<compile_context>
chip_gen: v6e
topology: v6e:2x2x1
jax: 0.10.0
libtpu: 0.0.40
codegen_flags: <defaults>
</compile_context>

<pallas_src>
import math
import numpy as np
import jax
import jax.numpy as jnp
from jax import lax
from jax.experimental import pallas as pl
from jax.experimental.pallas import tpu as pltpu

NEG_SLOPE = 0.01          # TODO(synk): confirm LeakyReLU slope used by ConvBlock/LinBlock
BN_EPS = 1e-5


def _align8(n):
    return -(-n // 8) * 8


# ----------------------------------------------------------------------------
# Parameter construction (deterministic; shapes/init match the PyTorch __init__)
# ----------------------------------------------------------------------------
def init_params(key, channels, n_layers, n_sample):
    n_stages = len(channels) - 1
    assert n_sample % (4 ** n_stages) == 0, "n_sample must be divisible by 4**(len(channels)-1)"
    keys = iter(jax.random.split(key, 256))
    nxt = lambda: next(keys)

    def conv_params(cin, cout):
        w = 0.02 * jax.random.normal(nxt(), (cout, cin, 3), jnp.float32)      # N(0, 0.02) (ref init)
        kb = 1.0 / np.sqrt(cin * 3)
        # tap-major rows: [0:cin)=k0 (x[l-1]), [cin:2cin)=k1 (x[l]), [2cin:3cin)=k2 (x[l+1])
        w_rows = jnp.concatenate([w[:, :, k].T for k in range(3)], axis=0)    # (3*Cin, Cout)
        return {'w': w_rows,
                'b': jax.random.uniform(nxt(), (1, cout), jnp.float32, -kb, kb),
                'g': 0.02 * jax.random.normal(nxt(), (1, cout), jnp.float32),  # BN weight N(0,0.02)
                'be': jnp.zeros((1, cout), jnp.float32)}                        # BN bias = 0

    stage_params = []
    for cin, cout in zip(channels[:-1], channels[1:]):
        k = 1.0 / np.sqrt(cin)
        u = lambda shape: jax.random.uniform(nxt(), shape, jnp.float32, -k, k)
        # GRU, gate order (r, z, n) along the concatenated column axis.
        wi = jnp.concatenate([u((cin, cin)) for _ in range(3)], axis=1)        # (C, 3C) input weights
        wh = jnp.concatenate([u((cin, cin)) for _ in range(3)], axis=1)        # (C, 3C) fused recurrent weights
        bir, biz, bin_, bhr, bhz, bhn = (u((1, cin)) for _ in range(6))
        bi = jnp.concatenate([bir + bhr, biz + bhz, bin_], axis=1)             # b_h{r,z} folded in
        c1, c2 = conv_params(cin, cout), conv_params(cout, cout)
        stage_params.append({'wi': wi, 'bi': bi, 'wh': wh, 'bhn': bhn,
                             'w1': c1['w'], 'b1': c1['b'], 'g1': c1['g'], 'be1': c1['be'],
                             'w2': c2['w'], 'b2': c2['b'], 'g2': c2['g'], 'be2': c2['be']})

    # h_dims = flip(2 ** int(linspace(0, log2(n), n_layers)))
    n = int(n_sample / 4 ** (len(channels) - 1)) * channels[-1]
    r = np.linspace(0.0, np.log2(float(n)), n_layers)
    h_dims = (2 ** r.astype(np.int64))[::-1]

    L_last = n_sample // (4 ** n_stages)
    C_last = channels[-1]
    assert int(h_dims[0]) == C_last * L_last, (h_dims, C_last, L_last)

    lin_params = []
    for i, (fin, fout) in enumerate(zip(h_dims[:-1], h_dims[1:])):
        fin, fout = int(fin), int(fout)
        kk = 1.0 / np.sqrt(fin)
        w = jax.random.uniform(nxt(), (fin, fout), jnp.float32, -kk, kk)
        b = jax.random.uniform(nxt(), (1, fout), jnp.float32, -kk, kk)
        if i == 0:
            # Fold Flatten(B, C, L): reorder columns (c*L + l) -> (l*C + c) so the in-kernel
            # lane-concat of per-timestep slices matches.
            w = w.reshape(C_last, L_last, fout).transpose(1, 0, 2).reshape(L_last * C_last, fout)
        lin_params.append({'w': w, 'b': b})
    return stage_params, lin_params


def _pack_slab(named_arrays):
    """Pack all parameters into ONE f32 slab (single HBM->VMEM DMA); 8-row-aligned offsets."""
    W = max(int(a.shape[1]) for _, a in named_arrays)
    layout, off = {}, 0
    for name, a in named_arrays:
        r, c = int(a.shape[0]), int(a.shape[1])
        layout[name] = (off, r, c)
        off += _align8(r)
    slab = np.zeros((off, W), np.float32)
    for name, a in named_arrays:
        o, r, c = layout[name]
        slab[o:o + r, :c] = np.asarray(a, np.float32)
    return jnp.asarray(slab), layout


# ----------------------------------------------------------------------------
# Fully fused forward pass (one pallas_call)
# ----------------------------------------------------------------------------
def build_discriminator_forward(B, channels, n_sample, stage_params, lin_params):
    n_stages = len(channels) - 1
    assert n_sample % (4 ** n_stages) == 0
    Ls = [n_sample // (4 ** s) for s in range(n_stages)]
    assert all(L % 4 == 0 for L in Ls), "every stage needs two factor-2 pools"
    Cins, Couts = list(channels[:-1]), list(channels[1:])
    L_last = n_sample // (4 ** n_stages)
    C_last = channels[-1]
    n_lin = len(lin_params)
    F_last = int(lin_params[-1]['w'].shape[-1])
    PAD = _align8(max(8, B))                       # aligned halo rows of padded activation buffers

    # GRU timestep chunking: spc timesteps per chunk so chunk rows = spc*B is sublane-aligned.
    steps_per_chunk = []
    for L in Ls:
        spc = 8 // B if (B <= 8 and 8 % B == 0 and L % (8 // B) == 0) else 1
        steps_per_chunk.append(spc)

    # -------- pack EVERY parameter into one slab -> 2 input DMAs total (x + slab) --------
    named = []
    for s, p in enumerate(stage_params):
        for k in ('wi', 'bi', 'wh', 'bhn', 'w1', 'b1', 'g1', 'be1', 'w2', 'b2', 'g2', 'be2'):
            named.append((f's{s}_{k}', p[k]))
    for i, lp_ in enumerate(lin_params):
        named.append((f'lin{i}_w', lp_['w']))
        named.append((f'lin{i}_b', lp_['b']))
    slab, layout = _pack_slab(named)

    # -------- VMEM scratch: every intermediate activation stays on-chip --------
    scratch_shapes, scratch_idx = [], {}

    def add_scratch(name, shape):
        scratch_idx[name] = len(scratch_shapes)
        scratch_shapes.append(pltpu.VMEM(shape, jnp.float32))

    for s in range(n_stages):
        L, Cin, Cout = Ls[s], Cins[s], Couts[s]
        add_scratch(f'xp{s}', (L * B, 3 * Cin))                      # hoisted GRU input projections
        add_scratch(f'gpad{s}', (PAD + L * B + PAD, Cin))            # padded GRU outputs (conv1 taps)
        add_scratch(f'ya{s}', (L * B, Cout))                         # pre-pool activations (conv1 & conv2)
        add_scratch(f'c1pad{s}', (PAD + (L // 2) * B + PAD, Cout))   # padded pooled conv1 (conv2 taps)
        if s + 1 < n_stages:
            add_scratch(f'xbuf{s + 1}', ((L // 4) * B, Cout))        # next-stage GRU input
    add_scratch('flat', (L_last * B, C_last))                        # pooled final activation

    def kernel(x_ref, slab_ref, out_ref, *scratch):
        scr = lambda name: scratch[scratch_idx[name]]

        def pv(name):                                   # static window into the parameter slab
            off, r, c = layout[name]
            return slab_ref[pl.ds(off, r), pl.ds(0, c)]

        leaky = lambda v: jnp.maximum(v, NEG_SLOPE * v)

        # ---- GRU: hoisted input projection + chunked recurrence, ONE fused gate matmul per step ----
        def gru(x_val, s):
            L, C = Ls[s], Cins[s]
            xp_ref, gpad_ref = scr(f'xp{s}'), scr(f'gpad{s}')
            # Input projections for ALL timesteps: one (L*B, C) @ (C, 3C) matmul.
            xp_ref[...] = jnp.dot(x_val, pv(f's{s}_wi'),
                                  preferred_element_type=jnp.float32) + pv(f's{s}_bi')
            zer = jnp.zeros((B, C), jnp.float32)
            gpad_ref[pl.ds(PAD - B, B), :] = zer                     # x[-1] halo
            gpad_ref[pl.ds(PAD + L * B, B), :] = zer                 # x[L]  halo
            wh_v = pv(f's{s}_wh')                                    # (C, 3C) fused (r|z|n) weights
            bhn_b = jnp.broadcast_to(pv(f's{s}_bhn'), (B, C))        # hoisted broadcast
            spc = steps_per_chunk[s]
            rows = spc * B
            g = math.gcd(PAD, rows)

            def chunk(c, h):
                r0 = pl.multiple_of(c * rows, rows)
                xp_chunk = xp_ref[pl.ds(r0, rows), :]                # one aligned (rows, 3C) load / chunk
                hs = []
                for j in range(spc):                                 # inner timesteps fully unrolled
                    xj = xp_chunk[j * B:(j + 1) * B, :]
                    hh = jnp.dot(h, wh_v, preferred_element_type=jnp.float32)  # one MXU issue / step
                    r = jax.nn.sigmoid(xj[:, 0:C] + hh[:, 0:C])
                    z = jax.nn.sigmoid(xj[:, C:2 * C] + hh[:, C:2 * C])
                    n = jnp.tanh(xj[:, 2 * C:3 * C] + r * (hh[:, 2 * C:3 * C] + bhn_b))
                    h = (1.0 - z) * n + z * h
                    hs.append(h)
                hc = jnp.concatenate(hs, axis=0) if spc > 1 else hs[0]
                w0 = PAD + c * rows
                if g > 1:
                    w0 = pl.multiple_of(w0, g)
                gpad_ref[pl.ds(w0, rows), :] = hc                    # one (aligned) store / chunk
                return h

            lax.fori_loop(0, L // spc, chunk, jnp.zeros((B, C), jnp.float32))

        # ---- ConvBlock: Conv1d(k=3,p=1) + BatchNorm (batch stats) + LeakyReLU + MaxPool1d(2) ----
        def conv_block(s, which, src_ref, L, Cin, Cout, dst_ref, dst_off):
            N = L * B
            w_v = pv(f's{s}_w{which}')                               # (3*Cin, Cout), tap-major rows
            xm = src_ref[pl.ds(PAD - B, N), :]                       # x[l-1]  (zero halo at l=0)
            x0 = src_ref[pl.ds(PAD, N), :]                           # x[l]
            xp = src_ref[pl.ds(PAD + B, N), :]                       # x[l+1]  (zero halo at l=L-1)
            y = (jnp.dot(xm, w_v[0:Cin], preferred_element_type=jnp.float32)
                 + jnp.dot(x0, w_v[Cin:2 * Cin], preferred_element_type=jnp.float32)
                 + jnp.dot(xp, w_v[2 * Cin:3 * Cin], preferred_element_type=jnp.float32)
                 + pv(f's{s}_b{which}'))
            # BatchNorm1d, training-mode batch stats over (B, L), biased var, eps=1e-5.
            inv_n = 1.0 / float(N)
            mean = jnp.sum(y, axis=0, keepdims=True) * inv_n
            d = y - mean
            var = jnp.sum(d * d, axis=0, keepdims=True) * inv_n
            ya = leaky(d * lax.rsqrt(var + BN_EPS) * pv(f's{s}_g{which}') + pv(f's{s}_be{which}'))
            ya_ref = scr(f'ya{s}')
            ya_ref[pl.ds(0, N), :] = ya
            # MaxPool1d(2): strided even/odd time-row reads + VPU max, strided store into the
            # destination buffer (no selector matmuls, no DMA'd 0/1 constants).
            Lh = L // 2
            for b in range(B):
                even = ya_ref[pl.ds(b, Lh, stride=2 * B), :]
                odd = ya_ref[pl.ds(b + B, Lh, stride=2 * B), :]
                dst_ref[pl.ds(dst_off + b, Lh, stride=B), :] = jnp.maximum(even, odd)
            # Dropout(p=0.0) -> identity.

        x = x_ref[...]                                               # (L0*B, C0), rows l-major (l*B + b)
        for s in range(n_stages):
            L, Cin, Cout = Ls[s], Cins[s], Couts[s]
            gru(x, s)
            c1pad_ref = scr(f'c1pad{s}')
            Lh = L // 2
            zc = jnp.zeros((B, Cout), jnp.float32)
            c1pad_ref[pl.ds(PAD - B, B), :] = zc
            c1pad_ref[pl.ds(PAD + Lh * B, B), :] = zc
            conv_block(s, 1, scr(f'gpad{s}'), L, Cin, Cout, c1pad_ref, PAD)   # -> (L/2)*B rows
            dst2 = scr(f'xbuf{s + 1}') if s + 1 < n_stages else scr('flat')
            conv_block(s, 2, c1pad_ref, Lh, Cout, Cout, dst2, 0)              # -> (L/4)*B rows
            if s + 1 < n_stages:
                x = dst2[...]

        # ---- Flatten + first Linear: lane-concat per-timestep slices -> ONE matmul ----
        fv = scr('flat')[...]                                        # (L_last*B, C_last)
        xcat = jnp.concatenate([fv[l * B:(l + 1) * B, :] for l in range(L_last)], axis=1)
        y = leaky(jnp.dot(xcat, pv('lin0_w'), preferred_element_type=jnp.float32) + pv('lin0_b'))
        for i in range(1, n_lin):
            y = leaky(jnp.dot(y, pv(f'lin{i}_w'), preferred_element_type=jnp.float32) + pv(f'lin{i}_b'))
        out_ref[...] = y

    def forward(x_bcl):
        # (B, C0, L0) -> (L0*B, C0) l-major rows; one tiny rearrangement outside the single kernel.
        x2 = jnp.transpose(x_bcl, (2, 0, 1)).reshape(Ls[0] * B, Cins[0])
        out = pl.pallas_call(
            kernel,
            out_shape=jax.ShapeDtypeStruct((B, F_last), jnp.float32),
            grid=(1,),
            in_specs=[pl.BlockSpec(x2.shape, lambda i: (0, 0)),
                      pl.BlockSpec(slab.shape, lambda i: (0, 0))],
            out_specs=pl.BlockSpec((B, F_last), lambda i: (0, 0)),
            scratch_shapes=scratch_shapes,
            compiler_params=pltpu.CompilerParams(dimension_semantics=("arbitrary",)),
        )(x2, slab)
        return out.reshape(B, 1, F_last)                             # (B, 1, 1) for the reference config

    return forward


if __name__ == "__main__":
    channels = [2, 4, 8]
    n_layers = 3
    n_sample = 64
    B = 2

    key = jax.random.PRNGKey(0)
    pkey, xkey = jax.random.split(key)
    stage_params, lin_params = init_params(pkey, channels, n_layers, n_sample)
    fwd = build_discriminator_forward(B, channels, n_sample, stage_params, lin_params)

    x = jax.random.normal(xkey, (B, channels[0], n_sample), jnp.float32)
    out = jax.block_until_ready(jax.jit(fwd)(x))
    assert out.shape == (B, 1, 1), out.shape
    assert bool(jnp.all(jnp.isfinite(out)))
    print("KERNEL_OK")
</pallas_src>

<mosaic_0001>
module attributes {stable_mosaic.version = 11 : i64} {
  func.func @kernel(%arg0: i32, %arg1: memref<128x2xf32, #tpu.memory_space<vmem>>, %arg2: memref<280x12xf32, #tpu.memory_space<vmem>>, %arg3: memref<2x1xf32, #tpu.memory_space<vmem>>, %arg4: memref<128x6xf32, #tpu.memory_space<vmem>>, %arg5: memref<144x2xf32, #tpu.memory_space<vmem>>, %arg6: memref<128x4xf32, #tpu.memory_space<vmem>>, %arg7: memref<80x4xf32, #tpu.memory_space<vmem>>, %arg8: memref<32x4xf32, #tpu.memory_space<vmem>>, %arg9: memref<32x12xf32, #tpu.memory_space<vmem>>, %arg10: memref<48x4xf32, #tpu.memory_space<vmem>>, %arg11: memref<32x8xf32, #tpu.memory_space<vmem>>, %arg12: memref<32x8xf32, #tpu.memory_space<vmem>>, %arg13: memref<8x8xf32, #tpu.memory_space<vmem>>) attributes {dimension_semantics = [#tpu.dimension_semantics<arbitrary>], iteration_bounds = array<i64: 1>, scalar_prefetch = 0 : i64, scratch_operands = 10 : i64, tpu.core_type = #tpu.core_type<tc>, window_params = [{pipeline_mode = #tpu.pipeline_mode<synchronous>, transform_indices = @transform_0, window_bounds = array<i64: 128, 2>}, {pipeline_mode = #tpu.pipeline_mode<synchronous>, transform_indices = @transform_1, window_bounds = array<i64: 280, 12>}, {pipeline_mode = #tpu.pipeline_mode<synchronous>, transform_indices = @transform_2, window_bounds = array<i64: 2, 1>}]} {
    %c0 = arith.constant 0 : index
    %c0_0 = arith.constant 0 : index
    %0 = vector.load %arg1[%c0, %c0_0] : memref<128x2xf32, #tpu.memory_space<vmem>>, vector<128x2xf32>
    %c0_1 = arith.constant 0 : index
    %c0_2 = arith.constant 0 : index
    %1 = vector.load %arg2[%c0_1, %c0_2] : memref<280x12xf32, #tpu.memory_space<vmem>>, vector<2x6xf32>
    %cst = arith.constant dense<0.000000e+00> : vector<128x6xf32>
    %2 = tpu.matmul %0, %1, %cst {dimension_numbers = #tpu.dot_dimension_numbers<[1], [0], [0], [1], [0, 0, 1, 1], [], []>} : vector<128x2xf32>, vector<2x6xf32>, vector<128x6xf32> -> vector<128x6xf32>
    %c8 = arith.constant 8 : index
    %c0_3 = arith.constant 0 : index
    %3 = vector.load %arg2[%c8, %c0_3] : memref<280x12xf32, #tpu.memory_space<vmem>>, vector<1x6xf32>
    %4 = vector.broadcast %3 : vector<1x6xf32> to vector<128x6xf32>
    %5 = arith.addf %2, %4 : vector<128x6xf32>
    %c0_4 = arith.constant 0 : index
    %c0_5 = arith.constant 0 : index
    %6 = vector.load %arg4[%c0_4, %c0_5] : memref<128x6xf32, #tpu.memory_space<vmem>>, vector<128x6xf32>
    tpu.vector_store %arg4[%c0_4, %c0_5], %5 {strides = array<i32>} : memref<128x6xf32, #tpu.memory_space<vmem>>, vector<128x6xf32>,
    %cst_6 = arith.constant 0.000000e+00 : f32
    %7 = vector.broadcast %cst_6 : f32 to vector<2x2xf32>
    %c6 = arith.constant 6 : index
    %c0_7 = arith.constant 0 : index
    %8 = vector.load %arg5[%c6, %c0_7] : memref<144x2xf32, #tpu.memory_space<vmem>>, vector<2x2xf32>
    tpu.vector_store %arg5[%c6, %c0_7], %7 {strides = array<i32>} : memref<144x2xf32, #tpu.memory_space<vmem>>, vector<2x2xf32>,
    %c136 = arith.constant 136 : index
    %c0_8 = arith.constant 0 : index
    %9 = vector.load %arg5[%c136, %c0_8] : memref<144x2xf32, #tpu.memory_space<vmem>>, vector<2x2xf32>
    tpu.vector_store %arg5[%c136, %c0_8], %7 {strides = array<i32>} : memref<144x2xf32, #tpu.memory_space<vmem>>, vector<2x2xf32>,
    %c16 = arith.constant 16 : index
    %c0_9 = arith.constant 0 : index
    %10 = vector.load %arg2[%c16, %c0_9] : memref<280x12xf32, #tpu.memory_space<vmem>>, vector<2x6xf32>
    %c24 = arith.constant 24 : index
    %c0_10 = arith.constant 0 : index
    %11 = vector.load %arg2[%c24, %c0_10] : memref<280x12xf32, #tpu.memory_space<vmem>>, vector<1x2xf32>
    %12 = vector.shape_cast %11 : vector<1x2xf32> to vector<1x2xf32>
    %13 = vector.broadcast %12 : vector<1x2xf32> to vector<2x2xf32>
    %cst_11 = arith.constant 0.000000e+00 : f32
    %14 = vector.broadcast %cst_11 : f32 to vector<2x2xf32>
    %c0_i32 = arith.constant 0 : i32
    %c16_i32 = arith.constant 16 : i32
    %15 = arith.addi %c0_i32, %c16_i32 : i32
    %c1_i32 = arith.constant 1 : i32
    %16 = scf.for %arg14 = %c0_i32 to %15 step %c1_i32 iter_args(%arg15 = %14) -> (vector<2x2xf32>)  : i32 {
      %c8_i32 = arith.constant 8 : i32
      %259 = arith.muli %arg14, %c8_i32 : i32
      %260 = tpu.assume_multiple %259, 8 : i32
      %261 = arith.index_cast %260 : i32 to index
      %c0_180 = arith.constant 0 : index
      %262 = vector.load %arg4[%261, %c0_180] : memref<128x6xf32, #tpu.memory_space<vmem>>, vector<8x6xf32>
      %263 = vector.extract_strided_slice %262 {offsets = [0, 0], sizes = [2, 6], strides = [1, 1]} : vector<8x6xf32> to vector<2x6xf32>
      %cst_181 = arith.constant dense<0.000000e+00> : vector<2x6xf32>
      %264 = tpu.matmul %arg15, %10, %cst_181 {dimension_numbers = #tpu.dot_dimension_numbers<[1], [0], [0], [1], [0, 0, 1, 1], [], []>} : vector<2x2xf32>, vector<2x6xf32>, vector<2x6xf32> -> vector<2x6xf32>
      %265 = vector.extract_strided_slice %263 {offsets = [0, 0], sizes = [2, 2], strides = [1, 1]} : vector<2x6xf32> to vector<2x2xf32>
      %266 = vector.extract_strided_slice %264 {offsets = [0, 0], sizes = [2, 2], strides = [1, 1]} : vector<2x6xf32> to vector<2x2xf32>
      %267 = arith.addf %265, %266 : vector<2x2xf32>
      %268 = arith.negf %267 : vector<2x2xf32>
      %269 = math.exp %268 : vector<2x2xf32>
      %cst_182 = arith.constant 1.000000e+00 : f32
      %270 = vector.broadcast %cst_182 : f32 to vector<2x2xf32>
      %271 = arith.addf %270, %269 : vector<2x2xf32>
      %272 = arith.divf %270, %271 : vector<2x2xf32>
      %273 = vector.extract_strided_slice %263 {offsets = [0, 2], sizes = [2, 2], strides = [1, 1]} : vector<2x6xf32> to vector<2x2xf32>
      %274 = vector.extract_strided_slice %264 {offsets = [0, 2], sizes = [2, 2], strides = [1, 1]} : vector<2x6xf32> to vector<2x2xf32>
      %275 = arith.addf %273, %274 : vector<2x2xf32>
      %276 = arith.negf %275 : vector<2x2xf32>
      %277 = math.exp %276 : vector<2x2xf32>
      %cst_183 = arith.constant 1.000000e+00 : f32
      %278 = vector.broadcast %cst_183 : f32 to vector<2x2xf32>
      %279 = arith.addf %278, %277 : vector<2x2xf32>
      %280 = arith.divf %278, %279 : vector<2x2xf32>
      %281 = vector.extract_strided_slice %263 {offsets = [0, 4], sizes = [2, 2], strides = [1, 1]} : vector<2x6xf32> to vector<2x2xf32>
      %282 = vector.extract_strided_slice %264 {offsets = [0, 4], sizes = [2, 2], strides = [1, 1]} : vector<2x6xf32> to vector<2x2xf32>
      %283 = arith.addf %282, %13 : vector<2x2xf32>
      %284 = arith.mulf %272, %283 : vector<2x2xf32>
      %285 = arith.addf %281, %284 : vector<2x2xf32>
      %286 = math.tanh %285 : vector<2x2xf32>
      %cst_184 = arith.constant 1.000000e+00 : f32
      %287 = vector.broadcast %cst_184 : f32 to vector<2x2xf32>
      %288 = arith.subf %287, %280 : vector<2x2xf32>
      %289 = arith.mulf %288, %286 : vector<2x2xf32>
      %290 = arith.mulf %280, %arg15 : vector<2x2xf32>
      %291 = arith.addf %289, %290 : vector<2x2xf32>
      %292 = vector.extract_strided_slice %262 {offsets = [2, 0], sizes = [2, 6], strides = [1, 1]} : vector<8x6xf32> to vector<2x6xf32>
      %cst_185 = arith.constant dense<0.000000e+00> : vector<2x6xf32>
      %293 = tpu.matmul %291, %10, %cst_185 {dimension_numbers = #tpu.dot_dimension_numbers<[1], [0], [0], [1], [0, 0, 1, 1], [], []>} : vector<2x2xf32>, vector<2x6xf32>, vector<2x6xf32> -> vector<2x6xf32>
      %294 = vector.extract_strided_slice %292 {offsets = [0, 0], sizes = [2, 2], strides = [1, 1]} : vector<2x6xf32> to vector<2x2xf32>
      %295 = vector.extract_strided_slice %293 {offsets = [0, 0], sizes = [2, 2], strides = [1, 1]} : vector<2x6xf32> to vector<2x2xf32>
      %296 = arith.addf %294, %295 : vector<2x2xf32>
      %297 = arith.negf %296 : vector<2x2xf32>
      %298 = math.exp %297 : vector<2x2xf32>
      %cst_186 = arith.constant 1.000000e+00 : f32
      %299 = vector.broadcast %cst_186 : f32 to vector<2x2xf32>
      %300 = arith.addf %299, %298 : vector<2x2xf32>
      %301 = arith.divf %299, %300 : vector<2x2xf32>
      %302 = vector.extract_strided_slice %292 {offsets = [0, 2], sizes = [2, 2], strides = [1, 1]} : vector<2x6xf32> to vector<2x2xf32>
      %303 = vector.extract_strided_slice %293 {offsets = [0, 2], sizes = [2, 2], strides = [1, 1]} : vector<2x6xf32> to vector<2x2xf32>
      %304 = arith.addf %302, %303 : vector<2x2xf32>
      %305 = arith.negf %304 : vector<2x2xf32>
      %306 = math.exp %305 : vector<2x2xf32>
      %cst_187 = arith.constant 1.000000e+00 : f32
      %307 = vector.broadcast %cst_187 : f32 to vector<2x2xf32>
      %308 = arith.addf %307, %306 : vector<2x2xf32>
      %309 = arith.divf %307, %308 : vector<2x2xf32>
      %310 = vector.extract_strided_slice %292 {offsets = [0, 4], sizes = [2, 2], strides = [1, 1]} : vector<2x6xf32> to vector<2x2xf32>
      %311 = vector.extract_strided_slice %293 {offsets = [0, 4], sizes = [2, 2], strides = [1, 1]} : vector<2x6xf32> to vector<2x2xf32>
      %312 = arith.addf %311, %13 : vector<2x2xf32>
      %313 = arith.mulf %301, %312 : vector<2x2xf32>
      %314 = arith.addf %310, %313 : vector<2x2xf32>
      %315 = math.tanh %314 : vector<2x2xf32>
      %cst_188 = arith.constant 1.000000e+00 : f32
      %316 = vector.broadcast %cst_188 : f32 to vector<2x2xf32>
      %317 = arith.subf %316, %309 : vector<2x2xf32>
      %318 = arith.mulf %317, %315 : vector<2x2xf32>
      %319 = arith.mulf %309, %291 : vector<2x2xf32>
      %320 = arith.addf %318, %319 : vector<2x2xf32>
      %321 = vector.extract_strided_slice %262 {offsets = [4, 0], sizes = [2, 6], strides = [1, 1]} : vector<8x6xf32> to vector<2x6xf32>
      %cst_189 = arith.constant dense<0.000000e+00> : vector<2x6xf32>
      %322 = tpu.matmul %320, %10, %cst_189 {dimension_numbers = #tpu.dot_dimension_numbers<[1], [0], [0], [1], [0, 0, 1, 1], [], []>} : vector<2x2xf32>, vector<2x6xf32>, vector<2x6xf32> -> vector<2x6xf32>
      %323 = vector.extract_strided_slice %321 {offsets = [0, 0], sizes = [2, 2], strides = [1, 1]} : vector<2x6xf32> to vector<2x2xf32>
      %324 = vector.extract_strided_slice %322 {offsets = [0, 0], sizes = [2, 2], strides = [1, 1]} : vector<2x6xf32> to vector<2x2xf32>
      %325 = arith.addf %323, %324 : vector<2x2xf32>
      %326 = arith.negf %325 : vector<2x2xf32>
      %327 = math.exp %326 : vector<2x2xf32>
      %cst_190 = arith.constant 1.000000e+00 : f32
      %328 = vector.broadcast %cst_190 : f32 to vector<2x2xf32>
      %329 = arith.addf %328, %327 : vector<2x2xf32>
      %330 = arith.divf %328, %329 : vector<2x2xf32>
      %331 = vector.extract_strided_slice %321 {offsets = [0, 2], sizes = [2, 2], strides = [1, 1]} : vector<2x6xf32> to vector<2x2xf32>
      %332 = vector.extract_strided_slice %322 {offsets = [0, 2], sizes = [2, 2], strides = [1, 1]} : vector<2x6xf32> to vector<2x2xf32>
      %333 = arith.addf %331, %332 : vector<2x2xf32>
      %334 = arith.negf %333 : vector<2x2xf32>
      %335 = math.exp %334 : vector<2x2xf32>
      %cst_191 = arith.constant 1.000000e+00 : f32
      %336 = vector.broadcast %cst_191 : f32 to vector<2x2xf32>
      %337 = arith.addf %336, %335 : vector<2x2xf32>
      %338 = arith.divf %336, %337 : vector<2x2xf32>
      %339 = vector.extract_strided_slice %321 {offsets = [0, 4], sizes = [2, 2], strides = [1, 1]} : vector<2x6xf32> to vector<2x2xf32>
      %340 = vector.extract_strided_slice %322 {offsets = [0, 4], sizes = [2, 2], strides = [1, 1]} : vector<2x6xf32> to vector<2x2xf32>
      %341 = arith.addf %340, %13 : vector<2x2xf32>
      %342 = arith.mulf %330, %341 : vector<2x2xf32>
      %343 = arith.addf %339, %342 : vector<2x2xf32>
      %344 = math.tanh %343 : vector<2x2xf32>
      %cst_192 = arith.constant 1.000000e+00 : f32
      %345 = vector.broadcast %cst_192 : f32 to vector<2x2xf32>
      %346 = arith.subf %345, %338 : vector<2x2xf32>
      %347 = arith.mulf %346, %344 : vector<2x2xf32>
      %348 = arith.mulf %338, %320 : vector<2x2xf32>
      %349 = arith.addf %347, %348 : vector<2x2xf32>
      %350 = vector.extract_strided_slice %262 {offsets = [6, 0], sizes = [2, 6], strides = [1, 1]} : vector<8x6xf32> to vector<2x6xf32>
      %cst_193 = arith.constant dense<0.000000e+00> : vector<2x6xf32>
      %351 = tpu.matmul %349, %10, %cst_193 {dimension_numbers = #tpu.dot_dimension_numbers<[1], [0], [0], [1], [0, 0, 1, 1], [], []>} : vector<2x2xf32>, vector<2x6xf32>, vector<2x6xf32> -> vector<2x6xf32>
      %352 = vector.extract_strided_slice %350 {offsets = [0, 0], sizes = [2, 2], strides = [1, 1]} : vector<2x6xf32> to vector<2x2xf32>
      %353 = vector.extract_strided_slice %351 {offsets = [0, 0], sizes = [2, 2], strides = [1, 1]} : vector<2x6xf32> to vector<2x2xf32>
      %354 = arith.addf %352, %353 : vector<2x2xf32>
      %355 = arith.negf %354 : vector<2x2xf32>
      %356 = math.exp %355 : vector<2x2xf32>
      %cst_194 = arith.constant 1.000000e+00 : f32
      %357 = vector.broadcast %cst_194 : f32 to vector<2x2xf32>
      %358 = arith.addf %357, %356 : vector<2x2xf32>
      %359 = arith.divf %357, %358 : vector<2x2xf32>
      %360 = vector.extract_strided_slice %350 {offsets = [0, 2], sizes = [2, 2], strides = [1, 1]} : vector<2x6xf32> to vector<2x2xf32>
      %361 = vector.extract_strided_slice %351 {offsets = [0, 2], sizes = [2, 2], strides = [1, 1]} : vector<2x6xf32> to vector<2x2xf32>
      %362 = arith.addf %360, %361 : vector<2x2xf32>
      %363 = arith.negf %362 : vector<2x2xf32>
      %364 = math.exp %363 : vector<2x2xf32>
      %cst_195 = arith.constant 1.000000e+00 : f32
      %365 = vector.broadcast %cst_195 : f32 to vector<2x2xf32>
      %366 = arith.addf %365, %364 : vector<2x2xf32>
      %367 = arith.divf %365, %366 : vector<2x2xf32>
      %368 = vector.extract_strided_slice %350 {offsets = [0, 4], sizes = [2, 2], strides = [1, 1]} : vector<2x6xf32> to vector<2x2xf32>
      %369 = vector.extract_strided_slice %351 {offsets = [0, 4], sizes = [2, 2], strides = [1, 1]} : vector<2x6xf32> to vector<2x2xf32>
      %370 = arith.addf %369, %13 : vector<2x2xf32>
      %371 = arith.mulf %359, %370 : vector<2x2xf32>
      %372 = arith.addf %368, %371 : vector<2x2xf32>
      %373 = math.tanh %372 : vector<2x2xf32>
      %cst_196 = arith.constant 1.000000e+00 : f32
      %374 = vector.broadcast %cst_196 : f32 to vector<2x2xf32>
      %375 = arith.subf %374, %367 : vector<2x2xf32>
      %376 = arith.mulf %375, %373 : vector<2x2xf32>
      %377 = arith.mulf %367, %349 : vector<2x2xf32>
      %378 = arith.addf %376, %377 : vector<2x2xf32>
      %379 = tpu.concatenate %291, %320, %349, %378 in 0 : vector<2x2xf32>, vector<2x2xf32>, vector<2x2xf32>, vector<2x2xf32> -> vector<8x2xf32>
      %c8_i32_197 = arith.constant 8 : i32
      %380 = arith.muli %arg14, %c8_i32_197 : i32
      %c8_i32_198 = arith.constant 8 : i32
      %381 = arith.addi %c8_i32_198, %380 : i32
      %382 = tpu.assume_multiple %381, 8 : i32
      %383 = arith.index_cast %382 : i32 to index
      %c0_199 = arith.constant 0 : index
      %384 = vector.load %arg5[%383, %c0_199] : memref<144x2xf32, #tpu.memory_space<vmem>>, vector<8x2xf32>
      tpu.vector_store %arg5[%383, %c0_199], %379 {strides = array<i32>} : memref<144x2xf32, #tpu.memory_space<vmem>>, vector<8x2xf32>,
      scf.yield %378 : vector<2x2xf32>
    }
    %c16_i32_12 = arith.constant 16 : i32
    %cst_13 = arith.constant 0.000000e+00 : f32
    %17 = vector.broadcast %cst_13 : f32 to vector<2x4xf32>
    %c6_14 = arith.constant 6 : index
    %c0_15 = arith.constant 0 : index
    %18 = vector.load %arg7[%c6_14, %c0_15] : memref<80x4xf32, #tpu.memory_space<vmem>>, vector<2x4xf32>
    tpu.vector_store %arg7[%c6_14, %c0_15], %17 {strides = array<i32>} : memref<80x4xf32, #tpu.memory_space<vmem>>, vector<2x4xf32>,
    %c72 = arith.constant 72 : index
    %c0_16 = arith.constant 0 : index
    %19 = vector.load %arg7[%c72, %c0_16] : memref<80x4xf32, #tpu.memory_space<vmem>>, vector<2x4xf32>
    tpu.vector_store %arg7[%c72, %c0_16], %17 {strides = array<i32>} : memref<80x4xf32, #tpu.memory_space<vmem>>, vector<2x4xf32>,
    %c32 = arith.constant 32 : index
    %c0_17 = arith.constant 0 : index
    %20 = vector.load %arg2[%c32, %c0_17] : memref<280x12xf32, #tpu.memory_space<vmem>>, vector<6x4xf32>
    %c6_18 = arith.constant 6 : index
    %c0_19 = arith.constant 0 : index
    %21 = vector.load %arg5[%c6_18, %c0_19] : memref<144x2xf32, #tpu.memory_space<vmem>>, vector<128x2xf32>
    %c8_20 = arith.constant 8 : index
    %c0_21 = arith.constant 0 : index
    %22 = vector.load %arg5[%c8_20, %c0_21] : memref<144x2xf32, #tpu.memory_space<vmem>>, vector<128x2xf32>
    %c10 = arith.constant 10 : index
    %c0_22 = arith.constant 0 : index
    %23 = vector.load %arg5[%c10, %c0_22] : memref<144x2xf32, #tpu.memory_space<vmem>>, vector<128x2xf32>
    %24 = vector.extract_strided_slice %20 {offsets = [0, 0], sizes = [2, 4], strides = [1, 1]} : vector<6x4xf32> to vector<2x4xf32>
    %cst_23 = arith.constant dense<0.000000e+00> : vector<128x4xf32>
    %25 = tpu.matmul %21, %24, %cst_23 {dimension_numbers = #tpu.dot_dimension_numbers<[1], [0], [0], [1], [0, 0, 1, 1], [], []>} : vector<128x2xf32>, vector<2x4xf32>, vector<128x4xf32> -> vector<128x4xf32>
    %26 = vector.extract_strided_slice %20 {offsets = [2, 0], sizes = [2, 4], strides = [1, 1]} : vector<6x4xf32> to vector<2x4xf32>
    %cst_24 = arith.constant dense<0.000000e+00> : vector<128x4xf32>
    %27 = tpu.matmul %22, %26, %cst_24 {dimension_numbers = #tpu.dot_dimension_numbers<[1], [0], [0], [1], [0, 0, 1, 1], [], []>} : vector<128x2xf32>, vector<2x4xf32>, vector<128x4xf32> -> vector<128x4xf32>
    %28 = arith.addf %25, %27 : vector<128x4xf32>
    %29 = vector.extract_strided_slice %20 {offsets = [4, 0], sizes = [2, 4], strides = [1, 1]} : vector<6x4xf32> to vector<2x4xf32>
    %cst_25 = arith.constant dense<0.000000e+00> : vector<128x4xf32>
    %30 = tpu.matmul %23, %29, %cst_25 {dimension_numbers = #tpu.dot_dimension_numbers<[1], [0], [0], [1], [0, 0, 1, 1], [], []>} : vector<128x2xf32>, vector<2x4xf32>, vector<128x4xf32> -> vector<128x4xf32>
    %31 = arith.addf %28, %30 : vector<128x4xf32>
    %c40 = arith.constant 40 : index
    %c0_26 = arith.constant 0 : index
    %32 = vector.load %arg2[%c40, %c0_26] : memref<280x12xf32, #tpu.memory_space<vmem>>, vector<1x4xf32>
    %33 = vector.broadcast %32 : vector<1x4xf32> to vector<128x4xf32>
    %34 = arith.addf %31, %33 : vector<128x4xf32>
    %cst_27 = arith.constant dense<0.000000e+00> : vector<4xf32>
    %35 = vector.multi_reduction <add>, %34, %cst_27 [0] : vector<128x4xf32> to vector<4xf32>
    %36 = vector.shape_cast %35 : vector<4xf32> to vector<1x4xf32>
    %cst_28 = arith.constant 7.812500e-03 : f32
    %37 = vector.broadcast %cst_28 : f32 to vector<1x4xf32>
    %38 = arith.mulf %36, %37 : vector<1x4xf32>
    %39 = vector.broadcast %38 : vector<1x4xf32> to vector<128x4xf32>
    %40 = arith.subf %34, %39 : vector<128x4xf32>
    %41 = arith.mulf %40, %40 : vector<128x4xf32>
    %cst_29 = arith.constant dense<0.000000e+00> : vector<4xf32>
    %42 = vector.multi_reduction <add>, %41, %cst_29 [0] : vector<128x4xf32> to vector<4xf32>
    %43 = vector.shape_cast %42 : vector<4xf32> to vector<1x4xf32>
    %cst_30 = arith.constant 7.812500e-03 : f32
    %44 = vector.broadcast %cst_30 : f32 to vector<1x4xf32>
    %45 = arith.mulf %43, %44 : vector<1x4xf32>
    %cst_31 = arith.constant 9.99999974E-6 : f32
    %46 = vector.broadcast %cst_31 : f32 to vector<1x4xf32>
    %47 = arith.addf %45, %46 : vector<1x4xf32>
    %48 = math.rsqrt %47 : vector<1x4xf32>
    %49 = vector.broadcast %48 : vector<1x4xf32> to vector<128x4xf32>
    %50 = arith.mulf %40, %49 : vector<128x4xf32>
    %c48 = arith.constant 48 : index
    %c0_32 = arith.constant 0 : index
    %51 = vector.load %arg2[%c48, %c0_32] : memref<280x12xf32, #tpu.memory_space<vmem>>, vector<1x4xf32>
    %52 = vector.broadcast %51 : vector<1x4xf32> to vector<128x4xf32>
    %53 = arith.mulf %50, %52 : vector<128x4xf32>
    %c56 = arith.constant 56 : index
    %c0_33 = arith.constant 0 : index
    %54 = vector.load %arg2[%c56, %c0_33] : memref<280x12xf32, #tpu.memory_space<vmem>>, vector<1x4xf32>
    %55 = vector.broadcast %54 : vector<1x4xf32> to vector<128x4xf32>
    %56 = arith.addf %53, %55 : vector<128x4xf32>
    %cst_34 = arith.constant 0.00999999977 : f32
    %57 = vector.broadcast %cst_34 : f32 to vector<128x4xf32>
    %58 = arith.mulf %57, %56 : vector<128x4xf32>
    %59 = arith.maximumf %56, %58 : vector<128x4xf32>
    %c0_35 = arith.constant 0 : index
    %c0_36 = arith.constant 0 : index
    %60 = vector.load %arg6[%c0_35, %c0_36] : memref<128x4xf32, #tpu.memory_space<vmem>>, vector<128x4xf32>
    tpu.vector_store %arg6[%c0_35, %c0_36], %59 {strides = array<i32>} : memref<128x4xf32, #tpu.memory_space<vmem>>, vector<128x4xf32>,
    %c0_37 = arith.constant 0 : index
    %c0_38 = arith.constant 0 : index
    %61 = tpu.strided_load %arg6[%c0_37, %c0_38] {strides = array<i32: 4, 1>} : memref<128x4xf32, #tpu.memory_space<vmem>>, vector<32x4xf32>
    %c2 = arith.constant 2 : index
    %c0_39 = arith.constant 0 : index
    %62 = tpu.strided_load %arg6[%c2, %c0_39] {strides = array<i32: 4, 1>} : memref<128x4xf32, #tpu.memory_space<vmem>>, vector<32x4xf32>
    %63 = arith.maximumf %61, %62 : vector<32x4xf32>
    %c8_40 = arith.constant 8 : index
    %c0_41 = arith.constant 0 : index
    %64 = tpu.strided_load %arg7[%c8_40, %c0_41] {strides = array<i32: 2, 1>} : memref<80x4xf32, #tpu.memory_space<vmem>>, vector<32x4xf32>
    tpu.strided_store %arg7[%c8_40, %c0_41], %63 {strides = array<i32: 2, 1>} : memref<80x4xf32, #tpu.memory_space<vmem>>, vector<32x4xf32>
    %c1 = arith.constant 1 : index
    %c0_42 = arith.constant 0 : index
    %65 = tpu.strided_load %arg6[%c1, %c0_42] {strides = array<i32: 4, 1>} : memref<128x4xf32, #tpu.memory_space<vmem>>, vector<32x4xf32>
    %c3 = arith.constant 3 : index
    %c0_43 = arith.constant 0 : index
    %66 = tpu.strided_load %arg6[%c3, %c0_43] {strides = array<i32: 4, 1>} : memref<128x4xf32, #tpu.memory_space<vmem>>, vector<32x4xf32>
    %67 = arith.maximumf %65, %66 : vector<32x4xf32>
    %c9 = arith.constant 9 : index
    %c0_44 = arith.constant 0 : index
    %68 = tpu.strided_load %arg7[%c9, %c0_44] {strides = array<i32: 2, 1>} : memref<80x4xf32, #tpu.memory_space<vmem>>, vector<32x4xf32>
    tpu.strided_store %arg7[%c9, %c0_44], %67 {strides = array<i32: 2, 1>} : memref<80x4xf32, #tpu.memory_space<vmem>>, vector<32x4xf32>
    %c64 = arith.constant 64 : index
    %c0_45 = arith.constant 0 : index
    %69 = vector.load %arg2[%c64, %c0_45] : memref<280x12xf32, #tpu.memory_space<vmem>>, vector<12x4xf32>
    %c6_46 = arith.constant 6 : index
    %c0_47 = arith.constant 0 : index
    %70 = vector.load %arg7[%c6_46, %c0_47] : memref<80x4xf32, #tpu.memory_space<vmem>>, vector<64x4xf32>
    %c8_48 = arith.constant 8 : index
    %c0_49 = arith.constant 0 : index
    %71 = vector.load %arg7[%c8_48, %c0_49] : memref<80x4xf32, #tpu.memory_space<vmem>>, vector<64x4xf32>
    %c10_50 = arith.constant 10 : index
    %c0_51 = arith.constant 0 : index
    %72 = vector.load %arg7[%c10_50, %c0_51] : memref<80x4xf32, #tpu.memory_space<vmem>>, vector<64x4xf32>
    %73 = vector.extract_strided_slice %69 {offsets = [0, 0], sizes = [4, 4], strides = [1, 1]} : vector<12x4xf32> to vector<4x4xf32>
    %cst_52 = arith.constant dense<0.000000e+00> : vector<64x4xf32>
    %74 = tpu.matmul %70, %73, %cst_52 {dimension_numbers = #tpu.dot_dimension_numbers<[1], [0], [0], [1], [0, 0, 1, 1], [], []>} : vector<64x4xf32>, vector<4x4xf32>, vector<64x4xf32> -> vector<64x4xf32>
    %75 = vector.extract_strided_slice %69 {offsets = [4, 0], sizes = [4, 4], strides = [1, 1]} : vector<12x4xf32> to vector<4x4xf32>
    %cst_53 = arith.constant dense<0.000000e+00> : vector<64x4xf32>
    %76 = tpu.matmul %71, %75, %cst_53 {dimension_numbers = #tpu.dot_dimension_numbers<[1], [0], [0], [1], [0, 0, 1, 1], [], []>} : vector<64x4xf32>, vector<4x4xf32>, vector<64x4xf32> -> vector<64x4xf32>
    %77 = arith.addf %74, %76 : vector<64x4xf32>
    %78 = vector.extract_strided_slice %69 {offsets = [8, 0], sizes = [4, 4], strides = [1, 1]} : vector<12x4xf32> to vector<4x4xf32>
    %cst_54 = arith.constant dense<0.000000e+00> : vector<64x4xf32>
    %79 = tpu.matmul %72, %78, %cst_54 {dimension_numbers = #tpu.dot_dimension_numbers<[1], [0], [0], [1], [0, 0, 1, 1], [], []>} : vector<64x4xf32>, vector<4x4xf32>, vector<64x4xf32> -> vector<64x4xf32>
    %80 = arith.addf %77, %79 : vector<64x4xf32>
    %c80 = arith.constant 80 : index
    %c0_55 = arith.constant 0 : index
    %81 = vector.load %arg2[%c80, %c0_55] : memref<280x12xf32, #tpu.memory_space<vmem>>, vector<1x4xf32>
    %82 = vector.broadcast %81 : vector<1x4xf32> to vector<64x4xf32>
    %83 = arith.addf %80, %82 : vector<64x4xf32>
    %cst_56 = arith.constant dense<0.000000e+00> : vector<4xf32>
    %84 = vector.multi_reduction <add>, %83, %cst_56 [0] : vector<64x4xf32> to vector<4xf32>
    %85 = vector.shape_cast %84 : vector<4xf32> to vector<1x4xf32>
    %cst_57 = arith.constant 1.562500e-02 : f32
    %86 = vector.broadcast %cst_57 : f32 to vector<1x4xf32>
    %87 = arith.mulf %85, %86 : vector<1x4xf32>
    %88 = vector.broadcast %87 : vector<1x4xf32> to vector<64x4xf32>
    %89 = arith.subf %83, %88 : vector<64x4xf32>
    %90 = arith.mulf %89, %89 : vector<64x4xf32>
    %cst_58 = arith.constant dense<0.000000e+00> : vector<4xf32>
    %91 = vector.multi_reduction <add>, %90, %cst_58 [0] : vector<64x4xf32> to vector<4xf32>
    %92 = vector.shape_cast %91 : vector<4xf32> to vector<1x4xf32>
    %cst_59 = arith.constant 1.562500e-02 : f32
    %93 = vector.broadcast %cst_59 : f32 to vector<1x4xf32>
    %94 = arith.mulf %92, %93 : vector<1x4xf32>
    %cst_60 = arith.constant 9.99999974E-6 : f32
    %95 = vector.broadcast %cst_60 : f32 to vector<1x4xf32>
    %96 = arith.addf %94, %95 : vector<1x4xf32>
    %97 = math.rsqrt %96 : vector<1x4xf32>
    %98 = vector.broadcast %97 : vector<1x4xf32> to vector<64x4xf32>
    %99 = arith.mulf %89, %98 : vector<64x4xf32>
    %c88 = arith.constant 88 : index
    %c0_61 = arith.constant 0 : index
    %100 = vector.load %arg2[%c88, %c0_61] : memref<280x12xf32, #tpu.memory_space<vmem>>, vector<1x4xf32>
    %101 = vector.broadcast %100 : vector<1x4xf32> to vector<64x4xf32>
    %102 = arith.mulf %99, %101 : vector<64x4xf32>
    %c96 = arith.constant 96 : index
    %c0_62 = arith.constant 0 : index
    %103 = vector.load %arg2[%c96, %c0_62] : memref<280x12xf32, #tpu.memory_space<vmem>>, vector<1x4xf32>
    %104 = vector.broadcast %103 : vector<1x4xf32> to vector<64x4xf32>
    %105 = arith.addf %102, %104 : vector<64x4xf32>
    %cst_63 = arith.constant 0.00999999977 : f32
    %106 = vector.broadcast %cst_63 : f32 to vector<64x4xf32>
    %107 = arith.mulf %106, %105 : vector<64x4xf32>
    %108 = arith.maximumf %105, %107 : vector<64x4xf32>
    %c0_64 = arith.constant 0 : index
    %c0_65 = arith.constant 0 : index
    %109 = vector.load %arg6[%c0_64, %c0_65] : memref<128x4xf32, #tpu.memory_space<vmem>>, vector<64x4xf32>
    tpu.vector_store %arg6[%c0_64, %c0_65], %108 {strides = array<i32>} : memref<128x4xf32, #tpu.memory_space<vmem>>, vector<64x4xf32>,
    %c0_66 = arith.constant 0 : index
    %c0_67 = arith.constant 0 : index
    %110 = tpu.strided_load %arg6[%c0_66, %c0_67] {strides = array<i32: 4, 1>} : memref<128x4xf32, #tpu.memory_space<vmem>>, vector<16x4xf32>
    %c2_68 = arith.constant 2 : index
    %c0_69 = arith.constant 0 : index
    %111 = tpu.strided_load %arg6[%c2_68, %c0_69] {strides = array<i32: 4, 1>} : memref<128x4xf32, #tpu.memory_space<vmem>>, vector<16x4xf32>
    %112 = arith.maximumf %110, %111 : vector<16x4xf32>
    %c0_70 = arith.constant 0 : index
    %c0_71 = arith.constant 0 : index
    %113 = tpu.strided_load %arg8[%c0_70, %c0_71] {strides = array<i32: 2, 1>} : memref<32x4xf32, #tpu.memory_space<vmem>>, vector<16x4xf32>
    tpu.strided_store %arg8[%c0_70, %c0_71], %112 {strides = array<i32: 2, 1>} : memref<32x4xf32, #tpu.memory_space<vmem>>, vector<16x4xf32>
    %c1_72 = arith.constant 1 : index
    %c0_73 = arith.constant 0 : index
    %114 = tpu.strided_load %arg6[%c1_72, %c0_73] {strides = array<i32: 4, 1>} : memref<128x4xf32, #tpu.memory_space<vmem>>, vector<16x4xf32>
    %c3_74 = arith.constant 3 : index
    %c0_75 = arith.constant 0 : index
    %115 = tpu.strided_load %arg6[%c3_74, %c0_75] {strides = array<i32: 4, 1>} : memref<128x4xf32, #tpu.memory_space<vmem>>, vector<16x4xf32>
    %116 = arith.maximumf %114, %115 : vector<16x4xf32>
    %c1_76 = arith.constant 1 : index
    %c0_77 = arith.constant 0 : index
    %117 = tpu.strided_load %arg8[%c1_76, %c0_77] {strides = array<i32: 2, 1>} : memref<32x4xf32, #tpu.memory_space<vmem>>, vector<16x4xf32>
    tpu.strided_store %arg8[%c1_76, %c0_77], %116 {strides = array<i32: 2, 1>} : memref<32x4xf32, #tpu.memory_space<vmem>>, vector<16x4xf32>
    %c0_78 = arith.constant 0 : index
    %c0_79 = arith.constant 0 : index
    %118 = vector.load %arg8[%c0_78, %c0_79] : memref<32x4xf32, #tpu.memory_space<vmem>>, vector<32x4xf32>
    %c104 = arith.constant 104 : index
    %c0_80 = arith.constant 0 : index
    %119 = vector.load %arg2[%c104, %c0_80] : memref<280x12xf32, #tpu.memory_space<vmem>>, vector<4x12xf32>
    %cst_81 = arith.constant dense<0.000000e+00> : vector<32x12xf32>
    %120 = tpu.matmul %118, %119, %cst_81 {dimension_numbers = #tpu.dot_dimension_numbers<[1], [0], [0], [1], [0, 0, 1, 1], [], []>} : vector<32x4xf32>, vector<4x12xf32>, vector<32x12xf32> -> vector<32x12xf32>
    %c112 = arith.constant 112 : index
    %c0_82 = arith.constant 0 : index
    %121 = vector.load %arg2[%c112, %c0_82] : memref<280x12xf32, #tpu.memory_space<vmem>>, vector<1x12xf32>
    %122 = vector.broadcast %121 : vector<1x12xf32> to vector<32x12xf32>
    %123 = arith.addf %120, %122 : vector<32x12xf32>
    %c0_83 = arith.constant 0 : index
    %c0_84 = arith.constant 0 : index
    %124 = vector.load %arg9[%c0_83, %c0_84] : memref<32x12xf32, #tpu.memory_space<vmem>>, vector<32x12xf32>
    tpu.vector_store %arg9[%c0_83, %c0_84], %123 {strides = array<i32>} : memref<32x12xf32, #tpu.memory_space<vmem>>, vector<32x12xf32>,
    %cst_85 = arith.constant 0.000000e+00 : f32
    %125 = vector.broadcast %cst_85 : f32 to vector<2x4xf32>
    %c6_86 = arith.constant 6 : index
    %c0_87 = arith.constant 0 : index
    %126 = vector.load %arg10[%c6_86, %c0_87] : memref<48x4xf32, #tpu.memory_space<vmem>>, vector<2x4xf32>
    tpu.vector_store %arg10[%c6_86, %c0_87], %125 {strides = array<i32>} : memref<48x4xf32, #tpu.memory_space<vmem>>, vector<2x4xf32>,
    %c40_88 = arith.constant 40 : index
    %c0_89 = arith.constant 0 : index
    %127 = vector.load %arg10[%c40_88, %c0_89] : memref<48x4xf32, #tpu.memory_space<vmem>>, vector<2x4xf32>
    tpu.vector_store %arg10[%c40_88, %c0_89], %125 {strides = array<i32>} : memref<48x4xf32, #tpu.memory_space<vmem>>, vector<2x4xf32>,
    %c120 = arith.constant 120 : index
    %c0_90 = arith.constant 0 : index
    %128 = vector.load %arg2[%c120, %c0_90] : memref<280x12xf32, #tpu.memory_space<vmem>>, vector<4x12xf32>
    %c128 = arith.constant 128 : index
    %c0_91 = arith.constant 0 : index
    %129 = vector.load %arg2[%c128, %c0_91] : memref<280x12xf32, #tpu.memory_space<vmem>>, vector<1x4xf32>
    %130 = vector.shape_cast %129 : vector<1x4xf32> to vector<1x4xf32>
    %131 = vector.broadcast %130 : vector<1x4xf32> to vector<2x4xf32>
    %cst_92 = arith.constant 0.000000e+00 : f32
    %132 = vector.broadcast %cst_92 : f32 to vector<2x4xf32>
    %c0_i32_93 = arith.constant 0 : i32
    %c4_i32 = arith.constant 4 : i32
    %133 = arith.addi %c0_i32_93, %c4_i32 : i32
    %c1_i32_94 = arith.constant 1 : i32
    %134 = scf.for %arg14 = %c0_i32_93 to %133 step %c1_i32_94 iter_args(%arg15 = %132) -> (vector<2x4xf32>)  : i32 {
      %c8_i32 = arith.constant 8 : i32
      %259 = arith.muli %arg14, %c8_i32 : i32
      %260 = tpu.assume_multiple %259, 8 : i32
      %261 = arith.index_cast %260 : i32 to index
      %c0_180 = arith.constant 0 : index
      %262 = vector.load %arg9[%261, %c0_180] : memref<32x12xf32, #tpu.memory_space<vmem>>, vector<8x12xf32>
      %263 = vector.extract_strided_slice %262 {offsets = [0, 0], sizes = [2, 12], strides = [1, 1]} : vector<8x12xf32> to vector<2x12xf32>
      %cst_181 = arith.constant dense<0.000000e+00> : vector<2x12xf32>
      %264 = tpu.matmul %arg15, %128, %cst_181 {dimension_numbers = #tpu.dot_dimension_numbers<[1], [0], [0], [1], [0, 0, 1, 1], [], []>} : vector<2x4xf32>, vector<4x12xf32>, vector<2x12xf32> -> vector<2x12xf32>
      %265 = vector.extract_strided_slice %263 {offsets = [0, 0], sizes = [2, 4], strides = [1, 1]} : vector<2x12xf32> to vector<2x4xf32>
      %266 = vector.extract_strided_slice %264 {offsets = [0, 0], sizes = [2, 4], strides = [1, 1]} : vector<2x12xf32> to vector<2x4xf32>
      %267 = arith.addf %265, %266 : vector<2x4xf32>
      %268 = arith.negf %267 : vector<2x4xf32>
      %269 = math.exp %268 : vector<2x4xf32>
      %cst_182 = arith.constant 1.000000e+00 : f32
      %270 = vector.broadcast %cst_182 : f32 to vector<2x4xf32>
      %271 = arith.addf %270, %269 : vector<2x4xf32>
      %272 = arith.divf %270, %271 : vector<2x4xf32>
      %273 = vector.extract_strided_slice %263 {offsets = [0, 4], sizes = [2, 4], strides = [1, 1]} : vector<2x12xf32> to vector<2x4xf32>
      %274 = vector.extract_strided_slice %264 {offsets = [0, 4], sizes = [2, 4], strides = [1, 1]} : vector<2x12xf32> to vector<2x4xf32>
      %275 = arith.addf %273, %274 : vector<2x4xf32>
      %276 = arith.negf %275 : vector<2x4xf32>
      %277 = math.exp %276 : vector<2x4xf32>
      %cst_183 = arith.constant 1.000000e+00 : f32
      %278 = vector.broadcast %cst_183 : f32 to vector<2x4xf32>
      %279 = arith.addf %278, %277 : vector<2x4xf32>
      %280 = arith.divf %278, %279 : vector<2x4xf32>
      %281 = vector.extract_strided_slice %263 {offsets = [0, 8], sizes = [2, 4], strides = [1, 1]} : vector<2x12xf32> to vector<2x4xf32>
      %282 = vector.extract_strided_slice %264 {offsets = [0, 8], sizes = [2, 4], strides = [1, 1]} : vector<2x12xf32> to vector<2x4xf32>
      %283 = arith.addf %282, %131 : vector<2x4xf32>
      %284 = arith.mulf %272, %283 : vector<2x4xf32>
      %285 = arith.addf %281, %284 : vector<2x4xf32>
      %286 = math.tanh %285 : vector<2x4xf32>
      %cst_184 = arith.constant 1.000000e+00 : f32
      %287 = vector.broadcast %cst_184 : f32 to vector<2x4xf32>
      %288 = arith.subf %287, %280 : vector<2x4xf32>
      %289 = arith.mulf %288, %286 : vector<2x4xf32>
      %290 = arith.mulf %280, %arg15 : vector<2x4xf32>
      %291 = arith.addf %289, %290 : vector<2x4xf32>
      %292 = vector.extract_strided_slice %262 {offsets = [2, 0], sizes = [2, 12], strides = [1, 1]} : vector<8x12xf32> to vector<2x12xf32>
      %cst_185 = arith.constant dense<0.000000e+00> : vector<2x12xf32>
      %293 = tpu.matmul %291, %128, %cst_185 {dimension_numbers = #tpu.dot_dimension_numbers<[1], [0], [0], [1], [0, 0, 1, 1], [], []>} : vector<2x4xf32>, vector<4x12xf32>, vector<2x12xf32> -> vector<2x12xf32>
      %294 = vector.extract_strided_slice %292 {offsets = [0, 0], sizes = [2, 4], strides = [1, 1]} : vector<2x12xf32> to vector<2x4xf32>
      %295 = vector.extract_strided_slice %293 {offsets = [0, 0], sizes = [2, 4], strides = [1, 1]} : vector<2x12xf32> to vector<2x4xf32>
      %296 = arith.addf %294, %295 : vector<2x4xf32>
      %297 = arith.negf %296 : vector<2x4xf32>
      %298 = math.exp %297 : vector<2x4xf32>
      %cst_186 = arith.constant 1.000000e+00 : f32
      %299 = vector.broadcast %cst_186 : f32 to vector<2x4xf32>
      %300 = arith.addf %299, %298 : vector<2x4xf32>
      %301 = arith.divf %299, %300 : vector<2x4xf32>
      %302 = vector.extract_strided_slice %292 {offsets = [0, 4], sizes = [2, 4], strides = [1, 1]} : vector<2x12xf32> to vector<2x4xf32>
      %303 = vector.extract_strided_slice %293 {offsets = [0, 4], sizes = [2, 4], strides = [1, 1]} : vector<2x12xf32> to vector<2x4xf32>
      %304 = arith.addf %302, %303 : vector<2x4xf32>
      %305 = arith.negf %304 : vector<2x4xf32>
      %306 = math.exp %305 : vector<2x4xf32>
      %cst_187 = arith.constant 1.000000e+00 : f32
      %307 = vector.broadcast %cst_187 : f32 to vector<2x4xf32>
      %308 = arith.addf %307, %306 : vector<2x4xf32>
      %309 = arith.divf %307, %308 : vector<2x4xf32>
      %310 = vector.extract_strided_slice %292 {offsets = [0, 8], sizes = [2, 4], strides = [1, 1]} : vector<2x12xf32> to vector<2x4xf32>
      %311 = vector.extract_strided_slice %293 {offsets = [0, 8], sizes = [2, 4], strides = [1, 1]} : vector<2x12xf32> to vector<2x4xf32>
      %312 = arith.addf %311, %131 : vector<2x4xf32>
      %313 = arith.mulf %301, %312 : vector<2x4xf32>
      %314 = arith.addf %310, %313 : vector<2x4xf32>
      %315 = math.tanh %314 : vector<2x4xf32>
      %cst_188 = arith.constant 1.000000e+00 : f32
      %316 = vector.broadcast %cst_188 : f32 to vector<2x4xf32>
      %317 = arith.subf %316, %309 : vector<2x4xf32>
      %318 = arith.mulf %317, %315 : vector<2x4xf32>
      %319 = arith.mulf %309, %291 : vector<2x4xf32>
      %320 = arith.addf %318, %319 : vector<2x4xf32>
      %321 = vector.extract_strided_slice %262 {offsets = [4, 0], sizes = [2, 12], strides = [1, 1]} : vector<8x12xf32> to vector<2x12xf32>
      %cst_189 = arith.constant dense<0.000000e+00> : vector<2x12xf32>
      %322 = tpu.matmul %320, %128, %cst_189 {dimension_numbers = #tpu.dot_dimension_numbers<[1], [0], [0], [1], [0, 0, 1, 1], [], []>} : vector<2x4xf32>, vector<4x12xf32>, vector<2x12xf32> -> vector<2x12xf32>
      %323 = vector.extract_strided_slice %321 {offsets = [0, 0], sizes = [2, 4], strides = [1, 1]} : vector<2x12xf32> to vector<2x4xf32>
      %324 = vector.extract_strided_slice %322 {offsets = [0, 0], sizes = [2, 4], strides = [1, 1]} : vector<2x12xf32> to vector<2x4xf32>
      %325 = arith.addf %323, %324 : vector<2x4xf32>
      %326 = arith.negf %325 : vector<2x4xf32>
      %327 = math.exp %326 : vector<2x4xf32>
      %cst_190 = arith.constant 1.000000e+00 : f32
      %328 = vector.broadcast %cst_190 : f32 to vector<2x4xf32>
      %329 = arith.addf %328, %327 : vector<2x4xf32>
      %330 = arith.divf %328, %329 : vector<2x4xf32>
      %331 = vector.extract_strided_slice %321 {offsets = [0, 4], sizes = [2, 4], strides = [1, 1]} : vector<2x12xf32> to vector<2x4xf32>
      %332 = vector.extract_strided_slice %322 {offsets = [0, 4], sizes = [2, 4], strides = [1, 1]} : vector<2x12xf32> to vector<2x4xf32>
      %333 = arith.addf %331, %332 : vector<2x4xf32>
      %334 = arith.negf %333 : vector<2x4xf32>
      %335 = math.exp %334 : vector<2x4xf32>
      %cst_191 = arith.constant 1.000000e+00 : f32
      %336 = vector.broadcast %cst_191 : f32 to vector<2x4xf32>
      %337 = arith.addf %336, %335 : vector<2x4xf32>
      %338 = arith.divf %336, %337 : vector<2x4xf32>
      %339 = vector.extract_strided_slice %321 {offsets = [0, 8], sizes = [2, 4], strides = [1, 1]} : vector<2x12xf32> to vector<2x4xf32>
      %340 = vector.extract_strided_slice %322 {offsets = [0, 8], sizes = [2, 4], strides = [1, 1]} : vector<2x12xf32> to vector<2x4xf32>
      %341 = arith.addf %340, %131 : vector<2x4xf32>
      %342 = arith.mulf %330, %341 : vector<2x4xf32>
      %343 = arith.addf %339, %342 : vector<2x4xf32>
      %344 = math.tanh %343 : vector<2x4xf32>
      %cst_192 = arith.constant 1.000000e+00 : f32
      %345 = vector.broadcast %cst_192 : f32 to vector<2x4xf32>
      %346 = arith.subf %345, %338 : vector<2x4xf32>
      %347 = arith.mulf %346, %344 : vector<2x4xf32>
      %348 = arith.mulf %338, %320 : vector<2x4xf32>
      %349 = arith.addf %347, %348 : vector<2x4xf32>
      %350 = vector.extract_strided_slice %262 {offsets = [6, 0], sizes = [2, 12], strides = [1, 1]} : vector<8x12xf32> to vector<2x12xf32>
      %cst_193 = arith.constant dense<0.000000e+00> : vector<2x12xf32>
      %351 = tpu.matmul %349, %128, %cst_193 {dimension_numbers = #tpu.dot_dimension_numbers<[1], [0], [0], [1], [0, 0, 1, 1], [], []>} : vector<2x4xf32>, vector<4x12xf32>, vector<2x12xf32> -> vector<2x12xf32>
      %352 = vector.extract_strided_slice %350 {offsets = [0, 0], sizes = [2, 4], strides = [1, 1]} : vector<2x12xf32> to vector<2x4xf32>
      %353 = vector.extract_strided_slice %351 {offsets = [0, 0], sizes = [2, 4], strides = [1, 1]} : vector<2x12xf32> to vector<2x4xf32>
      %354 = arith.addf %352, %353 : vector<2x4xf32>
      %355 = arith.negf %354 : vector<2x4xf32>
      %356 = math.exp %355 : vector<2x4xf32>
      %cst_194 = arith.constant 1.000000e+00 : f32
      %357 = vector.broadcast %cst_194 : f32 to vector<2x4xf32>
      %358 = arith.addf %357, %356 : vector<2x4xf32>
      %359 = arith.divf %357, %358 : vector<2x4xf32>
      %360 = vector.extract_strided_slice %350 {offsets = [0, 4], sizes = [2, 4], strides = [1, 1]} : vector<2x12xf32> to vector<2x4xf32>
      %361 = vector.extract_strided_slice %351 {offsets = [0, 4], sizes = [2, 4], strides = [1, 1]} : vector<2x12xf32> to vector<2x4xf32>
      %362 = arith.addf %360, %361 : vector<2x4xf32>
      %363 = arith.negf %362 : vector<2x4xf32>
      %364 = math.exp %363 : vector<2x4xf32>
      %cst_195 = arith.constant 1.000000e+00 : f32
      %365 = vector.broadcast %cst_195 : f32 to vector<2x4xf32>
      %366 = arith.addf %365, %364 : vector<2x4xf32>
      %367 = arith.divf %365, %366 : vector<2x4xf32>
      %368 = vector.extract_strided_slice %350 {offsets = [0, 8], sizes = [2, 4], strides = [1, 1]} : vector<2x12xf32> to vector<2x4xf32>
      %369 = vector.extract_strided_slice %351 {offsets = [0, 8], sizes = [2, 4], strides = [1, 1]} : vector<2x12xf32> to vector<2x4xf32>
      %370 = arith.addf %369, %131 : vector<2x4xf32>
      %371 = arith.mulf %359, %370 : vector<2x4xf32>
      %372 = arith.addf %368, %371 : vector<2x4xf32>
      %373 = math.tanh %372 : vector<2x4xf32>
      %cst_196 = arith.constant 1.000000e+00 : f32
      %374 = vector.broadcast %cst_196 : f32 to vector<2x4xf32>
      %375 = arith.subf %374, %367 : vector<2x4xf32>
      %376 = arith.mulf %375, %373 : vector<2x4xf32>
      %377 = arith.mulf %367, %349 : vector<2x4xf32>
      %378 = arith.addf %376, %377 : vector<2x4xf32>
      %379 = tpu.concatenate %291, %320, %349, %378 in 0 : vector<2x4xf32>, vector<2x4xf32>, vector<2x4xf32>, vector<2x4xf32> -> vector<8x4xf32>
      %c8_i32_197 = arith.constant 8 : i32
      %380 = arith.muli %arg14, %c8_i32_197 : i32
      %c8_i32_198 = arith.constant 8 : i32
      %381 = arith.addi %c8_i32_198, %380 : i32
      %382 = tpu.assume_multiple %381, 8 : i32
      %383 = arith.index_cast %382 : i32 to index
      %c0_199 = arith.constant 0 : index
      %384 = vector.load %arg10[%383, %c0_199] : memref<48x4xf32, #tpu.memory_space<vmem>>, vector<8x4xf32>
      tpu.vector_store %arg10[%383, %c0_199], %379 {strides = array<i32>} : memref<48x4xf32, #tpu.memory_space<vmem>>, vector<8x4xf32>,
      scf.yield %378 : vector<2x4xf32>
    }
    %c4_i32_95 = arith.constant 4 : i32
    %cst_96 = arith.constant 0.000000e+00 : f32
    %135 = vector.broadcast %cst_96 : f32 to vector<2x8xf32>
    %c6_97 = arith.constant 6 : index
    %c0_98 = arith.constant 0 : index
    %136 = vector.load %arg12[%c6_97, %c0_98] : memref<32x8xf32, #tpu.memory_space<vmem>>, vector<2x8xf32>
    tpu.vector_store %arg12[%c6_97, %c0_98], %135 {strides = array<i32>} : memref<32x8xf32, #tpu.memory_space<vmem>>, vector<2x8xf32>,
    %c24_99 = arith.constant 24 : index
    %c0_100 = arith.constant 0 : index
    %137 = vector.load %arg12[%c24_99, %c0_100] : memref<32x8xf32, #tpu.memory_space<vmem>>, vector<2x8xf32>
    tpu.vector_store %arg12[%c24_99, %c0_100], %135 {strides = array<i32>} : memref<32x8xf32, #tpu.memory_space<vmem>>, vector<2x8xf32>,
    %c136_101 = arith.constant 136 : index
    %c0_102 = arith.constant 0 : index
    %138 = vector.load %arg2[%c136_101, %c0_102] : memref<280x12xf32, #tpu.memory_space<vmem>>, vector<12x8xf32>
    %c6_103 = arith.constant 6 : index
    %c0_104 = arith.constant 0 : index
    %139 = vector.load %arg10[%c6_103, %c0_104] : memref<48x4xf32, #tpu.memory_space<vmem>>, vector<32x4xf32>
    %c8_105 = arith.constant 8 : index
    %c0_106 = arith.constant 0 : index
    %140 = vector.load %arg10[%c8_105, %c0_106] : memref<48x4xf32, #tpu.memory_space<vmem>>, vector<32x4xf32>
    %c10_107 = arith.constant 10 : index
    %c0_108 = arith.constant 0 : index
    %141 = vector.load %arg10[%c10_107, %c0_108] : memref<48x4xf32, #tpu.memory_space<vmem>>, vector<32x4xf32>
    %142 = vector.extract_strided_slice %138 {offsets = [0, 0], sizes = [4, 8], strides = [1, 1]} : vector<12x8xf32> to vector<4x8xf32>
    %cst_109 = arith.constant dense<0.000000e+00> : vector<32x8xf32>
    %143 = tpu.matmul %139, %142, %cst_109 {dimension_numbers = #tpu.dot_dimension_numbers<[1], [0], [0], [1], [0, 0, 1, 1], [], []>} : vector<32x4xf32>, vector<4x8xf32>, vector<32x8xf32> -> vector<32x8xf32>
    %144 = vector.extract_strided_slice %138 {offsets = [4, 0], sizes = [4, 8], strides = [1, 1]} : vector<12x8xf32> to vector<4x8xf32>
    %cst_110 = arith.constant dense<0.000000e+00> : vector<32x8xf32>
    %145 = tpu.matmul %140, %144, %cst_110 {dimension_numbers = #tpu.dot_dimension_numbers<[1], [0], [0], [1], [0, 0, 1, 1], [], []>} : vector<32x4xf32>, vector<4x8xf32>, vector<32x8xf32> -> vector<32x8xf32>
    %146 = arith.addf %143, %145 : vector<32x8xf32>
    %147 = vector.extract_strided_slice %138 {offsets = [8, 0], sizes = [4, 8], strides = [1, 1]} : vector<12x8xf32> to vector<4x8xf32>
    %cst_111 = arith.constant dense<0.000000e+00> : vector<32x8xf32>
    %148 = tpu.matmul %141, %147, %cst_111 {dimension_numbers = #tpu.dot_dimension_numbers<[1], [0], [0], [1], [0, 0, 1, 1], [], []>} : vector<32x4xf32>, vector<4x8xf32>, vector<32x8xf32> -> vector<32x8xf32>
    %149 = arith.addf %146, %148 : vector<32x8xf32>
    %c152 = arith.constant 152 : index
    %c0_112 = arith.constant 0 : index
    %150 = vector.load %arg2[%c152, %c0_112] : memref<280x12xf32, #tpu.memory_space<vmem>>, vector<1x8xf32>
    %151 = vector.broadcast %150 : vector<1x8xf32> to vector<32x8xf32>
    %152 = arith.addf %149, %151 : vector<32x8xf32>
    %cst_113 = arith.constant dense<0.000000e+00> : vector<8xf32>
    %153 = vector.multi_reduction <add>, %152, %cst_113 [0] : vector<32x8xf32> to vector<8xf32>
    %154 = vector.shape_cast %153 : vector<8xf32> to vector<1x8xf32>
    %cst_114 = arith.constant 3.125000e-02 : f32
    %155 = vector.broadcast %cst_114 : f32 to vector<1x8xf32>
    %156 = arith.mulf %154, %155 : vector<1x8xf32>
    %157 = vector.broadcast %156 : vector<1x8xf32> to vector<32x8xf32>
    %158 = arith.subf %152, %157 : vector<32x8xf32>
    %159 = arith.mulf %158, %158 : vector<32x8xf32>
    %cst_115 = arith.constant dense<0.000000e+00> : vector<8xf32>
    %160 = vector.multi_reduction <add>, %159, %cst_115 [0] : vector<32x8xf32> to vector<8xf32>
    %161 = vector.shape_cast %160 : vector<8xf32> to vector<1x8xf32>
    %cst_116 = arith.constant 3.125000e-02 : f32
    %162 = vector.broadcast %cst_116 : f32 to vector<1x8xf32>
    %163 = arith.mulf %161, %162 : vector<1x8xf32>
    %cst_117 = arith.constant 9.99999974E-6 : f32
    %164 = vector.broadcast %cst_117 : f32 to vector<1x8xf32>
    %165 = arith.addf %163, %164 : vector<1x8xf32>
    %166 = math.rsqrt %165 : vector<1x8xf32>
    %167 = vector.broadcast %166 : vector<1x8xf32> to vector<32x8xf32>
    %168 = arith.mulf %158, %167 : vector<32x8xf32>
    %c160 = arith.constant 160 : index
    %c0_118 = arith.constant 0 : index
    %169 = vector.load %arg2[%c160, %c0_118] : memref<280x12xf32, #tpu.memory_space<vmem>>, vector<1x8xf32>
    %170 = vector.broadcast %169 : vector<1x8xf32> to vector<32x8xf32>
    %171 = arith.mulf %168, %170 : vector<32x8xf32>
    %c168 = arith.constant 168 : index
    %c0_119 = arith.constant 0 : index
    %172 = vector.load %arg2[%c168, %c0_119] : memref<280x12xf32, #tpu.memory_space<vmem>>, vector<1x8xf32>
    %173 = vector.broadcast %172 : vector<1x8xf32> to vector<32x8xf32>
    %174 = arith.addf %171, %173 : vector<32x8xf32>
    %cst_120 = arith.constant 0.00999999977 : f32
    %175 = vector.broadcast %cst_120 : f32 to vector<32x8xf32>
    %176 = arith.mulf %175, %174 : vector<32x8xf32>
    %177 = arith.maximumf %174, %176 : vector<32x8xf32>
    %c0_121 = arith.constant 0 : index
    %c0_122 = arith.constant 0 : index
    %178 = vector.load %arg11[%c0_121, %c0_122] : memref<32x8xf32, #tpu.memory_space<vmem>>, vector<32x8xf32>
    tpu.vector_store %arg11[%c0_121, %c0_122], %177 {strides = array<i32>} : memref<32x8xf32, #tpu.memory_space<vmem>>, vector<32x8xf32>,
    %c0_123 = arith.constant 0 : index
    %c0_124 = arith.constant 0 : index
    %179 = tpu.strided_load %arg11[%c0_123, %c0_124] {strides = array<i32: 4, 1>} : memref<32x8xf32, #tpu.memory_space<vmem>>, vector<8x8xf32>
    %c2_125 = arith.constant 2 : index
    %c0_126 = arith.constant 0 : index
    %180 = tpu.strided_load %arg11[%c2_125, %c0_126] {strides = array<i32: 4, 1>} : memref<32x8xf32, #tpu.memory_space<vmem>>, vector<8x8xf32>
    %181 = arith.maximumf %179, %180 : vector<8x8xf32>
    %c8_127 = arith.constant 8 : index
    %c0_128 = arith.constant 0 : index
    %182 = tpu.strided_load %arg12[%c8_127, %c0_128] {strides = array<i32: 2, 1>} : memref<32x8xf32, #tpu.memory_space<vmem>>, vector<8x8xf32>
    tpu.strided_store %arg12[%c8_127, %c0_128], %181 {strides = array<i32: 2, 1>} : memref<32x8xf32, #tpu.memory_space<vmem>>, vector<8x8xf32>
    %c1_129 = arith.constant 1 : index
    %c0_130 = arith.constant 0 : index
    %183 = tpu.strided_load %arg11[%c1_129, %c0_130] {strides = array<i32: 4, 1>} : memref<32x8xf32, #tpu.memory_space<vmem>>, vector<8x8xf32>
    %c3_131 = arith.constant 3 : index
    %c0_132 = arith.constant 0 : index
    %184 = tpu.strided_load %arg11[%c3_131, %c0_132] {strides = array<i32: 4, 1>} : memref<32x8xf32, #tpu.memory_space<vmem>>, vector<8x8xf32>
    %185 = arith.maximumf %183, %184 : vector<8x8xf32>
    %c9_133 = arith.constant 9 : index
    %c0_134 = arith.constant 0 : index
    %186 = tpu.strided_load %arg12[%c9_133, %c0_134] {strides = array<i32: 2, 1>} : memref<32x8xf32, #tpu.memory_space<vmem>>, vector<8x8xf32>
    tpu.strided_store %arg12[%c9_133, %c0_134], %185 {strides = array<i32: 2, 1>} : memref<32x8xf32, #tpu.memory_space<vmem>>, vector<8x8xf32>
    %c176 = arith.constant 176 : index
    %c0_135 = arith.constant 0 : index
    %187 = vector.load %arg2[%c176, %c0_135] : memref<280x12xf32, #tpu.memory_space<vmem>>, vector<24x8xf32>
    %c6_136 = arith.constant 6 : index
    %c0_137 = arith.constant 0 : index
    %188 = vector.load %arg12[%c6_136, %c0_137] : memref<32x8xf32, #tpu.memory_space<vmem>>, vector<16x8xf32>
    %c8_138 = arith.constant 8 : index
    %c0_139 = arith.constant 0 : index
    %189 = vector.load %arg12[%c8_138, %c0_139] : memref<32x8xf32, #tpu.memory_space<vmem>>, vector<16x8xf32>
    %c10_140 = arith.constant 10 : index
    %c0_141 = arith.constant 0 : index
    %190 = vector.load %arg12[%c10_140, %c0_141] : memref<32x8xf32, #tpu.memory_space<vmem>>, vector<16x8xf32>
    %191 = vector.extract_strided_slice %187 {offsets = [0, 0], sizes = [8, 8], strides = [1, 1]} : vector<24x8xf32> to vector<8x8xf32>
    %cst_142 = arith.constant dense<0.000000e+00> : vector<16x8xf32>
    %192 = tpu.matmul %188, %191, %cst_142 {dimension_numbers = #tpu.dot_dimension_numbers<[1], [0], [0], [1], [0, 0, 1, 1], [], []>} : vector<16x8xf32>, vector<8x8xf32>, vector<16x8xf32> -> vector<16x8xf32>
    %193 = vector.extract_strided_slice %187 {offsets = [8, 0], sizes = [8, 8], strides = [1, 1]} : vector<24x8xf32> to vector<8x8xf32>
    %cst_143 = arith.constant dense<0.000000e+00> : vector<16x8xf32>
    %194 = tpu.matmul %189, %193, %cst_143 {dimension_numbers = #tpu.dot_dimension_numbers<[1], [0], [0], [1], [0, 0, 1, 1], [], []>} : vector<16x8xf32>, vector<8x8xf32>, vector<16x8xf32> -> vector<16x8xf32>
    %195 = arith.addf %192, %194 : vector<16x8xf32>
    %196 = vector.extract_strided_slice %187 {offsets = [16, 0], sizes = [8, 8], strides = [1, 1]} : vector<24x8xf32> to vector<8x8xf32>
    %cst_144 = arith.constant dense<0.000000e+00> : vector<16x8xf32>
    %197 = tpu.matmul %190, %196, %cst_144 {dimension_numbers = #tpu.dot_dimension_numbers<[1], [0], [0], [1], [0, 0, 1, 1], [], []>} : vector<16x8xf32>, vector<8x8xf32>, vector<16x8xf32> -> vector<16x8xf32>
    %198 = arith.addf %195, %197 : vector<16x8xf32>
    %c200 = arith.constant 200 : index
    %c0_145 = arith.constant 0 : index
    %199 = vector.load %arg2[%c200, %c0_145] : memref<280x12xf32, #tpu.memory_space<vmem>>, vector<1x8xf32>
    %200 = vector.broadcast %199 : vector<1x8xf32> to vector<16x8xf32>
    %201 = arith.addf %198, %200 : vector<16x8xf32>
    %cst_146 = arith.constant dense<0.000000e+00> : vector<8xf32>
    %202 = vector.multi_reduction <add>, %201, %cst_146 [0] : vector<16x8xf32> to vector<8xf32>
    %203 = vector.shape_cast %202 : vector<8xf32> to vector<1x8xf32>
    %cst_147 = arith.constant 6.250000e-02 : f32
    %204 = vector.broadcast %cst_147 : f32 to vector<1x8xf32>
    %205 = arith.mulf %203, %204 : vector<1x8xf32>
    %206 = vector.broadcast %205 : vector<1x8xf32> to vector<16x8xf32>
    %207 = arith.subf %201, %206 : vector<16x8xf32>
    %208 = arith.mulf %207, %207 : vector<16x8xf32>
    %cst_148 = arith.constant dense<0.000000e+00> : vector<8xf32>
    %209 = vector.multi_reduction <add>, %208, %cst_148 [0] : vector<16x8xf32> to vector<8xf32>
    %210 = vector.shape_cast %209 : vector<8xf32> to vector<1x8xf32>
    %cst_149 = arith.constant 6.250000e-02 : f32
    %211 = vector.broadcast %cst_149 : f32 to vector<1x8xf32>
    %212 = arith.mulf %210, %211 : vector<1x8xf32>
    %cst_150 = arith.constant 9.99999974E-6 : f32
    %213 = vector.broadcast %cst_150 : f32 to vector<1x8xf32>
    %214 = arith.addf %212, %213 : vector<1x8xf32>
    %215 = math.rsqrt %214 : vector<1x8xf32>
    %216 = vector.broadcast %215 : vector<1x8xf32> to vector<16x8xf32>
    %217 = arith.mulf %207, %216 : vector<16x8xf32>
    %c208 = arith.constant 208 : index
    %c0_151 = arith.constant 0 : index
    %218 = vector.load %arg2[%c208, %c0_151] : memref<280x12xf32, #tpu.memory_space<vmem>>, vector<1x8xf32>
    %219 = vector.broadcast %218 : vector<1x8xf32> to vector<16x8xf32>
    %220 = arith.mulf %217, %219 : vector<16x8xf32>
    %c216 = arith.constant 216 : index
    %c0_152 = arith.constant 0 : index
    %221 = vector.load %arg2[%c216, %c0_152] : memref<280x12xf32, #tpu.memory_space<vmem>>, vector<1x8xf32>
    %222 = vector.broadcast %221 : vector<1x8xf32> to vector<16x8xf32>
    %223 = arith.addf %220, %222 : vector<16x8xf32>
    %cst_153 = arith.constant 0.00999999977 : f32
    %224 = vector.broadcast %cst_153 : f32 to vector<16x8xf32>
    %225 = arith.mulf %224, %223 : vector<16x8xf32>
    %226 = arith.maximumf %223, %225 : vector<16x8xf32>
    %c0_154 = arith.constant 0 : index
    %c0_155 = arith.constant 0 : index
    %227 = vector.load %arg11[%c0_154, %c0_155] : memref<32x8xf32, #tpu.memory_space<vmem>>, vector<16x8xf32>
    tpu.vector_store %arg11[%c0_154, %c0_155], %226 {strides = array<i32>} : memref<32x8xf32, #tpu.memory_space<vmem>>, vector<16x8xf32>,
    %c0_156 = arith.constant 0 : index
    %c0_157 = arith.constant 0 : index
    %228 = tpu.strided_load %arg11[%c0_156, %c0_157] {strides = array<i32: 4, 1>} : memref<32x8xf32, #tpu.memory_space<vmem>>, vector<4x8xf32>
    %c2_158 = arith.constant 2 : index
    %c0_159 = arith.constant 0 : index
    %229 = tpu.strided_load %arg11[%c2_158, %c0_159] {strides = array<i32: 4, 1>} : memref<32x8xf32, #tpu.memory_space<vmem>>, vector<4x8xf32>
    %230 = arith.maximumf %228, %229 : vector<4x8xf32>
    %c0_160 = arith.constant 0 : index
    %c0_161 = arith.constant 0 : index
    %231 = tpu.strided_load %arg13[%c0_160, %c0_161] {strides = array<i32: 2, 1>} : memref<8x8xf32, #tpu.memory_space<vmem>>, vector<4x8xf32>
    tpu.strided_store %arg13[%c0_160, %c0_161], %230 {strides = array<i32: 2, 1>} : memref<8x8xf32, #tpu.memory_space<vmem>>, vector<4x8xf32>
    %c1_162 = arith.constant 1 : index
    %c0_163 = arith.constant 0 : index
    %232 = tpu.strided_load %arg11[%c1_162, %c0_163] {strides = array<i32: 4, 1>} : memref<32x8xf32, #tpu.memory_space<vmem>>, vector<4x8xf32>
    %c3_164 = arith.constant 3 : index
    %c0_165 = arith.constant 0 : index
    %233 = tpu.strided_load %arg11[%c3_164, %c0_165] {strides = array<i32: 4, 1>} : memref<32x8xf32, #tpu.memory_space<vmem>>, vector<4x8xf32>
    %234 = arith.maximumf %232, %233 : vector<4x8xf32>
    %c1_166 = arith.constant 1 : index
    %c0_167 = arith.constant 0 : index
    %235 = tpu.strided_load %arg13[%c1_166, %c0_167] {strides = array<i32: 2, 1>} : memref<8x8xf32, #tpu.memory_space<vmem>>, vector<4x8xf32>
    tpu.strided_store %arg13[%c1_166, %c0_167], %234 {strides = array<i32: 2, 1>} : memref<8x8xf32, #tpu.memory_space<vmem>>, vector<4x8xf32>
    %c0_168 = arith.constant 0 : index
    %c0_169 = arith.constant 0 : index
    %236 = vector.load %arg13[%c0_168, %c0_169] : memref<8x8xf32, #tpu.memory_space<vmem>>, vector<8x8xf32>
    %237 = vector.extract_strided_slice %236 {offsets = [0, 0], sizes = [2, 8], strides = [1, 1]} : vector<8x8xf32> to vector<2x8xf32>
    %238 = vector.extract_strided_slice %236 {offsets = [2, 0], sizes = [2, 8], strides = [1, 1]} : vector<8x8xf32> to vector<2x8xf32>
    %239 = vector.extract_strided_slice %236 {offsets = [4, 0], sizes = [2, 8], strides = [1, 1]} : vector<8x8xf32> to vector<2x8xf32>
    %240 = vector.extract_strided_slice %236 {offsets = [6, 0], sizes = [2, 8], strides = [1, 1]} : vector<8x8xf32> to vector<2x8xf32>
    %241 = tpu.concatenate %237, %238, %239, %240 in 1 : vector<2x8xf32>, vector<2x8xf32>, vector<2x8xf32>, vector<2x8xf32> -> vector<2x32xf32>
    %c224 = arith.constant 224 : index
    %c0_170 = arith.constant 0 : index
    %242 = vector.load %arg2[%c224, %c0_170] : memref<280x12xf32, #tpu.memory_space<vmem>>, vector<32x4xf32>
    %cst_171 = arith.constant dense<0.000000e+00> : vector<2x4xf32>
    %243 = tpu.matmul %241, %242, %cst_171 {dimension_numbers = #tpu.dot_dimension_numbers<[1], [0], [0], [1], [0, 0, 1, 1], [], []>} : vector<2x32xf32>, vector<32x4xf32>, vector<2x4xf32> -> vector<2x4xf32>
    %c256 = arith.constant 256 : index
    %c0_172 = arith.constant 0 : index
    %244 = vector.load %arg2[%c256, %c0_172] : memref<280x12xf32, #tpu.memory_space<vmem>>, vector<1x4xf32>
    %245 = vector.broadcast %244 : vector<1x4xf32> to vector<2x4xf32>
    %246 = arith.addf %243, %245 : vector<2x4xf32>
    %cst_173 = arith.constant 0.00999999977 : f32
    %247 = vector.broadcast %cst_173 : f32 to vector<2x4xf32>
    %248 = arith.mulf %247, %246 : vector<2x4xf32>
    %249 = arith.maximumf %246, %248 : vector<2x4xf32>
    %c264 = arith.constant 264 : index
    %c0_174 = arith.constant 0 : index
    %250 = vector.load %arg2[%c264, %c0_174] : memref<280x12xf32, #tpu.memory_space<vmem>>, vector<4x1xf32>
    %cst_175 = arith.constant dense<0.000000e+00> : vector<2x1xf32>
    %251 = tpu.matmul %249, %250, %cst_175 {dimension_numbers = #tpu.dot_dimension_numbers<[1], [0], [0], [1], [0, 0, 1, 1], [], []>} : vector<2x4xf32>, vector<4x1xf32>, vector<2x1xf32> -> vector<2x1xf32>
    %c272 = arith.constant 272 : index
    %c0_176 = arith.constant 0 : index
    %252 = vector.load %arg2[%c272, %c0_176] : memref<280x12xf32, #tpu.memory_space<vmem>>, vector<1x1xf32>
    %253 = vector.broadcast %252 : vector<1x1xf32> to vector<2x1xf32>
    %254 = arith.addf %251, %253 : vector<2x1xf32>
    %cst_177 = arith.constant 0.00999999977 : f32
    %255 = vector.broadcast %cst_177 : f32 to vector<2x1xf32>
    %256 = arith.mulf %255, %254 : vector<2x1xf32>
    %257 = arith.maximumf %254, %256 : vector<2x1xf32>
    %c0_178 = arith.constant 0 : index
    %c0_179 = arith.constant 0 : index
    %258 = vector.load %arg3[%c0_178, %c0_179] : memref<2x1xf32, #tpu.memory_space<vmem>>, vector<2x1xf32>
    tpu.vector_store %arg3[%c0_178, %c0_179], %257 {strides = array<i32>} : memref<2x1xf32, #tpu.memory_space<vmem>>, vector<2x1xf32>,
    return
  }
  func.func @transform_0(%arg0: i32) -> (i32, i32) {
    %c0_i32 = arith.constant 0 : i32
    %c0_i32_0 = arith.constant 0 : i32
    %c0_i32_1 = arith.constant 0 : i32
    return %c0_i32, %c0_i32_0 : i32, i32
  }
  func.func @transform_1(%arg0: i32) -> (i32, i32) {
    %c0_i32 = arith.constant 0 : i32
    %c0_i32_0 = arith.constant 0 : i32
    %c0_i32_1 = arith.constant 0 : i32
    return %c0_i32, %c0_i32_0 : i32, i32
  }
  func.func @transform_2(%arg0: i32) -> (i32, i32) {
    %c0_i32 = arith.constant 0 : i32
    %c0_i32_0 = arith.constant 0 : i32
    %c0_i32_1 = arith.constant 0 : i32
    return %c0_i32, %c0_i32_0 : i32, i32
  }
}

</mosaic_0001>

<bundles_post_ra>
// kernel: forward.1
= control target key start
LH: loop header
LB: loop body
LE: loop exit
PB: predicated region body
PF: predicated region fallthrough
CT: control target
= control target key end

     0   :  { %7 = vsyncpa [#allocation13], 0  ;;  %s4529_s9 = smov [#allocation12]   ;;  %s5186_s0 = inlined_call_operand.vmem [shape: f32[128,2], index: 0, kind: input, shape index: {}]   ;;  %s5187_s1 = inlined_call_operand.hbm [shape: f32[280,12], index: 1, kind: input, shape index: {}]   ;;  %s5188_s2 = inlined_call_operand.vmem [shape: f32[2,1], index: 2, kind: output, shape index: {}]  }
   0x1   :  { %s15_s10 = sshll.u32 %s4529_s9, 4  ;;  %s16_s10 = int_to_ptr.vmem [resolvable:$true] %s15_s10 }
   0x2   :  { %s4483_s11 = scalar_lea.vmem %s16_s10, 4480  ;;  %p4488_p1 = scmp.lt.s32.totalorder %s16_s10, %s16_s10 }
   0x3   :  { %p4484_p0 = scmp.ne.s32.totalorder %s16_s10, %s4483_s11  ;;  %p4489_p2 = scmp.lt.s32.totalorder %s4483_s11, %s4483_s11 }
   0x5   :  { %p4490_p3 = por %p4489_p2, %p4488_p1 }
   0x7   :  { %p4491_p4 = pnand %p4490_p3, %p4484_p0 }
   0x9   :  { %4494 = shalt.err (!%p4491_p4)
}
   0xa   :  { %s4530_s12 = smov 128   ;;  %s4531_s13 = smov 8  }
   0xb   :  { %21 = dma.hbm_to_vmem [thread:$0]  %s5187_s1, 4480, %s16_s10, [#allocation13], %s4530_s12, %s4530_s12, %s4531_s13  }
   0xc   :  { %4511 = dma.done.wait [#allocation13], 4480  }
   0xd   :  { %4512 = vsyncadd [#allocation13], 4294962816  ;;  %vm262_vm0 = vcmask 9216   ;;  %v4532_v0 = vmov 0.0   ;;  %vm96_vm1 = vcmask 1041408   ;;  %vm47_vm2 = vcmask 15360  }
   0xe   :  { %263 = vst.msk [vmem:[#allocation3 + $0x6] sm:$0x3] %vm262_vm0, %v4532_v0  ;;  %264 = vst.msk [vmem:[#allocation3 + $0x88] sm:$0x3] %vm262_vm0, %v4532_v0  ;;  %v4567_v1 = vld [vmem:[#allocation12 + $0x10] sm:$0x3] }
   0xf   :  { %v4569_v2 = vld [vmem:[#allocation12 + $0x18] ss:$0 sm:$0xff]  ;;  %v41_v3 = vld [vmem:[#allocation12] sm:$0x3]  ;;  %v25_v4 = vld [vmem:[%s5186_s0] sm:$0xff]  ;;  %vm245_vm3 = vcmask 48128  }
  0x10   :  { %4117 = vmatprep.subr.msk.mxu0 %vm96_vm1, %v41_v3  ;;  %4366 = vmatprep.subr.msk.mxu1 %vm96_vm1, %v41_v3  ;;  %v33_v5 = vld [vmem:[%s5186_s0 + $0x40] sm:$0xff]  ;;  %v26_v6 = vld [vmem:[%s5186_s0 + $0x8] sm:$0xff]  ;;  %v27_v8 = vld [vmem:[%s5186_s0 + $0x10] sm:$0xff]  ;;  %v4655_v53 = vmov 0.0  }
  0x11   :  { %4118 = vmatpush3.msk.msra.mxu0 %vm96_vm1, %v41_v3  ;;  %4367 = vmatpush3.msk.msra.mxu1 %vm96_vm1, %v41_v3  ;;  %v34_v7 = vld [vmem:[%s5186_s0 + $0x48] sm:$0xff]  ;;  %v35_v9 = vld [vmem:[%s5186_s0 + $0x50] sm:$0xff]  ;;  %v28_v10 = vld [vmem:[%s5186_s0 + $0x18] sm:$0xff] }
  0x12   :  { %4119 = vmatprep.mubr.msk.f32.mxu0 %vm47_vm2, %v25_v4  ;;  %4131 = vmatprep.mubr.msk.f32.mxu1 %vm47_vm2, %v33_v5  ;;  %v36_v11 = vld [vmem:[%s5186_s0 + $0x58] sm:$0xff]  ;;  %v29_v12 = vld [vmem:[%s5186_s0 + $0x20] sm:$0xff]  ;;  %v30_v14 = vld [vmem:[%s5186_s0 + $0x28] sm:$0xff] }
  0x13   :  { %4120 = vmatmul.mubr.msk.f32.vlgmr.msra.gmra.mxu0 %vm47_vm2, %v26_v6  ;;  %4132 = vmatmul.mubr.msk.f32.vlgmr.msra.gmra.mxu1 %vm47_vm2, %v34_v7  ;;  %v37_v13 = vld [vmem:[%s5186_s0 + $0x60] sm:$0xff]  ;;  %v38_v15 = vld [vmem:[%s5186_s0 + $0x68] sm:$0xff]  ;;  %v31_v16 = vld [vmem:[%s5186_s0 + $0x30] sm:$0xff] }
  0x14   :  { %4122 = vmatprep.mubr.msk.f32.mxu0 %vm47_vm2, %v27_v8  ;;  %4134 = vmatprep.mubr.msk.f32.mxu1 %vm47_vm2, %v35_v9  ;;  %v39_v17 = vld [vmem:[%s5186_s0 + $0x70] sm:$0xff]  ;;  %v32_v18 = vld [vmem:[%s5186_s0 + $0x38] sm:$0xff]  ;;  %v3798_v20 = vld [vmem:[#allocation12 + $0x8] ss:$0 sm:$0xff] }
  0x15   :  { %v40_v19 = vld [vmem:[%s5186_s0 + $0x78] sm:$0xff]  ;;  %s4657_s0 = smov 0  }
  0x17   :  { %4123 = vmatmul.mubr.msk.f32.gmra.mxu0 %vm47_vm2, %v28_v10  ;;  %4135 = vmatmul.mubr.msk.f32.gmra.mxu1 %vm47_vm2, %v36_v11 }
  0x18   :  { %4125 = vmatprep.mubr.msk.f32.mxu0 %vm47_vm2, %v29_v12  ;;  %4137 = vmatprep.mubr.msk.f32.mxu1 %vm47_vm2, %v37_v13 }
  0x1b   :  { %4126 = vmatmul.mubr.msk.f32.gmra.mxu0 %vm47_vm2, %v30_v14  ;;  %4138 = vmatmul.mubr.msk.f32.gmra.mxu1 %vm47_vm2, %v38_v15 }
  0x1c   :  { %4128 = vmatprep.mubr.msk.f32.mxu0 %vm47_vm2, %v31_v16  ;;  %4140 = vmatprep.mubr.msk.f32.mxu1 %vm47_vm2, %v39_v17 }
  0x1f   :  { %4129 = vmatmul.mubr.msk.f32.gmra.mxu0 %vm47_vm2, %v32_v18  ;;  %4141 = vmatmul.mubr.msk.f32.gmra.mxu1 %vm47_vm2, %v40_v19 }
  0xd3   :  { %v4121_v21 = vpop.f32.mrf.mxu0  ;;  %v4133_v22 = vpop.f32.mrf.mxu1 }
  0xd4   :  { %v172_v23 = vadd.f32 %v4121_v21, %v3798_v20  ;;  %v212_v24 = vadd.f32 %v4133_v22, %v3798_v20 }
  0xd5   :  { %v166_v25 = vpop.f32.mrf.mxu0  ;;  %v206_v26 = vpop.f32.mrf.mxu1 }
  0xd6   :  { %247 = vst.msk [vmem:[#allocation2 + $0x8] sm:$0xff] %vm245_vm3, %v172_v23  ;;  %255 = vst.msk [vmem:[#allocation2 + $0x48] sm:$0xff] %vm245_vm3, %v212_v24  ;;  %v167_v27 = vadd.f32 %v3798_v20, %v166_v25  ;;  %v207_v28 = vadd.f32 %v3798_v20, %v206_v26 }
  0xd7   :  { %v4124_v29 = vpop.f32.mrf.mxu0  ;;  %v4136_v30 = vpop.f32.mrf.mxu1 }
  0xd8   :  { %246 = vst.msk [vmem:[#allocation2] sm:$0xff] %vm245_vm3, %v167_v27  ;;  %254 = vst.msk [vmem:[#allocation2 + $0x40] sm:$0xff] %vm245_vm3, %v207_v28  ;;  %v182_v31 = vadd.f32 %v4124_v29, %v3798_v20  ;;  %v222_v32 = vadd.f32 %v4136_v30, %v3798_v20 }
  0xd9   :  { %v176_v33 = vpop.f32.mrf.mxu0  ;;  %v216_v34 = vpop.f32.mrf.mxu1 }
  0xda   :  { %249 = vst.msk [vmem:[#allocation2 + $0x18] sm:$0xff] %vm245_vm3, %v182_v31  ;;  %257 = vst.msk [vmem:[#allocation2 + $0x58] sm:$0xff] %vm245_vm3, %v222_v32  ;;  %v177_v35 = vadd.f32 %v3798_v20, %v176_v33  ;;  %v217_v36 = vadd.f32 %v3798_v20, %v216_v34 }
  0xdb   :  { %v4127_v37 = vpop.f32.mrf.mxu0  ;;  %v4139_v38 = vpop.f32.mrf.mxu1 }
  0xdc   :  { %248 = vst.msk [vmem:[#allocation2 + $0x10] sm:$0xff] %vm245_vm3, %v177_v35  ;;  %256 = vst.msk [vmem:[#allocation2 + $0x50] sm:$0xff] %vm245_vm3, %v217_v36  ;;  %v192_v39 = vadd.f32 %v4127_v37, %v3798_v20  ;;  %v232_v40 = vadd.f32 %v4139_v38, %v3798_v20 }
  0xdd   :  { %v186_v41 = vpop.f32.mrf.mxu0  ;;  %v226_v42 = vpop.f32.mrf.mxu1 }
  0xde   :  { %251 = vst.msk [vmem:[#allocation2 + $0x28] sm:$0xff] %vm245_vm3, %v192_v39  ;;  %259 = vst.msk [vmem:[#allocation2 + $0x68] sm:$0xff] %vm245_vm3, %v232_v40  ;;  %v187_v43 = vadd.f32 %v3798_v20, %v186_v41  ;;  %v227_v44 = vadd.f32 %v3798_v20, %v226_v42 }
  0xdf   :  { %v4130_v45 = vpop.f32.mrf.mxu0  ;;  %v4142_v46 = vpop.f32.mrf.mxu1 }
  0xe0   :  { %250 = vst.msk [vmem:[#allocation2 + $0x20] sm:$0xff] %vm245_vm3, %v187_v43  ;;  %258 = vst.msk [vmem:[#allocation2 + $0x60] sm:$0xff] %vm245_vm3, %v227_v44  ;;  %v202_v47 = vadd.f32 %v4130_v45, %v3798_v20  ;;  %v242_v48 = vadd.f32 %v4142_v46, %v3798_v20 }
  0xe1   :  { %v196_v49 = vpop.f32.mrf.mxu0  ;;  %v236_v50 = vpop.f32.mrf.mxu1 }
  0xe2   :  { %253 = vst.msk [vmem:[#allocation2 + $0x38] sm:$0xff] %vm245_vm3, %v202_v47  ;;  %261 = vst.msk [vmem:[#allocation2 + $0x78] sm:$0xff] %vm245_vm3, %v242_v48  ;;  %v197_v51 = vadd.f32 %v3798_v20, %v196_v49  ;;  %v237_v52 = vadd.f32 %v3798_v20, %v236_v50 }
  0xe4   :  { %252 = vst.msk [vmem:[#allocation2 + $0x30] sm:$0xff] %vm245_vm3, %v197_v51  ;;  %260 = vst.msk [vmem:[#allocation2 + $0x70] sm:$0xff] %vm245_vm3, %v237_v52 }
  0xe5 LB: > { %v4533_v54 = vmov 0.0   ;;  %vm4534_vm4 = vmmov 0   ;;  %v282_v55 = vrot.slane %v4515_v53, 6  ;;  %s4535_s19 = smov 126   ;;  %s4536_s20 = smov 4   ;;  %vm719_vm5 = vcmask 1043456   ;;  %s4519_s0 = sphi %s4657_s0, %s276_s0   ;;  %v4515_v53 = vphi %v4655_v53, %v717_v53  }
  0xe6   : > { %4143 = vmatprep.subr.mxu0 %v4533_v54  ;;  %4145 = vmatprep.mubr.msk.f32.mxu0 %vm4534_vm4, %v4533_v54  ;;  %s4537_s21 = smov 124   ;;  %s3817_s22 = sshll.u32 %s4519_s0, 3  ;;  %vm721_vm6 = vcmask 1045504  }
  0xe7   : > { %4144 = vmatpush3.msk.msra.mxu0 %vm96_vm1, %v4567_v1  ;;  %4148 = vmatprep.subr.mxu1 %v4533_v54  ;;  %s279_s23 = scalar_lea.vmem [#allocation2], %s3817_s22  ;;  %s3775_s24 = scalar_lea.vmem [#allocation3], %s3817_s22 }
  0xe8   : > { %4149 = vmatpush3.msk.msra.mxu1 %vm96_vm1, %v4567_v1  ;;  %4150 = vmatprep.mubr.msk.f32.mxu1 %vm4534_vm4, %v4533_v54  ;;  %s276_s0 = sadd.s32 1, %s4519_s0  }
  0xe9   : > { %283 = vrot.lane.b32.xlu0 %v282_v55, %s4535_s19  ;;  %4153 = vmatprep.subr.mxu0 %v4533_v54  ;;  %p273_p5 = scmp.ge.s32.totalorder %s276_s0, 16  }
  0xea   : > { %4158 = vmatprep.subr.mxu1 %v4533_v54  ;;  %vm1407_vm7 = vcmask (%p273_p5), 31744   ;;  %vm730_vm8 = vcmask (%p273_p5), 25600   ;;  %vm2372_vm9 = vcmask (%p273_p5), 97280   ;;  %s5048_s25 = smov (%p273_p5), 0  }
  0xeb   : > { %v4683_v61 = vld [vmem:[%s279_s23] sm:$0xff]  ;;  %732 = vst.msk [vmem:[#allocation5 + $0x48] sm:$0x3] (%p273_p5), %vm730_vm8, %v4532_v0  ;;  %2377 = vst.msk [vmem:[#allocation8 + $0x6] sm:$0x3] (%p273_p5), %vm730_vm8, %v4532_v0 }
  0xec   :  { %2378 = vst.msk [vmem:[#allocation8 + $0x28] sm:$0x3] (%p273_p5), %vm730_vm8, %v4532_v0  ;;  %731 = vst.msk [vmem:[#allocation5 + $0x6] sm:$0x3] (%p273_p5), %vm730_vm8, %v4532_v0 }
  0xed   : > { %368 = vrot.lane.b32.xlu0 %v4569_v2, %s4536_s20 }
 0x15b   : > { %v284_v56 = vpop.permute.xlu0 %283 }
 0x15c   : > { %4146 = vmatmul.mubr.msk.f32.vlgmr.msra.gmra.mxu0 %vm47_vm2, %v284_v56 }
 0x15d   : > { %4154 = vmatpush3.msk.msra.mxu0 %vm96_vm1, %v4567_v1  ;;  %4155 = vmatprep.mubr.msk.f32.mxu0 %vm4534_vm4, %v4533_v54 }
 0x15f   : > { %v4676_v57 = vpop.permute.xlu0 %368 }
 0x21c   : > { %v356_v58 = vpop.f32.mrf.mxu0 }
 0x21d   : > { %v371_v59 = vadd.f32 %v4676_v57, %v356_v58  ;;  %v360_v62 = vadd.f32 %v356_v58, %v4683_v61 }
 0x21e   : > { %v4147_v60 = vpop.f32.mrf.mxu0 }
 0x21f   : > { %373 = vrot.lane.b32.xlu1 %v371_v59, %s4537_s21  ;;  %v3820_v63 = vmul.f32 -1.442695, %v360_v62 }
 0x221   : > { %4419 = vpow2.f32 %v3820_v63 }
 0x22e   : > { %v4420_v3 = vpop.eup %4419 }
 0x22f   : > { %v364_v4 = vadd.f32 1.0, %v4420_v3 }
 0x231   : > { %4421 = vrcp.f32 %v364_v4 }
 0x23e   : > { %v4422_v5 = vpop.eup %4421 }
 0x23f   : > { %v383_v11 = vsub.f32 1.0, %v4422_v5  ;;  %v390_v13 = vmul.f32 %v4422_v5, %v282_v55 }
 0x291   : > { %v374_v6 = vpop.permute.xlu1 %373 }
 0x292   : > { %v376_v7 = vmul.f32 %v4422_v5, %v374_v6 }
 0x294   : > { %378 = vrot.lane.b32.xlu1 %v376_v7, %s4536_s20 }
 0x306   : > { %v379_v8 = vpop.permute.xlu1 %378 }
 0x307   : > { %v381_v9 = vadd.f32 %v379_v8, %v4683_v61 }
 0x309   : > { %4423 = vtanh.f32 %v381_v9 }
 0x316   : > { %v4424_v10 = vpop.eup %4423 }
 0x317   : > { %385 = vrot.lane.b32.xlu0 %v4424_v10, %s4535_s19 }
 0x389   : > { %v386_v12 = vpop.permute.xlu0 %385 }
 0x38a   : > { %v388_v14 = vmul.f32 %v386_v12, %v383_v11 }
 0x38c   : > { %v4689_v15 = vadd.f32 %v390_v13, %v388_v14 }
 0x38e   : > { %393 = vrot.lane.b32.xlu1 %v4689_v15, %s4535_s19  ;;  %v496_v33 = vrot.slane %v4689_v15, 6 }
 0x400   : > { %v394_v16 = vpop.permute.xlu1 %393 }
 0x401   : > { %4151 = vmatmul.mubr.msk.f32.vlgmr.msra.gmra.mxu1 %vm47_vm2, %v394_v16 }
 0x402   : > { %4159 = vmatpush3.msk.msra.mxu1 %vm96_vm1, %v4567_v1  ;;  %4160 = vmatprep.mubr.msk.f32.mxu1 %vm4534_vm4, %v4533_v54 }
 0x4c1   : > { %v463_v17 = vpop.f32.mrf.mxu1 }
 0x4c2   : > { %v477_v18 = vadd.f32 %v463_v17, %v4676_v57  ;;  %v468_v21 = vrot.slane %v463_v17, 6 }
 0x4c3   : > { %v4152_v19 = vpop.f32.mrf.mxu1 }
 0x4c4   : > { %v479_v20 = vrot.slane %v477_v18, 6  ;;  %v470_v22 = vadd.f32 %v468_v21, %v4683_v61 }
 0x4c6   : > { %480 = vrot.lane.b32.xlu0 %v479_v20, %s4537_s21  ;;  %v3823_v23 = vmul.f32 -1.442695, %v470_v22 }
 0x4c8   : > { %4425 = vpow2.f32 %v3823_v23 }
 0x4d5   : > { %v4426_v24 = vpop.eup %4425 }
 0x4d6   : > { %v474_v25 = vadd.f32 1.0, %v4426_v24 }
 0x4d8   : > { %4427 = vrcp.f32 %v474_v25 }
 0x4e5   : > { %v4428_v26 = vpop.eup %4427 }
 0x4e6   : > { %v490_v32 = vsub.f32 1.0, %v4428_v26  ;;  %v498_v36 = vmul.f32 %v4428_v26, %v496_v33 }
 0x538   : > { %v481_v27 = vpop.permute.xlu0 %480 }
 0x539   : > { %v483_v28 = vmul.f32 %v4428_v26, %v481_v27 }
 0x53b   : > { %485 = vrot.lane.b32.xlu1 %v483_v28, %s4536_s20 }
 0x5ad   : > { %v486_v29 = vpop.permute.xlu1 %485 }
 0x5ae   : > { %v488_v30 = vadd.f32 %v486_v29, %v4683_v61 }
 0x5b0   : > { %4429 = vtanh.f32 %v488_v30 }
 0x5bd   : > { %v4430_v31 = vpop.eup %4429 }
 0x5be   : > { %492 = vrot.lane.b32.xlu0 %v4430_v31, %s4535_s19 }
 0x630   : > { %v493_v34 = vpop.permute.xlu0 %492 }
 0x631   : > { %v495_v35 = vmul.f32 %v493_v34, %v490_v32 }
 0x633   : > { %v499_v37 = vadd.f32 %v498_v36, %v495_v35 }
 0x635   : > { %v501_v38 = vrot.slane %v499_v37, 2  ;;  %v605_v56 = vrot.slane %v499_v37, 6  ;;  %v718_v63 = vsel %vm96_vm1, %v4689_v15, %v499_v37 }
 0x637   : > { %502 = vrot.lane.b32.xlu1 %v501_v38, %s4535_s19 }
 0x6a9   : > { %v503_v39 = vpop.permute.xlu1 %502 }
 0x6aa   : > { %4156 = vmatmul.mubr.msk.f32.vlgmr.msra.gmra.mxu0 %vm47_vm2, %v503_v39 }
 0x76a   : > { %v572_v40 = vpop.f32.mrf.mxu0 }
 0x76b   : > { %v586_v41 = vadd.f32 %v572_v40, %v4676_v57  ;;  %v577_v44 = vrot.slane %v572_v40, 4 }
 0x76c   : > { %v4157_v42 = vpop.f32.mrf.mxu0 }
 0x76d   : > { %v588_v43 = vrot.slane %v586_v41, 4  ;;  %v579_v45 = vadd.f32 %v577_v44, %v4683_v61 }
 0x76f   : > { %589 = vrot.lane.b32.xlu0 %v588_v43, %s4537_s21  ;;  %v3826_v46 = vmul.f32 -1.442695, %v579_v45 }
 0x771   : > { %4431 = vpow2.f32 %v3826_v46 }
 0x77e   : > { %v4432_v47 = vpop.eup %4431 }
 0x77f   : > { %v583_v48 = vadd.f32 1.0, %v4432_v47 }
 0x781   : > { %4433 = vrcp.f32 %v583_v48 }
 0x78e   : > { %v4434_v49 = vpop.eup %4433 }
 0x78f   : > { %v599_v55 = vsub.f32 1.0, %v4434_v49  ;;  %v607_v59 = vmul.f32 %v4434_v49, %v605_v56 }
 0x7e1   : > { %v590_v50 = vpop.permute.xlu0 %589 }
 0x7e2   : > { %v592_v51 = vmul.f32 %v4434_v49, %v590_v50 }
 0x7e4   : > { %594 = vrot.lane.b32.xlu1 %v592_v51, %s4536_s20 }
 0x856   : > { %v595_v52 = vpop.permute.xlu1 %594 }
 0x857   : > { %v597_v53 = vadd.f32 %v595_v52, %v4683_v61 }
 0x859   : > { %4435 = vtanh.f32 %v597_v53 }
 0x866   : > { %v4436_v54 = vpop.eup %4435 }
 0x867   : > { %601 = vrot.lane.b32.xlu0 %v4436_v54, %s4535_s19 }
 0x8d9   : > { %v602_v58 = vpop.permute.xlu0 %601 }
 0x8da   : > { %v604_v60 = vmul.f32 %v602_v58, %v599_v55 }
 0x8dc   : > { %v608_v62 = vadd.f32 %v607_v59, %v604_v60 }
 0x8de   : > { %v610_v3 = vrot.slane %v608_v62, 4  ;;  %v720_v4 = vsel %vm719_vm5, %v718_v63, %v608_v62  ;;  %v714_v21 = vrot.slane %v608_v62, 6 }
 0x8e0   : > { %611 = vrot.lane.b32.xlu1 %v610_v3, %s4535_s19 }
 0x952   : > { %v612_v5 = vpop.permute.xlu1 %611 }
 0x953   : > { %4161 = vmatmul.mubr.msk.f32.vlgmr.msra.gmra.mxu1 %vm47_vm2, %v612_v5 }
 0xa13   : > { %v681_v6 = vpop.f32.mrf.mxu1 }
 0xa14   : > { %v695_v7 = vadd.f32 %v681_v6, %v4676_v57  ;;  %v686_v10 = vrot.slane %v681_v6, 2 }
 0xa15   : > { %v4162_v8 = vpop.f32.mrf.mxu1 }
 0xa16   : > { %v697_v9 = vrot.slane %v695_v7, 2  ;;  %v688_v11 = vadd.f32 %v686_v10, %v4683_v61 }
 0xa18   : > { %698 = vrot.lane.b32.xlu0 %v697_v9, %s4537_s21  ;;  %v3829_v12 = vmul.f32 -1.442695, %v688_v11 }
 0xa1a   : > { %4437 = vpow2.f32 %v3829_v12 }
 0xa27   : > { %v4438_v13 = vpop.eup %4437 }
 0xa28   : > { %v692_v14 = vadd.f32 1.0, %v4438_v13 }
 0xa2a   : > { %4439 = vrcp.f32 %v692_v14 }
 0xa37   : > { %v4440_v15 = vpop.eup %4439 }
 0xa38   : > { %v708_v20 = vsub.f32 1.0, %v4440_v15  ;;  %v716_v23 = vmul.f32 %v4440_v15, %v714_v21 }
 0xa8a   : > { %v699_v16 = vpop.permute.xlu0 %698 }
 0xa8b   : > { %v701_v17 = vmul.f32 %v4440_v15, %v699_v16 }
 0xa8d   : > { %703 = vrot.lane.b32.xlu1 %v701_v17, %s4536_s20 }
 0xaff   : > { %v704_v18 = vpop.permute.xlu1 %703 }
 0xb00   : > { %v706_v57 = vadd.f32 %v704_v18, %v4683_v61  ;;  %v733_v61 = vld [vmem:[#allocation12 + $0x20] sm:$0x3f] (%p273_p5) }
 0xb01   :  { %v783_v29 = vrot.slane (%p273_p5), %v733_v61, 2  ;;  %v1174_v32 = vrot.slane (%p273_p5), %v733_v61, 4 }
 0xb02   : > { %4441 = vtanh.f32 %v706_v57 }
 0xb03   :  { %4163 = vmatprep.subr.msk.mxu0 (%p273_p5), %vm96_vm1, %v783_v29  ;;  %4368 = vmatprep.subr.msk.mxu1 (%p273_p5), %vm96_vm1, %v783_v29 }
 0xb04   :  { %4164 = vmatpush3.msk.msra.mxu0 (%p273_p5), %vm96_vm1, %v783_v29  ;;  %4369 = vmatpush3.msk.msra.mxu1 (%p273_p5), %vm96_vm1, %v783_v29 }
 0xb05   :  { %4215 = vmatprep.subr.msk.mxu0 (%p273_p5), %vm96_vm1, %v1174_v32  ;;  %4189 = vmatprep.subr.msk.mxu1 (%p273_p5), %vm96_vm1, %v733_v61 }
 0xb0f   : > { %v4442_v19 = vpop.eup %4441 }
 0xb10   : > { %710 = vrot.lane.b32.xlu0 %v4442_v19, %s4535_s19 }
 0xb82   : > { %v711_v22 = vpop.permute.xlu0 %710 }
 0xb83   : > { %v713_v24 = vmul.f32 %v711_v22, %v708_v20 }
 0xb85   : > { %v717_v53 = vadd.f32 %v716_v23, %v713_v24  }
 0xb87   : > { %v722_v25 = vsel %vm721_vm6, %v720_v4, %v717_v53 }
 0xb88   : > { %725 = vrot.lane.b32.xlu1 %v722_v25, %s4535_s19 }
 0xbf7   :  { %275 = sbr.rel (!%p273_p5) target bundleno = 229 (0xe5), region = 82 }
 0xbfa   : > { %v726_v26 = vpop.permute.xlu1 %725 }
 0xbfb   : > { %3831 = vst.msk [vmem:[%s3775_s24 + $0x8] sm:$0xff] %vm47_vm2, %v726_v26 }
 0xc02   :  { %v750_v27 = vld [vmem:[#allocation3 + $0x8] sm:$0xff]  ;;  %v764_v28 = vld [vmem:[#allocation3 + $0x78] sm:$0xff]  ;;  %v751_v30 = vld [vmem:[#allocation3 + $0x10] sm:$0xff] }
 0xc03   :  { %4165 = vmatprep.mubr.msk.f32.mxu0 %vm47_vm2, %v750_v27  ;;  %4186 = vmatprep.mubr.msk.f32.mxu1 %vm47_vm2, %v764_v28  ;;  %v765_v31 = vld [vmem:[#allocation3 + $0x80] sm:$0xff]  ;;  %v752_v33 = vld [vmem:[#allocation3 + $0x18] sm:$0xff]  ;;  %v735_v34 = vld [vmem:[#allocation3 + $0xe] sm:$0xff] }
 0xc04   :  { %4166 = vmatmul.mubr.msk.f32.vlgmr.msra.gmra.mxu0 %vm47_vm2, %v751_v30  ;;  %4187 = vmatmul.mubr.msk.f32.vlgmr.msra.gmra.mxu1 %vm47_vm2, %v765_v31  ;;  %v734_v1 = vld [vmem:[#allocation3 + $0x6] sm:$0xff]  ;;  %v736_v36 = vld [vmem:[#allocation3 + $0x16] sm:$0xff]  ;;  %v737_v38 = vld [vmem:[#allocation3 + $0x1e] sm:$0xff] }
 0xc05   :  { %v753_v2 = vld [vmem:[#allocation3 + $0x20] sm:$0xff]  ;;  %4216 = vmatpush3.msk.msra.mxu0 %vm96_vm1, %v1174_v32  ;;  %4168 = vmatprep.mubr.msk.f32.mxu0 %vm47_vm2, %v752_v33  ;;  %v754_v35 = vld [vmem:[#allocation3 + $0x28] sm:$0xff]  ;;  %v755_v37 = vld [vmem:[#allocation3 + $0x30] sm:$0xff] }
 0xc06   :  { %4190 = vmatpush3.msk.msra.mxu1 %vm96_vm1, %v733_v61  ;;  %4191 = vmatprep.mubr.msk.f32.mxu1 %vm47_vm2, %v734_v1  ;;  %v756_v39 = vld [vmem:[#allocation3 + $0x38] sm:$0xff]  ;;  %v738_v40 = vld [vmem:[#allocation3 + $0x26] sm:$0xff]  ;;  %v739_v42 = vld [vmem:[#allocation3 + $0x2e] sm:$0xff] }
 0xc07   :  { %v757_v41 = vld [vmem:[#allocation3 + $0x40] sm:$0xff]  ;;  %v758_v43 = vld [vmem:[#allocation3 + $0x48] sm:$0xff]  ;;  %v740_v44 = vld [vmem:[#allocation3 + $0x36] sm:$0xff] }
 0xc08   :  { %4169 = vmatmul.mubr.msk.f32.gmra.mxu0 %vm47_vm2, %v753_v2  ;;  %4192 = vmatmul.mubr.msk.f32.vlgmr.msra.gmra.mxu1 %vm47_vm2, %v735_v34  ;;  %v759_v45 = vld [vmem:[#allocation3 + $0x50] sm:$0xff]  ;;  %v741_v46 = vld [vmem:[#allocation3 + $0x3e] sm:$0xff]  ;;  %v742_v48 = vld [vmem:[#allocation3 + $0x46] sm:$0xff] }
 0xc09   :  { %4171 = vmatprep.mubr.msk.f32.mxu0 %vm47_vm2, %v754_v35  ;;  %4194 = vmatprep.mubr.msk.f32.mxu1 %vm47_vm2, %v736_v36  ;;  %v760_v47 = vld [vmem:[#allocation3 + $0x58] sm:$0xff]  ;;  %v761_v49 = vld [vmem:[#allocation3 + $0x60] sm:$0xff]  ;;  %v743_v50 = vld [vmem:[#allocation3 + $0x4e] sm:$0xff] }
 0xc0a   :  { %v762_v51 = vld [vmem:[#allocation3 + $0x68] sm:$0xff]  ;;  %v744_v52 = vld [vmem:[#allocation3 + $0x56] sm:$0xff]  ;;  %v745_v54 = vld [vmem:[#allocation3 + $0x5e] sm:$0xff] }
 0xc0b   :  { %v763_v53 = vld [vmem:[#allocation3 + $0x70] sm:$0xff]  ;;  %v746_v55 = vld [vmem:[#allocation3 + $0x66] sm:$0xff]  ;;  %v768_v62 = vld [vmem:[#allocation3 + $0x1a] sm:$0xff] }
 0xc0c   :  { %4172 = vmatmul.mubr.msk.f32.gmra.mxu0 %vm47_vm2, %v755_v37  ;;  %4195 = vmatmul.mubr.msk.f32.gmra.mxu1 %vm47_vm2, %v737_v38  ;;  %v766_v56 = vld [vmem:[#allocation3 + $0xa] sm:$0xff]  ;;  %v767_v59 = vld [vmem:[#allocation3 + $0x12] sm:$0xff]  ;;  %v749_v63 = vld [vmem:[#allocation3 + $0x7e] sm:$0xff] }
 0xc0d   :  { %4174 = vmatprep.mubr.msk.f32.mxu0 %vm47_vm2, %v756_v39  ;;  %4197 = vmatprep.mubr.msk.f32.mxu1 %vm47_vm2, %v738_v40  ;;  %v747_v58 = vld [vmem:[#allocation3 + $0x6e] sm:$0xff]  ;;  %v748_v60 = vld [vmem:[#allocation3 + $0x76] sm:$0xff]  ;;  %v769_v3 = vld [vmem:[#allocation3 + $0x22] sm:$0xff] }
 0xc0e   :  { %v770_v4 = vld [vmem:[#allocation3 + $0x2a] sm:$0xff]  ;;  %v771_v5 = vld [vmem:[#allocation3 + $0x32] sm:$0xff]  ;;  %v772_v6 = vld [vmem:[#allocation3 + $0x3a] sm:$0xff] }
 0xc0f   :  { %v773_v7 = vld [vmem:[#allocation3 + $0x42] sm:$0xff]  ;;  %v774_v8 = vld [vmem:[#allocation3 + $0x4a] sm:$0xff]  ;;  %v775_v9 = vld [vmem:[#allocation3 + $0x52] sm:$0xff] }
 0xc10   :  { %4175 = vmatmul.mubr.msk.f32.gmra.mxu0 %vm47_vm2, %v757_v41  ;;  %4198 = vmatmul.mubr.msk.f32.gmra.mxu1 %vm47_vm2, %v739_v42  ;;  %v776_v10 = vld [vmem:[#allocation3 + $0x5a] sm:$0xff]  ;;  %v777_v11 = vld [vmem:[#allocation3 + $0x62] sm:$0xff]  ;;  %v778_v12 = vld [vmem:[#allocation3 + $0x6a] sm:$0xff] }
 0xc11   :  { %4177 = vmatprep.mubr.msk.f32.mxu0 %vm47_vm2, %v758_v43  ;;  %4200 = vmatprep.mubr.msk.f32.mxu1 %vm47_vm2, %v740_v44  ;;  %v779_v13 = vld [vmem:[#allocation3 + $0x72] sm:$0xff]  ;;  %v780_v14 = vld [vmem:[#allocation3 + $0x7a] sm:$0xff]  ;;  %v781_v15 = vld [vmem:[#allocation3 + $0x82] sm:$0xff] }
 0xc12   :  { %v4801_v42 = vld [vmem:[#allocation12 + $0x28] ss:$0 sm:$0xff] }
 0xc14   :  { %4178 = vmatmul.mubr.msk.f32.gmra.mxu0 %vm47_vm2, %v759_v45  ;;  %4201 = vmatmul.mubr.msk.f32.gmra.mxu1 %vm47_vm2, %v741_v46 }
 0xc15   :  { %4180 = vmatprep.mubr.msk.f32.mxu0 %vm47_vm2, %v760_v47  ;;  %4203 = vmatprep.mubr.msk.f32.mxu1 %vm47_vm2, %v742_v48 }
 0xc18   :  { %4181 = vmatmul.mubr.msk.f32.gmra.mxu0 %vm47_vm2, %v761_v49  ;;  %4204 = vmatmul.mubr.msk.f32.gmra.mxu1 %vm47_vm2, %v743_v50 }
 0xc19   :  { %4183 = vmatprep.mubr.msk.f32.mxu0 %vm47_vm2, %v762_v51  ;;  %4206 = vmatprep.mubr.msk.f32.mxu1 %vm47_vm2, %v744_v52 }
 0xc1c   :  { %4184 = vmatmul.mubr.msk.f32.gmra.mxu0 %vm47_vm2, %v763_v53  ;;  %4207 = vmatmul.mubr.msk.f32.gmra.mxu1 %vm47_vm2, %v745_v54 }
 0xc1d   :  { %4209 = vmatprep.mubr.msk.f32.mxu1 %vm47_vm2, %v746_v55  ;;  %4217 = vmatprep.mubr.msk.f32.mxu0 %vm47_vm2, %v766_v56 }
 0xc20   :  { %4210 = vmatmul.mubr.msk.f32.gmra.mxu1 %vm47_vm2, %v747_v58  ;;  %4218 = vmatmul.mubr.msk.f32.vlgmr.msra.gmra.mxu0 %vm47_vm2, %v767_v59 }
 0xc21   :  { %4212 = vmatprep.mubr.msk.f32.mxu1 %vm47_vm2, %v748_v60  ;;  %4220 = vmatprep.mubr.msk.f32.mxu0 %vm47_vm2, %v768_v62 }
 0xc24   :  { %4213 = vmatmul.mubr.msk.f32.gmra.mxu1 %vm47_vm2, %v749_v63  ;;  %4221 = vmatmul.mubr.msk.f32.gmra.mxu0 %vm47_vm2, %v769_v3 }
 0xc25   :  { %4223 = vmatprep.mubr.msk.f32.mxu0 %vm47_vm2, %v770_v4 }
 0xc28   :  { %4224 = vmatmul.mubr.msk.f32.gmra.mxu0 %vm47_vm2, %v771_v5 }
 0xc29   :  { %4226 = vmatprep.mubr.msk.f32.mxu0 %vm47_vm2, %v772_v6 }
 0xc2c   :  { %4227 = vmatmul.mubr.msk.f32.gmra.mxu0 %vm47_vm2, %v773_v7 }
 0xc2d   :  { %4229 = vmatprep.mubr.msk.f32.mxu0 %vm47_vm2, %v774_v8 }
 0xc30   :  { %4230 = vmatmul.mubr.msk.f32.gmra.mxu0 %vm47_vm2, %v775_v9 }
 0xc31   :  { %4232 = vmatprep.mubr.msk.f32.mxu0 %vm47_vm2, %v776_v10 }
 0xc34   :  { %4233 = vmatmul.mubr.msk.f32.gmra.mxu0 %vm47_vm2, %v777_v11 }
 0xc35   :  { %4235 = vmatprep.mubr.msk.f32.mxu0 %vm47_vm2, %v778_v12 }
 0xc38   :  { %4236 = vmatmul.mubr.msk.f32.gmra.mxu0 %vm47_vm2, %v779_v13 }
 0xc39   :  { %4238 = vmatprep.mubr.msk.f32.mxu0 %vm47_vm2, %v780_v14 }
 0xc3c   :  { %4239 = vmatmul.mubr.msk.f32.gmra.mxu0 %vm47_vm2, %v781_v15 }
 0xcc4   :  { %v4167_v16 = vpop.f32.mrf.mxu0  ;;  %v4789_v17 = vpop.f32.mrf.mxu1 }
 0xcc6   :  { %v900_v18 = vpop.f32.mrf.mxu0  ;;  %v4791_v57 = vpop.f32.mrf.mxu1 }
 0xcc8   :  { %v4170_v19 = vpop.f32.mrf.mxu0  ;;  %v4193_v20 = vpop.f32.mrf.mxu1 }
 0xcc9   :  { %v1101_v37 = vadd.f32 %v4193_v20, %v4167_v16 }
 0xcca   :  { %v910_v21 = vpop.f32.mrf.mxu0  ;;  %v1095_v22 = vpop.f32.mrf.mxu1 }
 0xccb   :  { %v1096_v39 = vadd.f32 %v1095_v22, %v900_v18 }
 0xccc   :  { %v4173_v23 = vpop.f32.mrf.mxu0  ;;  %v4196_v24 = vpop.f32.mrf.mxu1 }
 0xccd   :  { %v1111_v44 = vadd.f32 %v4196_v24, %v4170_v19 }
 0xcce   :  { %v920_v25 = vpop.f32.mrf.mxu0  ;;  %v1105_v26 = vpop.f32.mrf.mxu1 }
 0xccf   :  { %v1106_v47 = vadd.f32 %v1105_v26, %v910_v21 }
 0xcd0   :  { %v4176_v61 = vpop.f32.mrf.mxu0  ;;  %v4199_v27 = vpop.f32.mrf.mxu1 }
 0xcd1   :  { %v1121_v53 = vadd.f32 %v4199_v27, %v4173_v23 }
 0xcd2   :  { %v930_v28 = vpop.f32.mrf.mxu0  ;;  %v1115_v29 = vpop.f32.mrf.mxu1 }
 0xcd3   :  { %v1116_v56 = vadd.f32 %v1115_v29, %v920_v25 }
 0xcd4   :  { %v4179_v30 = vpop.f32.mrf.mxu0  ;;  %v4202_v31 = vpop.f32.mrf.mxu1 }
 0xcd5   :  { %v1131_v6 = vadd.f32 %v4202_v31, %v4176_v61  ;;  %v4839_v31 = vld [vmem:[#allocation12 + $0x40] sm:$0xff] }
 0xcd6   :  { %v940_v32 = vpop.f32.mrf.mxu0  ;;  %v1125_v1 = vpop.f32.mrf.mxu1 }
 0xcd7   :  { %v1126_v9 = vadd.f32 %v1125_v1, %v930_v28 }
 0xcd8   :  { %v4793_v33 = vpop.f32.mrf.mxu0  ;;  %v4205_v35 = vpop.f32.mrf.mxu1 }
 0xcd9   :  { %v1141_v20 = vadd.f32 %v4205_v35, %v4179_v30  ;;  %v1680_v30 = vld [vmem:[#allocation12 + $0x48] sm:$0xf] }
 0xcda   :  { %v4795_v2 = vpop.f32.mrf.mxu0  ;;  %v1135_v40 = vpop.f32.mrf.mxu1  ;;  %4269 = vmatprep.subr.msk.mxu0 %vm719_vm5, %v1680_v30 }
 0xcdb   :  { %v1136_v23 = vadd.f32 %v1135_v40, %v940_v32  ;;  %v1706_v32 = vrot.slane %v4839_v31, 4  ;;  %4270 = vmatpush3.msk.msra.mxu0 %vm719_vm5, %v1680_v30 }
 0xcdc   :  { %v4797_v34 = vpop.f32.mrf.mxu0  ;;  %v4208_v48 = vpop.f32.mrf.mxu1 }
 0xcdd   :  { %4241 = vmatprep.subr.msk.mxu1 %vm719_vm5, %v1706_v32 }
 0xcde   :  { %v4799_v36 = vpop.f32.mrf.mxu0  ;;  %v1145_v59 = vpop.f32.mrf.mxu1  ;;  %4242 = vmatpush3.msk.msra.mxu1 %vm719_vm5, %v1706_v32 }
 0xcdf   :  { %v1146_v40 = vadd.f32 %v1145_v59, %v4795_v2  ;;  %4255 = vmatprep.subr.msk.mxu1 %vm719_vm5, %v4839_v31 }
 0xce0   :  { %v4219_v38 = vpop.f32.mrf.mxu0  ;;  %v4211_v12 = vpop.f32.mrf.mxu1 }
 0xce1   :  { %v1371_v41 = vadd.f32 %v4219_v38, %v1101_v37  ;;  %v1151_v37 = vadd.f32 %v4208_v48, %v4793_v33  ;;  %v1161_v2 = vadd.f32 %v4211_v12, %v4797_v34 }
 0xce2   :  { %v1291_v43 = vpop.f32.mrf.mxu0  ;;  %v1155_v26 = vpop.f32.mrf.mxu1 }
 0xce3   :  { %v1370_v45 = vadd.f32 %v1291_v43, %v1096_v39  ;;  %v4804_v49 = vadd.f32 %v4801_v42, %v1371_v41 }
 0xce4   :  { %v4222_v46 = vpop.f32.mrf.mxu0 }
 0xce5   :  { %v4807_v50 = vadd.f32 %v4801_v42, %v1370_v45  ;;  %v1373_v51 = vadd.f32 %v4222_v46, %v1111_v44  ;;  %v1409_v60 = vsel %vm1407_vm7, %v4804_v49, 0.0  ;;  %v4214_v44 = vpop.f32.mrf.mxu1 }
 0xce6   :  { %v1301_v52 = vpop.f32.mrf.mxu0 }
 0xce7   :  { %v1408_v54 = vsel %vm1407_vm7, %v4807_v50, 0.0  ;;  %v1372_v55 = vadd.f32 %v1301_v52, %v1106_v47  ;;  %v4814_v62 = vadd.f32 %v4801_v42, %v1373_v51  ;;  %v1165_v59 = vpop.f32.mrf.mxu1 }
 0xce8   :  { %v4225_v58 = vpop.f32.mrf.mxu0  ;;  %v1410_v4 = vadd.f32 %v1409_v60, %v1408_v54 }
 0xce9   :  { %v4817_v63 = vadd.f32 %v4801_v42, %v1372_v55  ;;  %v1375_v3 = vadd.f32 %v4225_v58, %v1121_v53  ;;  %v1413_v13 = vsel %vm1407_vm7, %v4814_v62, 0.0  ;;  %v1156_v58 = vadd.f32 %v1155_v26, %v4799_v36 }
 0xcea   :  { %v1311_v5 = vpop.f32.mrf.mxu0 }
 0xceb   :  { %v1411_v7 = vsel %vm1407_vm7, %v4817_v63, 0.0  ;;  %v1374_v8 = vadd.f32 %v1311_v5, %v1116_v56  ;;  %v4824_v14 = vadd.f32 %v4801_v42, %v1375_v3 }
 0xcec   :  { %v1412_v10 = vadd.f32 %v1411_v7, %v1410_v4  ;;  %v4228_v11 = vpop.f32.mrf.mxu0 }
 0xced   :  { %v4827_v15 = vadd.f32 %v4801_v42, %v1374_v8  ;;  %v1377_v16 = vadd.f32 %v4228_v11, %v1131_v6  ;;  %v1417_v61 = vsel %vm1407_vm7, %v4824_v14, 0.0  ;;  %v1171_v6 = vadd.f32 %v4214_v44, %v4789_v17 }
 0xcee   :  { %v1414_v18 = vadd.f32 %v1413_v13, %v1412_v10  ;;  %v1321_v19 = vpop.f32.mrf.mxu0 }
 0xcef   :  { %v1415_v21 = vsel %vm1407_vm7, %v4827_v15, 0.0  ;;  %v1376_v22 = vadd.f32 %v1321_v19, %v1126_v9  ;;  %v4834_v27 = vadd.f32 %v4801_v42, %v1377_v16  ;;  %v1166_v9 = vadd.f32 %v1165_v59, %v4791_v57 }
 0xcf0   :  { %v1416_v24 = vadd.f32 %v1415_v21, %v1414_v18  ;;  %v4231_v25 = vpop.f32.mrf.mxu0 }
 0xcf1   :  { %v4837_v28 = vadd.f32 %v4801_v42, %v1376_v22  ;;  %v1379_v29 = vadd.f32 %v4231_v25, %v1141_v20  ;;  %v1421_v45 = vsel %vm1407_vm7, %v4834_v27, 0.0 }
 0xcf2   :  { %v1418_v1 = vadd.f32 %v1417_v61, %v1416_v24  ;;  %v1331_v35 = vpop.f32.mrf.mxu0 }
 0xcf3   :  { %v1419_v38 = vsel %vm1407_vm7, %v4837_v28, 0.0  ;;  %v1378_v39 = vadd.f32 %v1331_v35, %v1136_v23  ;;  %v4852_v46 = vadd.f32 %v4801_v42, %v1379_v29 }
 0xcf4   :  { %v1420_v41 = vadd.f32 %v1419_v38, %v1418_v1  ;;  %v4234_v43 = vpop.f32.mrf.mxu0 }
 0xcf5   :  { %v4855_v33 = vadd.f32 %v4801_v42, %v1378_v39  ;;  %v1381_v47 = vadd.f32 %v4234_v43, %v1151_v37  ;;  %v1425_v60 = vsel %vm1407_vm7, %v4852_v46, 0.0 }
 0xcf6   :  { %v1422_v48 = vadd.f32 %v1421_v45, %v1420_v41  ;;  %v1341_v51 = vpop.f32.mrf.mxu0 }
 0xcf7   :  { %v1423_v52 = vsel %vm1407_vm7, %v4855_v33, 0.0  ;;  %v1380_v53 = vadd.f32 %v1341_v51, %v1146_v40  ;;  %v4864_v55 = vadd.f32 %v4801_v42, %v1381_v47 }
 0xcf8   :  { %v1424_v54 = vadd.f32 %v1423_v52, %v1422_v48  ;;  %v4237_v56 = vpop.f32.mrf.mxu0 }
 0xcf9   :  { %v4870_v3 = vadd.f32 %v4801_v42, %v1380_v53  ;;  %v1383_v4 = vadd.f32 %v4237_v56, %v1161_v2  ;;  %v1429_v36 = vsel %vm1407_vm7, %v4864_v55, 0.0 }
 0xcfa   :  { %v1426_v34 = vadd.f32 %v1425_v60, %v1424_v54  ;;  %v1351_v5 = vpop.f32.mrf.mxu0 }
 0xcfb   :  { %v1427_v7 = vsel %vm1407_vm7, %v4870_v3, 0.0  ;;  %v1382_v8 = vadd.f32 %v1351_v5, %v1156_v58  ;;  %v4879_v12 = vadd.f32 %v4801_v42, %v1383_v4 }
 0xcfc   :  { %v1428_v10 = vadd.f32 %v1427_v7, %v1426_v34  ;;  %v4240_v11 = vpop.f32.mrf.mxu0 }
 0xcfd   :  { %v4882_v13 = vadd.f32 %v4801_v42, %v1382_v8  ;;  %v1385_v16 = vadd.f32 %v4240_v11, %v1171_v6  ;;  %v1433_v21 = vsel %vm1407_vm7, %v4879_v12, 0.0 }
 0xcfe   :  { %v1430_v17 = vadd.f32 %v1429_v36, %v1428_v10  ;;  %v1361_v18 = vpop.f32.mrf.mxu0 }
 0xcff   :  { %v1431_v57 = vsel %vm1407_vm7, %v4882_v13, 0.0  ;;  %v1384_v19 = vadd.f32 %v1361_v18, %v1166_v9  ;;  %v4893_v22 = vadd.f32 %v4801_v42, %v1385_v16 }
 0xd00   :  { %v1432_v20 = vadd.f32 %v1431_v57, %v1430_v17 }
 0xd01   :  { %v1405_v23 = vadd.f32 %v4801_v42, %v1384_v19  ;;  %v1437_v61 = vsel %vm1407_vm7, %v4893_v22, 0.0 }
 0xd02   :  { %v1434_v24 = vadd.f32 %v1433_v21, %v1432_v20 }
 0xd03   :  { %v1435_v25 = vsel %vm1407_vm7, %v1405_v23, 0.0 }
 0xd04   :  { %v1436_v26 = vadd.f32 %v1435_v25, %v1434_v24 }
 0xd06   :  { %v1438_v29 = vadd.f32 %v1437_v61, %v1436_v26 }
 0xd08   :  { %v1439_v30 = vrot.slane %v1438_v29, 4 }
 0xd0a   :  { %v1440_v1 = vadd.f32 %v1439_v30, %v1438_v29 }
 0xd0c   :  { %v1441_v35 = vrot.slane %v1440_v1, 2 }
 0xd0e   :  { %v1442_v32 = vadd.f32 %v1441_v35, %v1440_v1 }
 0xd10   :  { %v1443_v37 = vrot.slane %v1442_v32, 1 }
 0xd12   :  { %v1444_v38 = vadd.f32 %v1443_v37, %v1442_v32 }
 0xd14   :  { %v1445_v39 = vmul.f32 0.0078125, %v1444_v38 }
 0xd16   :  { %v4900_v40 = vsub.f32 %v4807_v50, %v1445_v39  ;;  %v4903_v42 = vsub.f32 %v4804_v49, %v1445_v39  ;;  %v4906_v41 = vsub.f32 %v4817_v63, %v1445_v39  ;;  %v4909_v43 = vsub.f32 %v4814_v62, %v1445_v39 }
 0xd17   :  { %v4916_v47 = vsub.f32 %v4827_v15, %v1445_v39  ;;  %v4921_v49 = vsub.f32 %v4824_v14, %v1445_v39  ;;  %v4928_v2 = vsub.f32 %v4837_v28, %v1445_v39  ;;  %v4934_v14 = vsub.f32 %v4834_v27, %v1445_v39 }
 0xd18   :  { %v1462_v44 = vmul.f32 %v4900_v40, %v4900_v40  ;;  %v1463_v45 = vmul.f32 %v4903_v42, %v4903_v42  ;;  %v1464_v50 = vmul.f32 %v4906_v41, %v4906_v41  ;;  %v1465_v63 = vmul.f32 %v4909_v43, %v4909_v43 }
 0xd19   :  { %v1466_v15 = vmul.f32 %v4916_v47, %v4916_v47  ;;  %v1467_v54 = vmul.f32 %v4921_v49, %v4921_v49  ;;  %v1454_v59 = vsub.f32 %v4855_v33, %v1445_v39  ;;  %v1468_v28 = vmul.f32 %v4928_v2, %v4928_v2 }
 0xd1a   :  { %v1478_v62 = vsel %vm1407_vm7, %v1462_v44, 0.0  ;;  %v1479_v48 = vsel %vm1407_vm7, %v1463_v45, 0.0  ;;  %v1481_v52 = vsel %vm1407_vm7, %v1464_v50, 0.0  ;;  %v1483_v56 = vsel %vm1407_vm7, %v1465_v63, 0.0 }
 0xd1b   :  { %v1480_v51 = vadd.f32 %v1479_v48, %v1478_v62  ;;  %v1485_v60 = vsel %vm1407_vm7, %v1466_v15, 0.0  ;;  %v1455_v34 = vsub.f32 %v4852_v46, %v1445_v39  ;;  %v1469_v27 = vmul.f32 %v4934_v14, %v4934_v14 }
 0xd1c   :  { %v1487_v5 = vsel %vm1407_vm7, %v1467_v54, 0.0  ;;  %v1456_v7 = vsub.f32 %v4870_v3, %v1445_v39  ;;  %v1470_v8 = vmul.f32 %v1454_v59, %v1454_v59  ;;  %v1489_v9 = vsel %vm1407_vm7, %v1468_v28, 0.0 }
 0xd1d   :  { %v1482_v53 = vadd.f32 %v1481_v52, %v1480_v51  ;;  %v1457_v36 = vsub.f32 %v4864_v55, %v1445_v39  ;;  %v1471_v10 = vmul.f32 %v1455_v34, %v1455_v34  ;;  %v1491_v11 = vsel %vm1407_vm7, %v1469_v27, 0.0  ;;  %v3884_v27 = vld [vmem:[#allocation12 + $0x30] ss:$0 sm:$0xff] }
 0xd1e   :  { %v1458_v46 = vsub.f32 %v4882_v13, %v1445_v39  ;;  %v1472_v17 = vmul.f32 %v1456_v7, %v1456_v7  ;;  %v1493_v18 = vsel %vm1407_vm7, %v1470_v8, 0.0  ;;  %v1459_v19 = vsub.f32 %v4879_v12, %v1445_v39 }
 0xd1f   :  { %v1484_v58 = vadd.f32 %v1483_v56, %v1482_v53  ;;  %v1473_v20 = vmul.f32 %v1457_v36, %v1457_v36  ;;  %v1495_v3 = vsel %vm1407_vm7, %v1471_v10, 0.0  ;;  %v1460_v24 = vsub.f32 %v1405_v23, %v1445_v39 }
 0xd20   :  { %v1474_v25 = vmul.f32 %v1458_v46, %v1458_v46  ;;  %v1497_v55 = vsel %vm1407_vm7, %v1472_v17, 0.0  ;;  %v1461_v61 = vsub.f32 %v4893_v22, %v1445_v39  ;;  %v1475_v29 = vmul.f32 %v1459_v19, %v1459_v19 }
 0xd21   :  { %v1486_v4 = vadd.f32 %v1485_v60, %v1484_v58  ;;  %v1499_v13 = vsel %vm1407_vm7, %v1473_v20, 0.0  ;;  %v1476_v1 = vmul.f32 %v1460_v24, %v1460_v24 }
 0xd22   :  { %v1501_v35 = vsel %vm1407_vm7, %v1474_v25, 0.0  ;;  %v1477_v12 = vmul.f32 %v1461_v61, %v1461_v61  ;;  %v1503_v37 = vsel %vm1407_vm7, %v1475_v29, 0.0 }
 0xd23   :  { %v1488_v6 = vadd.f32 %v1487_v5, %v1486_v4  ;;  %v1505_v23 = vsel %vm1407_vm7, %v1476_v1, 0.0 }
 0xd24   :  { %v1507_v45 = vsel %vm1407_vm7, %v1477_v12, 0.0 }
 0xd25   :  { %v1490_v33 = vadd.f32 %v1489_v9, %v1488_v6 }
 0xd27   :  { %v1492_v16 = vadd.f32 %v1491_v11, %v1490_v33 }
 0xd29   :  { %v1494_v57 = vadd.f32 %v1493_v18, %v1492_v16 }
 0xd2b   :  { %v1496_v21 = vadd.f32 %v1495_v3, %v1494_v57 }
 0xd2d   :  { %v1498_v26 = vadd.f32 %v1497_v55, %v1496_v21 }
 0xd2f   :  { %v1500_v30 = vadd.f32 %v1499_v13, %v1498_v26 }
 0xd31   :  { %v1502_v32 = vadd.f32 %v1501_v35, %v1500_v30 }
 0xd33   :  { %v1504_v38 = vadd.f32 %v1503_v37, %v1502_v32 }
 0xd35   :  { %v1506_v44 = vadd.f32 %v1505_v23, %v1504_v38 }
 0xd37   :  { %v1508_v50 = vadd.f32 %v1507_v45, %v1506_v44 }
 0xd39   :  { %v1509_v63 = vrot.slane %v1508_v50, 4 }
 0xd3b   :  { %v1510_v22 = vadd.f32 %v1509_v63, %v1508_v50 }
 0xd3d   :  { %v1511_v39 = vrot.slane %v1510_v22, 2 }
 0xd3f   :  { %v1512_v62 = vadd.f32 %v1511_v39, %v1510_v22 }
 0xd41   :  { %v1513_v48 = vrot.slane %v1512_v62, 1 }
 0xd43   :  { %v1514_v51 = vadd.f32 %v1513_v48, %v1512_v62 }
 0xd45   :  { %v1515_v15 = vmul.f32 0.0078125, %v1514_v51 }
 0xd47   :  { %v1516_v52 = vadd.f32 1e-05, %v1515_v15 }
 0xd49   :  { %4443 = vrsqrt.f32 %v1516_v52 }
 0xd56   :  { %v4444_v53 = vpop.eup %4443 }
 0xd57   :  { %v1518_v54 = vmul.f32 %v4444_v53, %v4900_v40  ;;  %v1519_v56 = vmul.f32 %v4444_v53, %v4903_v42  ;;  %v1520_v58 = vmul.f32 %v4444_v53, %v4906_v41  ;;  %v1521_v28 = vmul.f32 %v4444_v53, %v4909_v43 }
 0xd58   :  { %v1522_v60 = vmul.f32 %v4444_v53, %v4916_v47  ;;  %v1523_v4 = vmul.f32 %v4444_v53, %v4921_v49  ;;  %v1524_v5 = vmul.f32 %v4444_v53, %v4928_v2  ;;  %v1525_v6 = vmul.f32 %v4444_v53, %v4934_v14  ;;  %v3885_v49 = vld [vmem:[#allocation12 + $0x38] ss:$0 sm:$0xff] }
 0xd59   :  { %v1526_v8 = vmul.f32 %v4444_v53, %v1454_v59  ;;  %v1527_v9 = vmul.f32 %v4444_v53, %v1455_v34  ;;  %v1528_v33 = vmul.f32 %v4444_v53, %v1456_v7  ;;  %v1529_v10 = vmul.f32 %v4444_v53, %v1457_v36 }
 0xd5a   :  { %v1530_v40 = vmul.f32 %v4444_v53, %v1458_v46  ;;  %v1531_v11 = vmul.f32 %v4444_v53, %v1459_v19  ;;  %v1532_v42 = vmul.f32 %v4444_v53, %v1460_v24  ;;  %v1539_v16 = vmul.f32 %v3884_v27, %v1518_v54 }
 0xd5b   :  { %v1540_v41 = vmul.f32 %v3884_v27, %v1519_v56  ;;  %v1541_v17 = vmul.f32 %v3884_v27, %v1520_v58  ;;  %v1533_v43 = vmul.f32 %v4444_v53, %v1461_v61  ;;  %v1542_v18 = vmul.f32 %v3884_v27, %v1521_v28 }
 0xd5c   :  { %v1543_v47 = vmul.f32 %v3884_v27, %v1522_v60  ;;  %v1544_v57 = vmul.f32 %v3884_v27, %v1523_v4  ;;  %v1545_v20 = vmul.f32 %v3884_v27, %v1524_v5  ;;  %v1546_v3 = vmul.f32 %v3884_v27, %v1525_v6 }
 0xd5d   :  { %v1547_v2 = vmul.f32 %v3884_v27, %v1526_v8  ;;  %v1548_v21 = vmul.f32 %v3884_v27, %v1527_v9  ;;  %v1549_v14 = vmul.f32 %v3884_v27, %v1528_v33  ;;  %v1550_v59 = vmul.f32 %v3884_v27, %v1529_v10 }
 0xd5e   :  { %v1551_v34 = vmul.f32 %v3884_v27, %v1530_v40  ;;  %v1552_v7 = vmul.f32 %v3884_v27, %v1531_v11  ;;  %v1553_v36 = vmul.f32 %v3884_v27, %v1532_v42  ;;  %v1560_v46 = vadd.f32 %v3885_v49, %v1539_v16 }
 0xd5f   :  { %v1561_v19 = vadd.f32 %v3885_v49, %v1540_v41  ;;  %v1562_v24 = vadd.f32 %v3885_v49, %v1541_v17  ;;  %v1554_v25 = vmul.f32 %v3884_v27, %v1533_v43  ;;  %v1563_v55 = vadd.f32 %v3885_v49, %v1542_v18 }
 0xd60   :  { %v1564_v26 = vadd.f32 %v3885_v49, %v1543_v47  ;;  %v1565_v61 = vadd.f32 %v3885_v49, %v1544_v57  ;;  %v1566_v29 = vadd.f32 %v3885_v49, %v1545_v20  ;;  %v1567_v13 = vadd.f32 %v3885_v49, %v1546_v3 }
 0xd61   :  { %v1568_v30 = vadd.f32 %v3885_v49, %v1547_v2  ;;  %v1569_v1 = vadd.f32 %v3885_v49, %v1548_v21  ;;  %v1570_v35 = vadd.f32 %v3885_v49, %v1549_v14  ;;  %v1571_v32 = vadd.f32 %v3885_v49, %v1550_v59 }
 0xd62   :  { %v1572_v12 = vadd.f32 %v3885_v49, %v1551_v34  ;;  %v1573_v37 = vadd.f32 %v3885_v49, %v1552_v7  ;;  %v1574_v38 = vadd.f32 %v3885_v49, %v1553_v36  ;;  %v1576_v23 = vmul.f32 0.01, %v1560_v46 }
 0xd63   :  { %v1577_v44 = vmul.f32 0.01, %v1561_v19  ;;  %v1578_v45 = vmul.f32 0.01, %v1562_v24  ;;  %v1575_v50 = vadd.f32 %v3885_v49, %v1554_v25  ;;  %v1579_v63 = vmul.f32 0.01, %v1563_v55 }
 0xd64   :  { %v1580_v22 = vmul.f32 0.01, %v1564_v26  ;;  %v1581_v39 = vmul.f32 0.01, %v1565_v61  ;;  %v1582_v62 = vmul.f32 0.01, %v1566_v29  ;;  %v1592_v15 = vmax.f32 %v1560_v46, %v1576_v23 }
 0xd65   :  { %v1583_v48 = vmul.f32 0.01, %v1567_v13  ;;  %v1584_v51 = vmul.f32 0.01, %v1568_v30  ;;  %v1585_v52 = vmul.f32 0.01, %v1569_v1  ;;  %v1593_v56 = vmax.f32 %v1561_v19, %v1577_v44 }
 0xd66   :  { %v1586_v53 = vmul.f32 0.01, %v1570_v35  ;;  %v1587_v54 = vmul.f32 0.01, %v1571_v32  ;;  %v1588_v58 = vmul.f32 0.01, %v1572_v12  ;;  %v1594_v4 = vmax.f32 %v1562_v24, %v1578_v45 }
 0xd67   :  { %v1589_v28 = vmul.f32 0.01, %v1573_v37  ;;  %v1590_v60 = vmul.f32 0.01, %v1574_v38  ;;  %1608 = vst.msk [vmem:[#allocation4] sm:$0xff] %vm1407_vm7, %v1592_v15  ;;  %v1595_v5 = vmax.f32 %v1563_v55, %v1579_v63  ;;  %v1596_v6 = vmax.f32 %v1564_v26, %v1580_v22  ;;  %1609 = vst.msk [vmem:[#allocation4 + $0x8] sm:$0xff] %vm1407_vm7, %v1593_v56 }
 0xd68   :  { %v1591_v27 = vmul.f32 0.01, %v1575_v50  ;;  %v1597_v8 = vmax.f32 %v1565_v61, %v1581_v39  ;;  %v1598_v9 = vmax.f32 %v1566_v29, %v1582_v62  ;;  %v1599_v33 = vmax.f32 %v1567_v13, %v1583_v48  ;;  %1610 = vst.msk [vmem:[#allocation4 + $0x10] sm:$0xff] %vm1407_vm7, %v1594_v4  ;;  %v2266_v4 = vld [vmem:[#allocation12 + $0x68] sm:$0xf] }
 0xd69   :  { %v1600_v10 = vmax.f32 %v1568_v30, %v1584_v51  ;;  %v1601_v40 = vmax.f32 %v1569_v1, %v1585_v52  ;;  %v1602_v11 = vmax.f32 %v1570_v35, %v1586_v53  ;;  %v1603_v42 = vmax.f32 %v1571_v32, %v1587_v54  ;;  %1611 = vst.msk [vmem:[#allocation4 + $0x18] sm:$0xff] %vm1407_vm7, %v1595_v5 }
 0xd6a   :  { %v1604_v16 = vmax.f32 %v1572_v12, %v1588_v58  ;;  %v1605_v41 = vmax.f32 %v1573_v37, %v1589_v28  ;;  %1612 = vst.msk [vmem:[#allocation4 + $0x20] sm:$0xff] %vm1407_vm7, %v1596_v6  ;;  %1613 = vst.msk [vmem:[#allocation4 + $0x28] sm:$0xff] %vm1407_vm7, %v1597_v8  ;;  %v1606_v17 = vmax.f32 %v1574_v38, %v1590_v60 }
 0xd6b   :  { %v1607_v43 = vmax.f32 %v1575_v50, %v1591_v27  ;;  %1614 = vst.msk [vmem:[#allocation4 + $0x30] sm:$0xff] %vm1407_vm7, %v1598_v9  ;;  %1615 = vst.msk [vmem:[#allocation4 + $0x38] sm:$0xff] %vm1407_vm7, %v1599_v33 }
 0xd6c   :  { %1616 = vst.msk [vmem:[#allocation4 + $0x40] sm:$0xff] %vm1407_vm7, %v1600_v10  ;;  %1617 = vst.msk [vmem:[#allocation4 + $0x48] sm:$0xff] %vm1407_vm7, %v1601_v40 }
 0xd6d   :  { %1618 = vst.msk [vmem:[#allocation4 + $0x50] sm:$0xff] %vm1407_vm7, %v1602_v11  ;;  %1619 = vst.msk [vmem:[#allocation4 + $0x58] sm:$0xff] %vm1407_vm7, %v1603_v42 }
 0xd6e   :  { %1620 = vst.msk [vmem:[#allocation4 + $0x60] sm:$0xff] %vm1407_vm7, %v1604_v16  ;;  %1621 = vst.msk [vmem:[#allocation4 + $0x68] sm:$0xff] %vm1407_vm7, %v1605_v41 }
 0xd6f   :  { %1622 = vst.msk [vmem:[#allocation4 + $0x70] sm:$0xff] %vm1407_vm7, %v1606_v17  ;;  %1623 = vst.msk [vmem:[#allocation4 + $0x78] sm:$0xff] %vm1407_vm7, %v1607_v43 }
 0xd70   :  { %v1624_v18 = vld [vmem:[#allocation4] ss:$4 sm:$0xff]  ;;  %v1632_v47 = vld [vmem:[#allocation4 + $0x2] ss:$4 sm:$0xff]  ;;  %v1652_v57 = vld [vmem:[#allocation4 + $0x1] ss:$4 sm:$0xff] }
 0xd71   :  { %v1639_v49 = vmax.f32 %v1624_v18, %v1632_v47  ;;  %v1660_v20 = vld [vmem:[#allocation4 + $0x3] ss:$4 sm:$0xff] }
 0xd72   :  { %v1626_v3 = vld [vmem:[#allocation4 + $0x20] ss:$4 sm:$0xff]  ;;  %v1634_v2 = vld [vmem:[#allocation4 + $0x22] ss:$4 sm:$0xff]  ;;  %v1667_v21 = vmax.f32 %v1652_v57, %v1660_v20  ;;  %v1654_v59 = vld [vmem:[#allocation4 + $0x21] ss:$4 sm:$0xff] }
 0xd73   :  { %v1640_v14 = vmax.f32 %v1626_v3, %v1634_v2  ;;  %v1662_v34 = vld [vmem:[#allocation4 + $0x23] ss:$4 sm:$0xff]  ;;  %1644 = vst [vmem:[#allocation5 + $0x8] ss:$2 sm:$0xff] %v1639_v49  ;;  %v3913_v20 = vld [vmem:[#allocation12 + $0x50] ss:$0 sm:$0xff] }
 0xd74   :  { %v1628_v7 = vld [vmem:[#allocation4 + $0x40] ss:$4 sm:$0xff]  ;;  %v1668_v36 = vmax.f32 %v1654_v59, %v1662_v34  ;;  %v1636_v46 = vld [vmem:[#allocation4 + $0x42] ss:$4 sm:$0xff]  ;;  %v1656_v19 = vld [vmem:[#allocation4 + $0x41] ss:$4 sm:$0xff] }
 0xd75   :  { %v1664_v24 = vld [vmem:[#allocation4 + $0x43] ss:$4 sm:$0xff]  ;;  %1672 = vst [vmem:[#allocation5 + $0x9] ss:$2 sm:$0xff] %v1667_v21  ;;  %1646 = vst [vmem:[#allocation5 + $0x18] ss:$2 sm:$0xff] %v1640_v14  ;;  %v1641_v25 = vmax.f32 %v1628_v7, %v1636_v46 }
 0xd76   :  { %v1669_v55 = vmax.f32 %v1656_v19, %v1664_v24  ;;  %v1630_v26 = vld [vmem:[#allocation4 + $0x60] ss:$4 sm:$0xff]  ;;  %v1638_v61 = vld [vmem:[#allocation4 + $0x62] ss:$4 sm:$0xff]  ;;  %v1658_v29 = vld [vmem:[#allocation4 + $0x61] ss:$4 sm:$0xff] }
 0xd77   :  { %1674 = vst [vmem:[#allocation5 + $0x19] ss:$2 sm:$0xff] %v1668_v36  ;;  %v1642_v13 = vmax.f32 %v1630_v26, %v1638_v61  ;;  %v1666_v30 = vld [vmem:[#allocation4 + $0x63] ss:$4 sm:$0xff]  ;;  %1648 = vst [vmem:[#allocation5 + $0x28] ss:$2 sm:$0xff] %v1641_v25 }
 0xd78   :  { %1676 = vst [vmem:[#allocation5 + $0x29] ss:$2 sm:$0xff] %v1669_v55  ;;  %v1670_v1 = vmax.f32 %v1658_v29, %v1666_v30 }
 0xd79   :  { %1650 = vst [vmem:[#allocation5 + $0x38] ss:$2 sm:$0xff] %v1642_v13 }
 0xd7a   :  { %1678 = vst [vmem:[#allocation5 + $0x39] ss:$2 sm:$0xff] %v1670_v1 }
 0xd7c   :  { %v1689_v35 = vld [vmem:[#allocation5 + $0x8] sm:$0xff]  ;;  %v1690_v12 = vld [vmem:[#allocation5 + $0x10] sm:$0xff] }
 0xd7d   :  { %v1697_v32 = vld [vmem:[#allocation5 + $0xa] sm:$0xff]  ;;  %4243 = vmatprep.mubr.msk.f32.mxu1 %vm1407_vm7, %v1689_v35 }
 0xd7e   :  { %4271 = vmatprep.mubr.msk.f32.mxu0 %vm1407_vm7, %v1697_v32  ;;  %v1698_v37 = vld [vmem:[#allocation5 + $0x12] sm:$0xff]  ;;  %4244 = vmatmul.mubr.msk.f32.vlgmr.msra.gmra.mxu1 %vm1407_vm7, %v1690_v12  ;;  %v1699_v23 = vld [vmem:[#allocation5 + $0x1a] sm:$0xff]  ;;  %v1681_v15 = vld [vmem:[#allocation5 + $0x6] sm:$0xff] }
 0xd7f   :  { %4272 = vmatmul.mubr.msk.f32.vlgmr.msra.gmra.mxu0 %vm1407_vm7, %v1698_v37  ;;  %v1691_v38 = vld [vmem:[#allocation5 + $0x18] sm:$0xff]  ;;  %4256 = vmatpush3.msk.msra.mxu1 %vm719_vm5, %v4839_v31  ;;  %v1692_v44 = vld [vmem:[#allocation5 + $0x20] sm:$0xff]  ;;  %v1693_v50 = vld [vmem:[#allocation5 + $0x28] sm:$0xff] }
 0xd80   :  { %4246 = vmatprep.mubr.msk.f32.mxu1 %vm1407_vm7, %v1691_v38  ;;  %4274 = vmatprep.mubr.msk.f32.mxu0 %vm1407_vm7, %v1699_v23  ;;  %v1700_v45 = vld [vmem:[#allocation5 + $0x22] sm:$0xff]  ;;  %v1701_v63 = vld [vmem:[#allocation5 + $0x2a] sm:$0xff]  ;;  %v1683_v53 = vld [vmem:[#allocation5 + $0x16] sm:$0xff] }
 0xd81   :  { %v1694_v22 = vld [vmem:[#allocation5 + $0x30] sm:$0xff]  ;;  %v1695_v31 = vld [vmem:[#allocation5 + $0x38] sm:$0xff]  ;;  %v1696_v48 = vld [vmem:[#allocation5 + $0x40] sm:$0xff]  ;;  %4283 = vmatprep.subr.msk.mxu1 %vm719_vm5, %v2266_v4 }
 0xd82   :  { %4247 = vmatmul.mubr.msk.f32.gmra.mxu1 %vm1407_vm7, %v1692_v44  ;;  %v1702_v39 = vld [vmem:[#allocation5 + $0x32] sm:$0xff]  ;;  %v1703_v62 = vld [vmem:[#allocation5 + $0x3a] sm:$0xff]  ;;  %v1704_v51 = vld [vmem:[#allocation5 + $0x42] sm:$0xff] }
 0xd83   :  { %4275 = vmatmul.mubr.msk.f32.gmra.mxu0 %vm1407_vm7, %v1700_v45  ;;  %4249 = vmatprep.mubr.msk.f32.mxu1 %vm1407_vm7, %v1693_v50  ;;  %v1682_v52 = vld [vmem:[#allocation5 + $0xe] sm:$0xff]  ;;  %v1684_v54 = vld [vmem:[#allocation5 + $0x1e] sm:$0xff]  ;;  %v1685_v56 = vld [vmem:[#allocation5 + $0x26] sm:$0xff] }
 0xd84   :  { %4277 = vmatprep.mubr.msk.f32.mxu0 %vm1407_vm7, %v1701_v63  ;;  %v1686_v58 = vld [vmem:[#allocation5 + $0x2e] sm:$0xff]  ;;  %v1687_v28 = vld [vmem:[#allocation5 + $0x36] sm:$0xff]  ;;  %v1688_v60 = vld [vmem:[#allocation5 + $0x3e] sm:$0xff] }
 0xd86   :  { %4250 = vmatmul.mubr.msk.f32.gmra.mxu1 %vm1407_vm7, %v1694_v22 }
 0xd87   :  { %4278 = vmatmul.mubr.msk.f32.gmra.mxu0 %vm1407_vm7, %v1702_v39  ;;  %4252 = vmatprep.mubr.msk.f32.mxu1 %vm1407_vm7, %v1695_v31 }
 0xd88   :  { %4280 = vmatprep.mubr.msk.f32.mxu0 %vm1407_vm7, %v1703_v62 }
 0xd8a   :  { %4253 = vmatmul.mubr.msk.f32.gmra.mxu1 %vm1407_vm7, %v1696_v48 }
 0xd8b   :  { %4281 = vmatmul.mubr.msk.f32.gmra.mxu0 %vm1407_vm7, %v1704_v51  ;;  %4257 = vmatprep.mubr.msk.f32.mxu1 %vm1407_vm7, %v1681_v15 }
 0xd8e   :  { %4258 = vmatmul.mubr.msk.f32.vlgmr.msra.gmra.mxu1 %vm1407_vm7, %v1682_v52 }
 0xd8f   :  { %4260 = vmatprep.mubr.msk.f32.mxu1 %vm1407_vm7, %v1683_v53  ;;  %4284 = vmatpush3.msk.msra.mxu1 %vm719_vm5, %v2266_v4 }
 0xd92   :  { %4261 = vmatmul.mubr.msk.f32.gmra.mxu1 %vm1407_vm7, %v1684_v54 }
 0xd93   :  { %4263 = vmatprep.mubr.msk.f32.mxu1 %vm1407_vm7, %v1685_v56 }
 0xd96   :  { %4264 = vmatmul.mubr.msk.f32.gmra.mxu1 %vm1407_vm7, %v1686_v58 }
 0xd97   :  { %4266 = vmatprep.mubr.msk.f32.mxu1 %vm1407_vm7, %v1687_v28 }
 0xd9a   :  { %4267 = vmatmul.mubr.msk.f32.gmra.mxu1 %vm1407_vm7, %v1688_v60 }
 0xe3e   :  { %v4245_v27 = vpop.f32.mrf.mxu1 }
 0xe3f   :  { %v4273_v6 = vpop.f32.mrf.mxu0 }
 0xe40   :  { %v1800_v5 = vpop.f32.mrf.mxu1 }
 0xe41   :  { %v2063_v33 = vpop.f32.mrf.mxu0 }
 0xe42   :  { %v4248_v8 = vpop.f32.mrf.mxu1 }
 0xe43   :  { %v4276_v11 = vpop.f32.mrf.mxu0 }
 0xe44   :  { %v1810_v9 = vpop.f32.mrf.mxu1 }
 0xe45   :  { %v2073_v41 = vpop.f32.mrf.mxu0 }
 0xe46   :  { %v4251_v10 = vpop.f32.mrf.mxu1 }
 0xe47   :  { %v4279_v49 = vpop.f32.mrf.mxu0 }
 0xe48   :  { %v1820_v40 = vpop.f32.mrf.mxu1 }
 0xe49   :  { %v2083_v46 = vpop.f32.mrf.mxu0 }
 0xe4a   :  { %v4254_v42 = vpop.f32.mrf.mxu1 }
 0xe4b   :  { %v4282_v35 = vpop.f32.mrf.mxu0 }
 0xe4c   :  { %v1830_v16 = vpop.f32.mrf.mxu1 }
 0xe4d   :  { %v2093_v62 = vpop.f32.mrf.mxu0 }
 0xe4e   :  { %v4259_v17 = vpop.f32.mrf.mxu1 }
 0xe4f   :  { %v1937_v43 = vadd.f32 %v4259_v17, %v4245_v27 }
 0xe50   :  { %v1931_v18 = vpop.f32.mrf.mxu1 }
 0xe51   :  { %v2103_v47 = vadd.f32 %v4273_v6, %v1937_v43  ;;  %v1932_v57 = vadd.f32 %v1931_v18, %v1800_v5 }
 0xe52   :  { %v4262_v3 = vpop.f32.mrf.mxu1 }
 0xe53   :  { %v2102_v2 = vadd.f32 %v2063_v33, %v1932_v57  ;;  %v1947_v21 = vadd.f32 %v4262_v3, %v4248_v8  ;;  %v2116_v59 = vadd.f32 %v3913_v20, %v2103_v47 }
 0xe54   :  { %v1941_v14 = vpop.f32.mrf.mxu1 }
 0xe55   :  { %v2115_v34 = vadd.f32 %v3913_v20, %v2102_v2  ;;  %v2105_v7 = vadd.f32 %v4276_v11, %v1947_v21  ;;  %v1942_v36 = vadd.f32 %v1941_v14, %v1810_v9  ;;  %v2124_v29 = vsel %vm1407_vm7, %v2116_v59, 0.0 }
 0xe56   :  { %v4265_v19 = vpop.f32.mrf.mxu1 }
 0xe57   :  { %v2123_v24 = vsel %vm1407_vm7, %v2115_v34, 0.0  ;;  %v2104_v25 = vadd.f32 %v2073_v41, %v1942_v36  ;;  %v1957_v55 = vadd.f32 %v4265_v19, %v4251_v10  ;;  %v2118_v26 = vadd.f32 %v3913_v20, %v2105_v7 }
 0xe58   :  { %v1951_v61 = vpop.f32.mrf.mxu1  ;;  %v2125_v32 = vadd.f32 %v2124_v29, %v2123_v24 }
 0xe59   :  { %v2117_v13 = vadd.f32 %v3913_v20, %v2104_v25  ;;  %v2107_v30 = vadd.f32 %v4279_v49, %v1957_v55  ;;  %v1952_v1 = vadd.f32 %v1951_v61, %v1820_v40  ;;  %v2128_v44 = vsel %vm1407_vm7, %v2118_v26, 0.0 }
 0xe5a   :  { %v4268_v12 = vpop.f32.mrf.mxu1 }
 0xe5b   :  { %v2126_v37 = vsel %vm1407_vm7, %v2117_v13, 0.0  ;;  %v2106_v38 = vadd.f32 %v2083_v46, %v1952_v1  ;;  %v1967_v23 = vadd.f32 %v4268_v12, %v4254_v42  ;;  %v2120_v63 = vadd.f32 %v3913_v20, %v2107_v30 }
 0xe5c   :  { %v2127_v45 = vadd.f32 %v2126_v37, %v2125_v32  ;;  %v1961_v50 = vpop.f32.mrf.mxu1 }
 0xe5d   :  { %v2119_v22 = vadd.f32 %v3913_v20, %v2106_v38  ;;  %v2109_v39 = vadd.f32 %v4282_v35, %v1967_v23  ;;  %v1962_v31 = vadd.f32 %v1961_v50, %v1830_v16  ;;  %v2132_v53 = vsel %vm1407_vm7, %v2120_v63, 0.0 }
 0xe5e   :  { %v2129_v48 = vadd.f32 %v2128_v44, %v2127_v45 }
 0xe5f   :  { %v2130_v51 = vsel %vm1407_vm7, %v2119_v22, 0.0  ;;  %v2108_v15 = vadd.f32 %v2093_v62, %v1962_v31  ;;  %v2122_v54 = vadd.f32 %v3913_v20, %v2109_v39 }
 0xe60   :  { %v2131_v52 = vadd.f32 %v2130_v51, %v2129_v48 }
 0xe61   :  { %v2121_v56 = vadd.f32 %v3913_v20, %v2108_v15  ;;  %v2136_v4 = vsel %vm1407_vm7, %v2122_v54, 0.0 }
 0xe62   :  { %v2133_v58 = vadd.f32 %v2132_v53, %v2131_v52 }
 0xe63   :  { %v2134_v28 = vsel %vm1407_vm7, %v2121_v56, 0.0 }
 0xe64   :  { %v2135_v60 = vadd.f32 %v2134_v28, %v2133_v58 }
 0xe66   :  { %v2137_v27 = vadd.f32 %v2136_v4, %v2135_v60 }
 0xe68   :  { %v2138_v5 = vrot.slane %v2137_v27, 4 }
 0xe6a   :  { %v2139_v6 = vadd.f32 %v2138_v5, %v2137_v27 }
 0xe6c   :  { %v2140_v8 = vrot.slane %v2139_v6, 2 }
 0xe6e   :  { %v2141_v9 = vadd.f32 %v2140_v8, %v2139_v6 }
 0xe70   :  { %v2142_v33 = vrot.slane %v2141_v9, 1 }
 0xe72   :  { %v2143_v10 = vadd.f32 %v2142_v33, %v2141_v9 }
 0xe74   :  { %v2144_v40 = vmul.f32 0.015625, %v2143_v10 }
 0xe76   :  { %v2145_v11 = vsub.f32 %v2115_v34, %v2144_v40  ;;  %v2146_v42 = vsub.f32 %v2116_v59, %v2144_v40  ;;  %v2147_v16 = vsub.f32 %v2117_v13, %v2144_v40  ;;  %v2148_v41 = vsub.f32 %v2118_v26, %v2144_v40 }
 0xe77   :  { %v2149_v17 = vsub.f32 %v2119_v22, %v2144_v40  ;;  %v2150_v57 = vsub.f32 %v2120_v63, %v2144_v40  ;;  %v2151_v21 = vsub.f32 %v2121_v56, %v2144_v40  ;;  %v2152_v34 = vsub.f32 %v2122_v54, %v2144_v40  ;;  %v3914_v22 = vld [vmem:[#allocation12 + $0x58] ss:$0 sm:$0xff]  ;;  %v3915_v54 = vld [vmem:[#allocation12 + $0x60] ss:$0 sm:$0xff] }
 0xe78   :  { %v2153_v43 = vmul.f32 %v2145_v11, %v2145_v11  ;;  %v2154_v18 = vmul.f32 %v2146_v42, %v2146_v42  ;;  %v2155_v47 = vmul.f32 %v2147_v16, %v2147_v16  ;;  %v2156_v49 = vmul.f32 %v2148_v41, %v2148_v41 }
 0xe79   :  { %v2157_v14 = vmul.f32 %v2149_v17, %v2149_v17  ;;  %v2158_v59 = vmul.f32 %v2150_v57, %v2150_v57  ;;  %v2159_v24 = vmul.f32 %v2151_v21, %v2151_v21  ;;  %v2160_v26 = vmul.f32 %v2152_v34, %v2152_v34 }
 0xe7a   :  { %v2161_v20 = vsel %vm1407_vm7, %v2153_v43, 0.0  ;;  %v2162_v3 = vsel %vm1407_vm7, %v2154_v18, 0.0  ;;  %v2164_v7 = vsel %vm1407_vm7, %v2155_v47, 0.0  ;;  %v2166_v46 = vsel %vm1407_vm7, %v2156_v49, 0.0 }
 0xe7b   :  { %v2163_v2 = vadd.f32 %v2162_v3, %v2161_v20  ;;  %v2168_v25 = vsel %vm1407_vm7, %v2157_v14, 0.0  ;;  %v2170_v61 = vsel %vm1407_vm7, %v2158_v59, 0.0  ;;  %v2172_v13 = vsel %vm1407_vm7, %v2159_v24, 0.0 }
 0xe7c   :  { %v2174_v1 = vsel %vm1407_vm7, %v2160_v26, 0.0 }
 0xe7d   :  { %v2165_v36 = vadd.f32 %v2164_v7, %v2163_v2 }
 0xe7f   :  { %v2167_v19 = vadd.f32 %v2166_v46, %v2165_v36 }
 0xe81   :  { %v2169_v55 = vadd.f32 %v2168_v25, %v2167_v19 }
 0xe83   :  { %v2171_v29 = vadd.f32 %v2170_v61, %v2169_v55 }
 0xe85   :  { %v2173_v30 = vadd.f32 %v2172_v13, %v2171_v29 }
 0xe87   :  { %v2175_v35 = vadd.f32 %v2174_v1, %v2173_v30 }
 0xe89   :  { %v2176_v32 = vrot.slane %v2175_v35, 4 }
 0xe8b   :  { %v2177_v12 = vadd.f32 %v2176_v32, %v2175_v35 }
 0xe8d   :  { %v2178_v37 = vrot.slane %v2177_v12, 2 }
 0xe8f   :  { %v2179_v38 = vadd.f32 %v2178_v37, %v2177_v12 }
 0xe91   :  { %v2180_v23 = vrot.slane %v2179_v38, 1 }
 0xe93   :  { %v2181_v44 = vadd.f32 %v2180_v23, %v2179_v38  ;;  %v5042_v23 = vld [vmem:[#allocation12 + $0x78] sm:$0xf] }
 0xe95   :  { %v2182_v45 = vmul.f32 0.015625, %v2181_v44  ;;  %v5044_v44 = vld [vmem:[#allocation12 + $0x80] ss:$0 sm:$0xff] }
 0xe97   :  { %v2183_v50 = vadd.f32 1e-05, %v2182_v45  ;;  %v3916_v45 = vld [vmem:[#allocation12 + $0x70] ss:$0 sm:$0xff] }
 0xe99   :  { %4445 = vrsqrt.f32 %v2183_v50 }
 0xea6   :  { %v4446_v63 = vpop.eup %4445 }
 0xea7   :  { %v2185_v39 = vmul.f32 %v4446_v63, %v2145_v11  ;;  %v2186_v31 = vmul.f32 %v4446_v63, %v2146_v42  ;;  %v2187_v62 = vmul.f32 %v4446_v63, %v2147_v16  ;;  %v2188_v48 = vmul.f32 %v4446_v63, %v2148_v41 }
 0xea8   :  { %v2189_v51 = vmul.f32 %v4446_v63, %v2149_v17  ;;  %v2190_v15 = vmul.f32 %v4446_v63, %v2150_v57  ;;  %v2191_v52 = vmul.f32 %v4446_v63, %v2151_v21  ;;  %v2192_v53 = vmul.f32 %v4446_v63, %v2152_v34 }
 0xea9   :  { %v2198_v56 = vmul.f32 %v3914_v22, %v2185_v39  ;;  %v2199_v58 = vmul.f32 %v3914_v22, %v2186_v31  ;;  %v2200_v28 = vmul.f32 %v3914_v22, %v2187_v62  ;;  %v2201_v60 = vmul.f32 %v3914_v22, %v2188_v48 }
 0xeaa   :  { %v2202_v4 = vmul.f32 %v3914_v22, %v2189_v51  ;;  %v2203_v27 = vmul.f32 %v3914_v22, %v2190_v15  ;;  %v2204_v5 = vmul.f32 %v3914_v22, %v2191_v52  ;;  %v2205_v6 = vmul.f32 %v3914_v22, %v2192_v53 }
 0xeab   :  { %v2211_v8 = vadd.f32 %v3915_v54, %v2198_v56  ;;  %v2212_v9 = vadd.f32 %v3915_v54, %v2199_v58  ;;  %v2213_v33 = vadd.f32 %v3915_v54, %v2200_v28  ;;  %v2214_v10 = vadd.f32 %v3915_v54, %v2201_v60 }
 0xeac   :  { %v2215_v40 = vadd.f32 %v3915_v54, %v2202_v4  ;;  %v2216_v11 = vadd.f32 %v3915_v54, %v2203_v27  ;;  %v2217_v42 = vadd.f32 %v3915_v54, %v2204_v5  ;;  %v2218_v16 = vadd.f32 %v3915_v54, %v2205_v6 }
 0xead   :  { %v2219_v41 = vmul.f32 0.01, %v2211_v8  ;;  %v2220_v17 = vmul.f32 0.01, %v2212_v9  ;;  %v2221_v43 = vmul.f32 0.01, %v2213_v33 }
 0xeae   :  { %v2222_v18 = vmul.f32 0.01, %v2214_v10  ;;  %v2223_v47 = vmul.f32 0.01, %v2215_v40  ;;  %v2224_v57 = vmul.f32 0.01, %v2216_v11 }
 0xeaf   :  { %v2225_v49 = vmul.f32 0.01, %v2217_v42  ;;  %v2226_v20 = vmul.f32 0.01, %v2218_v16  ;;  %v2227_v3 = vmax.f32 %v2211_v8, %v2219_v41  ;;  %v2228_v2 = vmax.f32 %v2212_v9, %v2220_v17 }
 0xeb0   :  { %v2229_v21 = vmax.f32 %v2213_v33, %v2221_v43  ;;  %v2230_v14 = vmax.f32 %v2214_v10, %v2222_v18  ;;  %v2231_v7 = vmax.f32 %v2215_v40, %v2223_v47  ;;  %v2232_v36 = vmax.f32 %v2216_v11, %v2224_v57 }
 0xeb1   :  { %v2233_v34 = vmax.f32 %v2217_v42, %v2225_v49  ;;  %v2234_v59 = vmax.f32 %v2218_v16, %v2226_v20  ;;  %2235 = vst.msk [vmem:[#allocation4] sm:$0xff] %vm1407_vm7, %v2227_v3  ;;  %2236 = vst.msk [vmem:[#allocation4 + $0x8] sm:$0xff] %vm1407_vm7, %v2228_v2  ;;  %v5046_v15 = vmov 0.0  }
 0xeb2   :  { %2237 = vst.msk [vmem:[#allocation4 + $0x10] sm:$0xff] %vm1407_vm7, %v2229_v21  ;;  %2238 = vst.msk [vmem:[#allocation4 + $0x18] sm:$0xff] %vm1407_vm7, %v2230_v14 }
 0xeb3   :  { %2239 = vst.msk [vmem:[#allocation4 + $0x20] sm:$0xff] %vm1407_vm7, %v2231_v7  ;;  %2240 = vst.msk [vmem:[#allocation4 + $0x28] sm:$0xff] %vm1407_vm7, %v2232_v36 }
 0xeb4   :  { %2241 = vst.msk [vmem:[#allocation4 + $0x30] sm:$0xff] %vm1407_vm7, %v2233_v34  ;;  %2242 = vst.msk [vmem:[#allocation4 + $0x38] sm:$0xff] %vm1407_vm7, %v2234_v59 }
 0xeb9   :  { %v2243_v46 = vld [vmem:[#allocation4] ss:$4 sm:$0xff]  ;;  %v2245_v19 = vld [vmem:[#allocation4 + $0x2] ss:$4 sm:$0xff]  ;;  %v2252_v24 = vld [vmem:[#allocation4 + $0x1] ss:$4 sm:$0xff] }
 0xeba   :  { %v2247_v25 = vmax.f32 %v2243_v46, %v2245_v19  ;;  %v2254_v55 = vld [vmem:[#allocation4 + $0x3] ss:$4 sm:$0xff] }
 0xebb   :  { %v2244_v26 = vld [vmem:[#allocation4 + $0x20] ss:$4 sm:$0xff]  ;;  %v2246_v61 = vld [vmem:[#allocation4 + $0x22] ss:$4 sm:$0xff]  ;;  %v2256_v29 = vmax.f32 %v2252_v24, %v2254_v55  ;;  %v2253_v30 = vld [vmem:[#allocation4 + $0x21] ss:$4 sm:$0xff] }
 0xebc   :  { %v2248_v13 = vmax.f32 %v2244_v26, %v2246_v61  ;;  %v2255_v1 = vld [vmem:[#allocation4 + $0x23] ss:$4 sm:$0xff]  ;;  %2249 = vst [vmem:[#allocation6] ss:$2 sm:$0xff] %v2247_v25 }
 0xebd   :  { %v2257_v35 = vmax.f32 %v2253_v30, %v2255_v1  ;;  %2259 = vst [vmem:[#allocation6 + $0x1] ss:$2 sm:$0xff] %v2256_v29 }
 0xebe   :  { %2251 = vst [vmem:[#allocation6 + $0x10] ss:$2 sm:$0xff] %v2248_v13 }
 0xebf   :  { %2261 = vst [vmem:[#allocation6 + $0x11] ss:$2 sm:$0xff] %v2257_v35 }
 0xec4   :  { %v2262_v32 = vld [vmem:[#allocation6] sm:$0xff]  ;;  %v2263_v12 = vld [vmem:[#allocation6 + $0x8] sm:$0xff] }
 0xec5   :  { %4285 = vmatprep.mubr.msk.f32.mxu1 %vm1407_vm7, %v2262_v32 }
 0xec6   :  { %4286 = vmatmul.mubr.msk.f32.vlgmr.msra.gmra.mxu1 %vm1407_vm7, %v2263_v12  ;;  %v2264_v37 = vld [vmem:[#allocation6 + $0x10] sm:$0xff]  ;;  %v2265_v38 = vld [vmem:[#allocation6 + $0x18] sm:$0xff] }
 0xec7   :  { %4288 = vmatprep.mubr.msk.f32.mxu1 %vm1407_vm7, %v2264_v37 }
 0xeca   :  { %4289 = vmatmul.mubr.msk.f32.gmra.mxu1 %vm1407_vm7, %v2265_v38 }
 0xf86   :  { %v4287_v50 = vpop.f32.mrf.mxu1 }
 0xf87   :  { %v2359_v63 = vadd.f32 %v4287_v50, %v3916_v45 }
 0xf88   :  { %v2353_v22 = vpop.f32.mrf.mxu1 }
 0xf89   :  { %2374 = vst.msk [vmem:[#allocation7 + $0x8] sm:$0xff] %vm2372_vm9, %v2359_v63  ;;  %v2354_v39 = vadd.f32 %v3916_v45, %v2353_v22 }
 0xf8a   :  { %v4290_v31 = vpop.f32.mrf.mxu1 }
 0xf8b   :  { %2373 = vst.msk [vmem:[#allocation7] sm:$0xff] %vm2372_vm9, %v2354_v39  ;;  %v2369_v62 = vadd.f32 %v4290_v31, %v3916_v45 }
 0xf8c   :  { %v2363_v48 = vpop.f32.mrf.mxu1 }
 0xf8d   :  { %2376 = vst.msk [vmem:[#allocation7 + $0x18] sm:$0xff] %vm2372_vm9, %v2369_v62  ;;  %v2364_v51 = vadd.f32 %v3916_v45, %v2363_v48 }
 0xf8f   :  { %2375 = vst.msk [vmem:[#allocation7 + $0x10] sm:$0xff] %vm2372_vm9, %v2364_v51 }
 0xf90 LB: > { %v4538_v52 = vmov 0.0   ;;  %vm4539_vm10 = vmmov 0   ;;  %v2396_v53 = vrot.slane %v4523_v15, 6  ;;  %s4540_s26 = smov 124   ;;  %s4541_s27 = smov 8   ;;  %s4527_s25 = sphi %s5048_s25, %s2390_s25   ;;  %v4523_v15 = vphi %v5046_v15, %v2831_v15  }
 0xf91   : > { %4291 = vmatprep.subr.mxu0 %v4538_v52  ;;  %4293 = vmatprep.mubr.msk.f32.mxu0 %vm4539_vm10, %v4538_v52  ;;  %s4542_s28 = smov 120   ;;  %s3923_s29 = sshll.u32 %s4527_s25, 3 }
 0xf92   : > { %4292 = vmatpush3.msk.msra.mxu0 %vm719_vm5, %v5042_v23  ;;  %4296 = vmatprep.subr.mxu1 %v4538_v52  ;;  %s2393_s30 = scalar_lea.vmem [#allocation7], %s3923_s29  ;;  %s3780_s3 = scalar_lea.vmem [#allocation8], %s3923_s29 }
 0xf93   : > { %4297 = vmatpush3.msk.msra.mxu1 %vm719_vm5, %v5042_v23  ;;  %4298 = vmatprep.mubr.msk.f32.mxu1 %vm4539_vm10, %v4538_v52  ;;  %s2390_s25 = sadd.s32 1, %s4527_s25  }
 0xf94   : > { %2397 = vrot.lane.b32.xlu0 %v2396_v53, %s4540_s26  ;;  %4301 = vmatprep.subr.mxu0 %v4538_v52  ;;  %p2387_p6 = scmp.ge.s32.totalorder %s2390_s25, 4  }
 0xf95   : > { %4306 = vmatprep.subr.mxu1 %v4538_v52  ;;  %vm2843_vm11 = vcmask (%p2387_p6), 58368   ;;  %vm3173_vm12 = vcmask (%p2387_p6), 64512   ;;  %vm4543_vm13 = vmmov (%p2387_p6), 0   ;;  %s4544_s4 = smov (%p2387_p6), 24   ;;  %s4545_s5 = smov (%p2387_p6), 16   ;;  %vm3592_vm14 = vcmask (%p2387_p6), 130048  }
 0xf96   : > { %v5074_v4 = vld [vmem:[%s2393_s30] sm:$0xff]  ;;  %2845 = vst.msk [vmem:[#allocation10 + $0x18] sm:$0x3] (%p2387_p6), %vm2843_vm11, %v4532_v0  ;;  %2844 = vst.msk [vmem:[#allocation10 + $0x6] sm:$0x3] (%p2387_p6), %vm2843_vm11, %v4532_v0  ;;  %vm3594_vm15 = vcmask (%p2387_p6), 195584  }
 0xf97   :  { %vm3605_vm0 = vcmask (%p2387_p6), 261120  }
 0xf98   : > { %2482 = vrot.lane.b32.xlu0 %v5044_v44, %s4541_s27 }
0x1006   : > { %v2398_v54 = vpop.permute.xlu0 %2397 }
0x1007   : > { %4294 = vmatmul.mubr.msk.f32.vlgmr.msra.gmra.mxu0 %vm1407_vm7, %v2398_v54 }
0x1008   : > { %4302 = vmatpush3.msk.msra.mxu0 %vm719_vm5, %v5042_v23  ;;  %4303 = vmatprep.mubr.msk.f32.mxu0 %vm4539_vm10, %v4538_v52 }
0x100a   : > { %v5067_v56 = vpop.permute.xlu0 %2482 }
0x10c7   : > { %v2470_v58 = vpop.f32.mrf.mxu0 }
0x10c8   : > { %v2485_v28 = vadd.f32 %v5067_v56, %v2470_v58  ;;  %v2474_v27 = vadd.f32 %v2470_v58, %v5074_v4 }
0x10c9   : > { %v4295_v60 = vpop.f32.mrf.mxu0 }
0x10ca   : > { %2487 = vrot.lane.b32.xlu1 %v2485_v28, %s4542_s28  ;;  %v3926_v5 = vmul.f32 -1.442695, %v2474_v27 }
0x10cc   : > { %4447 = vpow2.f32 %v3926_v5 }
0x10d9   : > { %v4448_v6 = vpop.eup %4447 }
0x10da   : > { %v2478_v8 = vadd.f32 1.0, %v4448_v6 }
0x10dc   : > { %4449 = vrcp.f32 %v2478_v8 }
0x10e9   : > { %v4450_v9 = vpop.eup %4449 }
0x10ea   : > { %v2497_v16 = vsub.f32 1.0, %v4450_v9  ;;  %v2504_v17 = vmul.f32 %v4450_v9, %v2396_v53 }
0x113c   : > { %v2488_v33 = vpop.permute.xlu1 %2487 }
0x113d   : > { %v2490_v10 = vmul.f32 %v4450_v9, %v2488_v33 }
0x113f   : > { %2492 = vrot.lane.b32.xlu1 %v2490_v10, %s4541_s27 }
0x11b1   : > { %v2493_v40 = vpop.permute.xlu1 %2492 }
0x11b2   : > { %v2495_v11 = vadd.f32 %v2493_v40, %v5074_v4 }
0x11b4   : > { %4451 = vtanh.f32 %v2495_v11 }
0x11c1   : > { %v4452_v42 = vpop.eup %4451 }
0x11c2   : > { %2499 = vrot.lane.b32.xlu0 %v4452_v42, %s4540_s26 }
0x1234   : > { %v2500_v41 = vpop.permute.xlu0 %2499 }
0x1235   : > { %v2502_v43 = vmul.f32 %v2500_v41, %v2497_v16 }
0x1237   : > { %v5080_v18 = vadd.f32 %v2504_v17, %v2502_v43 }
0x1239   : > { %2507 = vrot.lane.b32.xlu1 %v5080_v18, %s4540_s26  ;;  %v2610_v26 = vrot.slane %v5080_v18, 6 }
0x12ab   : > { %v2508_v47 = vpop.permute.xlu1 %2507 }
0x12ac   : > { %4299 = vmatmul.mubr.msk.f32.vlgmr.msra.gmra.mxu1 %vm1407_vm7, %v2508_v47 }
0x12ad   : > { %4307 = vmatpush3.msk.msra.mxu1 %vm719_vm5, %v5042_v23  ;;  %4308 = vmatprep.mubr.msk.f32.mxu1 %vm4539_vm10, %v4538_v52 }
0x136c   : > { %v2577_v57 = vpop.f32.mrf.mxu1 }
0x136d   : > { %v2591_v49 = vadd.f32 %v2577_v57, %v5067_v56  ;;  %v2582_v2 = vrot.slane %v2577_v57, 6 }
0x136e   : > { %v4300_v20 = vpop.f32.mrf.mxu1 }
0x136f   : > { %v2593_v3 = vrot.slane %v2591_v49, 6  ;;  %v2584_v21 = vadd.f32 %v2582_v2, %v5074_v4 }
0x1371   : > { %2594 = vrot.lane.b32.xlu0 %v2593_v3, %s4542_s28  ;;  %v3929_v14 = vmul.f32 -1.442695, %v2584_v21 }
0x1373   : > { %4453 = vpow2.f32 %v3929_v14 }
0x1380   : > { %v4454_v7 = vpop.eup %4453 }
0x1381   : > { %v2588_v36 = vadd.f32 1.0, %v4454_v7 }
0x1383   : > { %4455 = vrcp.f32 %v2588_v36 }
0x1390   : > { %v4456_v34 = vpop.eup %4455 }
0x1391   : > { %v2604_v55 = vsub.f32 1.0, %v4456_v34  ;;  %v2612_v13 = vmul.f32 %v4456_v34, %v2610_v26 }
0x13e3   : > { %v2595_v59 = vpop.permute.xlu0 %2594 }
0x13e4   : > { %v2597_v46 = vmul.f32 %v4456_v34, %v2595_v59 }
0x13e6   : > { %2599 = vrot.lane.b32.xlu1 %v2597_v46, %s4541_s27 }
0x1458   : > { %v2600_v19 = vpop.permute.xlu1 %2599 }
0x1459   : > { %v2602_v24 = vadd.f32 %v2600_v19, %v5074_v4 }
0x145b   : > { %4457 = vtanh.f32 %v2602_v24 }
0x1468   : > { %v4458_v25 = vpop.eup %4457 }
0x1469   : > { %2606 = vrot.lane.b32.xlu0 %v4458_v25, %s4540_s26 }
0x14db   : > { %v2607_v61 = vpop.permute.xlu0 %2606 }
0x14dc   : > { %v2609_v29 = vmul.f32 %v2607_v61, %v2604_v55  ;;  %v2847_v55 = vld [vmem:[#allocation12 + $0x90] sm:$0xf] (%p2387_p6) }
0x14de   : > { %v2613_v30 = vadd.f32 %v2612_v13, %v2609_v29 }
0x14e0   : > { %v2615_v1 = vrot.slane %v2613_v30, 2  ;;  %v2719_v54 = vrot.slane %v2613_v30, 6  ;;  %v2832_v5 = vsel %vm96_vm1, %v5080_v18, %v2613_v30  ;;  %vm3765_vm1 = vcmask (%p2387_p6), 1024  }
0x14e2   : > { %2616 = vrot.lane.b32.xlu1 %v2615_v1, %s4540_s26 }
0x1554   : > { %v2617_v35 = vpop.permute.xlu1 %2616 }
0x1555   : > { %4304 = vmatmul.mubr.msk.f32.vlgmr.msra.gmra.mxu0 %vm1407_vm7, %v2617_v35  ;;  %v3260_v35 = vld [vmem:[#allocation12 + $0xb8] sm:$0xff] (%p2387_p6) }
0x1615   : > { %v2686_v32 = vpop.f32.mrf.mxu0 }
0x1616   : > { %v2700_v12 = vadd.f32 %v2686_v32, %v5067_v56  ;;  %v2691_v45 = vrot.slane %v2686_v32, 4  ;;  %v3261_v32 = vld [vmem:[#allocation12 + $0xc0] sm:$0xff] (%p2387_p6) }
0x1617   : > { %v4305_v37 = vpop.f32.mrf.mxu0 }
0x1618   : > { %v2702_v38 = vrot.slane %v2700_v12, 4  ;;  %v2693_v50 = vadd.f32 %v2691_v45, %v5074_v4  ;;  %v5145_v12 = vld [vmem:[#allocation12 + $0xb0] sm:$0xff] (%p2387_p6) }
0x161a   : > { %2703 = vrot.lane.b32.xlu0 %v2702_v38, %s4542_s28  ;;  %v3932_v63 = vmul.f32 -1.442695, %v2693_v50 }
0x161c   : > { %4459 = vpow2.f32 %v3932_v63 }
0x1629   : > { %v4460_v22 = vpop.eup %4459 }
0x162a   : > { %v2697_v39 = vadd.f32 1.0, %v4460_v22 }
0x162c   : > { %4461 = vrcp.f32 %v2697_v39 }
0x1639   : > { %v4462_v31 = vpop.eup %4461 }
0x163a   : > { %v2713_v53 = vsub.f32 1.0, %v4462_v31  ;;  %v2721_v28 = vmul.f32 %v4462_v31, %v2719_v54 }
0x168c   : > { %v2704_v62 = vpop.permute.xlu0 %2703 }
0x168d   : > { %v2706_v48 = vmul.f32 %v4462_v31, %v2704_v62 }
0x168f   : > { %2708 = vrot.lane.b32.xlu1 %v2706_v48, %s4541_s27 }
0x1701   : > { %v2709_v51 = vpop.permute.xlu1 %2708 }
0x1702   : > { %v2711_v15 = vadd.f32 %v2709_v51, %v5074_v4 }
0x1704   : > { %4463 = vtanh.f32 %v2711_v15 }
0x1711   : > { %v4464_v52 = vpop.eup %4463 }
0x1712   : > { %2715 = vrot.lane.b32.xlu0 %v4464_v52, %s4540_s26  ;;  %v3953_v52 = vld [vmem:[#allocation12 + $0x98] ss:$0 sm:$0xff] (%p2387_p6) }
0x1784   : > { %v2716_v58 = vpop.permute.xlu0 %2715 }
0x1785   : > { %v2718_v60 = vmul.f32 %v2716_v58, %v2713_v53 }
0x1787   : > { %v2722_v27 = vadd.f32 %v2721_v28, %v2718_v60 }
0x1789   : > { %v2724_v6 = vrot.slane %v2722_v27, 4  ;;  %v2833_v8 = vsel %vm719_vm5, %v2832_v5, %v2722_v27  ;;  %v2828_v2 = vrot.slane %v2722_v27, 6 }
0x178b   : > { %2725 = vrot.lane.b32.xlu1 %v2724_v6, %s4540_s26 }
0x17fd   : > { %v2726_v9 = vpop.permute.xlu1 %2725 }
0x17fe   : > { %4309 = vmatmul.mubr.msk.f32.vlgmr.msra.gmra.mxu1 %vm1407_vm7, %v2726_v9 }
0x18be   : > { %v2795_v33 = vpop.f32.mrf.mxu1 }
0x18bf   : > { %v2809_v10 = vadd.f32 %v2795_v33, %v5067_v56  ;;  %v2800_v42 = vrot.slane %v2795_v33, 2 }
0x18c0   : > { %v4310_v40 = vpop.f32.mrf.mxu1 }
0x18c1   : > { %v2811_v11 = vrot.slane %v2809_v10, 2  ;;  %v2802_v16 = vadd.f32 %v2800_v42, %v5074_v4 }
0x18c3   : > { %2812 = vrot.lane.b32.xlu0 %v2811_v11, %s4542_s28  ;;  %v3935_v41 = vmul.f32 -1.442695, %v2802_v16 }
0x18c5   : > { %4465 = vpow2.f32 %v3935_v41 }
0x18d2   : > { %v4466_v17 = vpop.eup %4465 }
0x18d3   : > { %v2806_v43 = vadd.f32 1.0, %v4466_v17 }
0x18d5   : > { %4467 = vrcp.f32 %v2806_v43 }
0x18e2   : > { %v4468_v18 = vpop.eup %4467 }
0x18e3   : > { %v2822_v3 = vsub.f32 1.0, %v4468_v18  ;;  %v2830_v14 = vmul.f32 %v4468_v18, %v2828_v2 }
0x1935   : > { %v2813_v47 = vpop.permute.xlu0 %2812 }
0x1936   : > { %v2815_v57 = vmul.f32 %v4468_v18, %v2813_v47 }
0x1938   : > { %2817 = vrot.lane.b32.xlu1 %v2815_v57, %s4541_s27 }
0x19aa   : > { %v2818_v49 = vpop.permute.xlu1 %2817 }
0x19ab   : > { %v2820_v56 = vadd.f32 %v2818_v49, %v5074_v4  ;;  %v2846_v4 = vld [vmem:[#allocation12 + $0x88] sm:$0xff] (%p2387_p6) }
0x19ac   :  { %v2861_v19 = vrot.slane (%p2387_p6), %v2846_v4, 4  ;;  %4319 = vmatprep.subr.msk.mxu1 (%p2387_p6), %vm719_vm5, %v2846_v4 }
0x19ad   : > { %4469 = vtanh.f32 %v2820_v56  ;;  %4320 = vmatpush3.msk.msra.mxu1 (%p2387_p6), %vm719_vm5, %v2846_v4 }
0x19ae   :  { %4311 = vmatprep.subr.msk.mxu0 (%p2387_p6), %vm719_vm5, %v2861_v19  ;;  %4335 = vmatprep.subr.mxu1 (%p2387_p6), %v3260_v35 }
0x19af   :  { %4312 = vmatpush3.msk.msra.mxu0 (%p2387_p6), %vm719_vm5, %v2861_v19 }
0x19b0   :  { %4327 = vmatprep.subr.msk.mxu0 (%p2387_p6), %vm719_vm5, %v2847_v55 }
0x19ba   : > { %v4470_v20 = vpop.eup %4469 }
0x19bb   : > { %2824 = vrot.lane.b32.xlu0 %v4470_v20, %s4540_s26 }
0x1a2d   : > { %v2825_v21 = vpop.permute.xlu0 %2824 }
0x1a2e   : > { %v2827_v7 = vmul.f32 %v2825_v21, %v2822_v3 }
0x1a30   : > { %v2831_v15 = vadd.f32 %v2830_v14, %v2827_v7  }
0x1a32   : > { %v2835_v36 = vsel %vm721_vm6, %v2833_v8, %v2831_v15 }
0x1a33   : > { %2838 = vrot.lane.b32.xlu1 %v2835_v36, %s4540_s26 }
0x1aa2   :  { %2389 = sbr.rel (!%p2387_p6) target bundleno = 3984 (0xf90), region = 93 }
0x1aa5   : > { %v2839_v34 = vpop.permute.xlu1 %2838 }
0x1aa6   : > { %3937 = vst.msk [vmem:[%s3780_s3 + $0x8] sm:$0xff] %vm1407_vm7, %v2839_v34 }
0x1aad   :  { %v2852_v59 = vld [vmem:[#allocation8 + $0x8] sm:$0xff]  ;;  %v2853_v25 = vld [vmem:[#allocation8 + $0x10] sm:$0xff]  ;;  %v2854_v23 = vld [vmem:[#allocation8 + $0x18] sm:$0xff] }
0x1aae   :  { %v2848_v46 = vld [vmem:[#allocation8 + $0x6] sm:$0xff]  ;;  %4313 = vmatprep.mubr.msk.f32.mxu0 %vm1407_vm7, %v2852_v59  ;;  %v2849_v24 = vld [vmem:[#allocation8 + $0xe] sm:$0xff]  ;;  %v2850_v26 = vld [vmem:[#allocation8 + $0x16] sm:$0xff] }
0x1aaf   :  { %4321 = vmatprep.mubr.msk.f32.mxu1 %vm1407_vm7, %v2848_v46  ;;  %v2851_v44 = vld [vmem:[#allocation8 + $0x1e] sm:$0xff]  ;;  %4314 = vmatmul.mubr.msk.f32.vlgmr.msra.gmra.mxu0 %vm1407_vm7, %v2853_v25  ;;  %v2856_v29 = vld [vmem:[#allocation8 + $0xa] sm:$0xff]  ;;  %v2857_v13 = vld [vmem:[#allocation8 + $0x12] sm:$0xff] }
0x1ab0   :  { %4322 = vmatmul.mubr.msk.f32.vlgmr.msra.gmra.mxu1 %vm1407_vm7, %v2849_v24  ;;  %4328 = vmatpush3.msk.msra.mxu0 %vm719_vm5, %v2847_v55  ;;  %v2855_v61 = vld [vmem:[#allocation8 + $0x20] sm:$0xff] }
0x1ab1   :  { %4324 = vmatprep.mubr.msk.f32.mxu1 %vm1407_vm7, %v2850_v26  ;;  %4316 = vmatprep.mubr.msk.f32.mxu0 %vm1407_vm7, %v2854_v23  ;;  %v2858_v30 = vld [vmem:[#allocation8 + $0x1a] sm:$0xff]  ;;  %v2859_v1 = vld [vmem:[#allocation8 + $0x22] sm:$0xff] }
0x1ab2   :  { %4345 = vmatprep.subr.mxu0 %v3261_v32  ;;  %4336 = vmatpush3.msra.mxu1 %v3260_v35 }
0x1ab3   :  { %4317 = vmatmul.mubr.msk.f32.gmra.mxu0 %vm1407_vm7, %v2855_v61  ;;  %4340 = vmatprep.subr.mxu1 %v5145_v12 }
0x1ab4   :  { %4325 = vmatmul.mubr.msk.f32.gmra.mxu1 %vm1407_vm7, %v2851_v44  ;;  %4329 = vmatprep.mubr.msk.f32.mxu0 %vm1407_vm7, %v2856_v29 }
0x1ab7   :  { %4330 = vmatmul.mubr.msk.f32.vlgmr.msra.gmra.mxu0 %vm1407_vm7, %v2857_v13 }
0x1ab8   :  { %4332 = vmatprep.mubr.msk.f32.mxu0 %vm1407_vm7, %v2858_v30  ;;  %4346 = vmatpush3.msra.mxu0 %v3261_v32 }
0x1ab9   :  { %4361 = vmatprep.subr.mxu0 %v4532_v0 }
0x1abb   :  { %4333 = vmatmul.mubr.msk.f32.gmra.mxu0 %vm1407_vm7, %v2859_v1 }
0x1b6f   :  { %v4315_v38 = vpop.f32.mrf.mxu0 }
0x1b70   :  { %v4323_v37 = vpop.f32.mrf.mxu1 }
0x1b71   :  { %v2942_v45 = vpop.f32.mrf.mxu0  ;;  %v3047_v31 = vadd.f32 %v4323_v37, %v4315_v38  ;;  %v3954_v38 = vld [vmem:[#allocation12 + $0xa0] ss:$0 sm:$0xff] }
0x1b72   :  { %v3041_v50 = vpop.f32.mrf.mxu1 }
0x1b73   :  { %v4318_v63 = vpop.f32.mrf.mxu0  ;;  %v3042_v48 = vadd.f32 %v3041_v50, %v2942_v45 }
0x1b74   :  { %v4326_v22 = vpop.f32.mrf.mxu1 }
0x1b75   :  { %v2952_v39 = vpop.f32.mrf.mxu0  ;;  %v3057_v54 = vadd.f32 %v4326_v22, %v4318_v63 }
0x1b76   :  { %v3051_v15 = vpop.f32.mrf.mxu1 }
0x1b77   :  { %v4331_v62 = vpop.f32.mrf.mxu0  ;;  %v3052_v60 = vadd.f32 %v3051_v15, %v2952_v39  ;;  %v3955_v39 = vld [vmem:[#allocation12 + $0xa8] ss:$0 sm:$0xff] }
0x1b78   :  { %v3161_v51 = vadd.f32 %v4331_v62, %v3047_v31 }
0x1b79   :  { %v3141_v53 = vpop.f32.mrf.mxu0 }
0x1b7a   :  { %v3160_v58 = vadd.f32 %v3141_v53, %v3042_v48  ;;  %v3170_v27 = vadd.f32 %v3953_v52, %v3161_v51 }
0x1b7b   :  { %v4334_v28 = vpop.f32.mrf.mxu0 }
0x1b7c   :  { %v3169_v5 = vadd.f32 %v3953_v52, %v3160_v58  ;;  %v3163_v6 = vadd.f32 %v4334_v28, %v3057_v54  ;;  %v3175_v10 = vsel %vm3173_vm12, %v3170_v27, 0.0 }
0x1b7d   :  { %v3151_v8 = vpop.f32.mrf.mxu0 }
0x1b7e   :  { %v3174_v9 = vsel %vm3173_vm12, %v3169_v5, 0.0  ;;  %v3162_v33 = vadd.f32 %v3151_v8, %v3052_v60  ;;  %v3172_v40 = vadd.f32 %v3953_v52, %v3163_v6 }
0x1b7f   :  { %v3176_v42 = vadd.f32 %v3175_v10, %v3174_v9 }
0x1b80   :  { %v3171_v11 = vadd.f32 %v3953_v52, %v3162_v33  ;;  %v3179_v17 = vsel %vm3173_vm12, %v3172_v40, 0.0 }
0x1b82   :  { %v3177_v16 = vsel %vm3173_vm12, %v3171_v11, 0.0 }
0x1b83   :  { %v3178_v41 = vadd.f32 %v3177_v16, %v3176_v42 }
0x1b85   :  { %v3180_v43 = vadd.f32 %v3179_v17, %v3178_v41 }
0x1b87   :  { %v3181_v18 = vrot.slane %v3180_v43, 4 }
0x1b89   :  { %v3182_v47 = vadd.f32 %v3181_v18, %v3180_v43 }
0x1b8b   :  { %v3183_v57 = vrot.slane %v3182_v47, 2 }
0x1b8d   :  { %v3184_v49 = vadd.f32 %v3183_v57, %v3182_v47 }
0x1b8f   :  { %v3185_v56 = vrot.slane %v3184_v49, 1 }
0x1b91   :  { %v3186_v20 = vadd.f32 %v3185_v56, %v3184_v49  ;;  %v3599_v49 = vld [vmem:[#allocation12 + $0xf8] sm:$0xff] }
0x1b93   :  { %v3187_v3 = vmul.f32 0.03125, %v3186_v20 }
0x1b95   :  { %v3188_v2 = vsub.f32 %v3169_v5, %v3187_v3  ;;  %v3189_v21 = vsub.f32 %v3170_v27, %v3187_v3  ;;  %v3190_v14 = vsub.f32 %v3171_v11, %v3187_v3  ;;  %v3191_v7 = vsub.f32 %v3172_v40, %v3187_v3 }
0x1b97   :  { %v3192_v36 = vmul.f32 %v3188_v2, %v3188_v2  ;;  %v3193_v34 = vmul.f32 %v3189_v21, %v3189_v21  ;;  %v3194_v4 = vmul.f32 %v3190_v14, %v3190_v14  ;;  %v3195_v59 = vmul.f32 %v3191_v7, %v3191_v7 }
0x1b99   :  { %v3196_v46 = vsel %vm3173_vm12, %v3192_v36, 0.0  ;;  %v3197_v19 = vsel %vm3173_vm12, %v3193_v34, 0.0  ;;  %v3199_v25 = vsel %vm3173_vm12, %v3194_v4, 0.0  ;;  %v3201_v26 = vsel %vm3173_vm12, %v3195_v59, 0.0 }
0x1b9a   :  { %v3198_v24 = vadd.f32 %v3197_v19, %v3196_v46 }
0x1b9c   :  { %v3200_v55 = vadd.f32 %v3199_v25, %v3198_v24 }
0x1b9e   :  { %v3202_v23 = vadd.f32 %v3201_v26, %v3200_v55 }
0x1ba0   :  { %v3203_v44 = vrot.slane %v3202_v23, 4 }
0x1ba2   :  { %v3204_v61 = vadd.f32 %v3203_v44, %v3202_v23 }
0x1ba4   :  { %v3205_v29 = vrot.slane %v3204_v61, 2 }
0x1ba6   :  { %v3206_v13 = vadd.f32 %v3205_v29, %v3204_v61 }
0x1ba8   :  { %v3207_v30 = vrot.slane %v3206_v13, 1 }
0x1baa   :  { %v3208_v1 = vadd.f32 %v3207_v30, %v3206_v13 }
0x1bac   :  { %v3209_v35 = vmul.f32 0.03125, %v3208_v1 }
0x1bae   :  { %v3210_v32 = vadd.f32 1e-05, %v3209_v35 }
0x1bb0   :  { %4471 = vrsqrt.f32 %v3210_v32 }
0x1bbd   :  { %v4472_v37 = vpop.eup %4471 }
0x1bbe   :  { %v3212_v45 = vmul.f32 %v4472_v37, %v3188_v2  ;;  %v3213_v50 = vmul.f32 %v4472_v37, %v3189_v21  ;;  %v3214_v63 = vmul.f32 %v4472_v37, %v3190_v14  ;;  %v3215_v22 = vmul.f32 %v4472_v37, %v3191_v7  ;;  %v3962_v14 = vld [vmem:[#allocation12 + $0xc8] ss:$0 sm:$0xff] }
0x1bc0   :  { %v3221_v31 = vmul.f32 %v3954_v38, %v3212_v45  ;;  %v3222_v62 = vmul.f32 %v3954_v38, %v3213_v50  ;;  %v3223_v48 = vmul.f32 %v3954_v38, %v3214_v63  ;;  %v3224_v51 = vmul.f32 %v3954_v38, %v3215_v22 }
0x1bc2   :  { %v3230_v15 = vadd.f32 %v3955_v39, %v3221_v31  ;;  %v3231_v52 = vadd.f32 %v3955_v39, %v3222_v62  ;;  %v3232_v53 = vadd.f32 %v3955_v39, %v3223_v48  ;;  %v3233_v54 = vadd.f32 %v3955_v39, %v3224_v51 }
0x1bc4   :  { %v3234_v58 = vmul.f32 0.01, %v3230_v15  ;;  %v3235_v28 = vmul.f32 0.01, %v3231_v52  ;;  %v3236_v60 = vmul.f32 0.01, %v3232_v53 }
0x1bc5   :  { %v3237_v27 = vmul.f32 0.01, %v3233_v54 }
0x1bc6   :  { %v3238_v5 = vmax.f32 %v3230_v15, %v3234_v58  ;;  %v3239_v6 = vmax.f32 %v3231_v52, %v3235_v28  ;;  %v3240_v8 = vmax.f32 %v3232_v53, %v3236_v60  ;;  %v3963_v52 = vld [vmem:[#allocation12 + $0xd0] ss:$0 sm:$0xff]  ;;  %v3964_v58 = vld [vmem:[#allocation12 + $0xd8] ss:$0 sm:$0xff] }
0x1bc7   :  { %v3241_v9 = vmax.f32 %v3233_v54, %v3237_v27 }
0x1bc8   :  { %3242 = vst.msk [vmem:[#allocation9] sm:$0xff] %vm3173_vm12, %v3238_v5  ;;  %3243 = vst.msk [vmem:[#allocation9 + $0x8] sm:$0xff] %vm3173_vm12, %v3239_v6 }
0x1bc9   :  { %3244 = vst.msk [vmem:[#allocation9 + $0x10] sm:$0xff] %vm3173_vm12, %v3240_v8  ;;  %3245 = vst.msk [vmem:[#allocation9 + $0x18] sm:$0xff] %vm3173_vm12, %v3241_v9 }
0x1bd0   :  { %v3246_v33 = vld [vmem:[#allocation9] ss:$4 sm:$0xff]  ;;  %v3248_v10 = vld [vmem:[#allocation9 + $0x2] ss:$4 sm:$0xff]  ;;  %v3253_v40 = vld [vmem:[#allocation9 + $0x1] ss:$4 sm:$0xff] }
0x1bd1   :  { %v3249_v11 = vmax.f32 %v3246_v33, %v3248_v10  ;;  %v3255_v42 = vld [vmem:[#allocation9 + $0x3] ss:$4 sm:$0xff] }
0x1bd2   :  { %v3256_v16 = vmax.f32 %v3253_v40, %v3255_v42 }
0x1bd3   :  { %3251 = vst [vmem:[#allocation10 + $0x8] ss:$2 sm:$0xff] %v3249_v11 }
0x1bd4   :  { %3258 = vst [vmem:[#allocation10 + $0x9] ss:$2 sm:$0xff] %v3256_v16 }
0x1bdb   :  { %v3264_v41 = vld [vmem:[#allocation10 + $0x8] sm:$0xff]  ;;  %v3265_v43 = vld [vmem:[#allocation10 + $0x10] sm:$0xff] }
0x1bdc   :  { %v3266_v17 = vld [vmem:[#allocation10 + $0xa] sm:$0xff]  ;;  %4337 = vmatprep.mubr.msk.f32.mxu1 %vm3173_vm12, %v3264_v41  ;;  %v3267_v18 = vld [vmem:[#allocation10 + $0x12] sm:$0xff] }
0x1bdd   :  { %4347 = vmatprep.mubr.msk.f32.mxu0 %vm3173_vm12, %v3266_v17  ;;  %4338 = vmatmul.mubr.msk.f32.vlgmr.msra.gmra.mxu1 %vm3173_vm12, %v3265_v43  ;;  %v3262_v47 = vld [vmem:[#allocation10 + $0x6] sm:$0xff]  ;;  %v3263_v57 = vld [vmem:[#allocation10 + $0xe] sm:$0xff]  ;;  %v3598_v17 = vld [vmem:[#allocation12 + $0xf0] sm:$0xff] }
0x1bde   :  { %4348 = vmatmul.mubr.msk.f32.vlgmr.msra.gmra.mxu0 %vm3173_vm12, %v3267_v18  ;;  %4341 = vmatpush3.msra.mxu1 %v5145_v12  ;;  %v3597_v43 = vld [vmem:[#allocation12 + $0xe8] sm:$0xff]  ;;  %v3596_v18 = vld [vmem:[#allocation12 + $0xe0] sm:$0xff] }
0x1bdf   :  { %4342 = vmatprep.mubr.msk.f32.mxu1 %vm3173_vm12, %v3262_v47  ;;  %4350 = vmatprep.subr.mxu1 %v4532_v0 }
0x1be0   :  { %4363 = vmatprep.mubr.msk.f32.mxu0 %vm4543_vm13, %v4532_v0 }
0x1be1   :  { %4343 = vmatmul.mubr.msk.f32.vlgmr.msra.gmra.mxu1 %vm3173_vm12, %v3263_v57 }
0x1be2   :  { %4351 = vmatpush3.msra.mxu1 %v3599_v49  ;;  %4358 = vmatprep.mubr.msk.f32.mxu1 %vm4543_vm13, %v4532_v0 }
0x1be3   :  { %4352 = vmatprep.subr.mxu1 %v4532_v0 }
0x1be4   :  { %4353 = vmatpush3.msra.mxu1 %v3598_v17 }
0x1be5   :  { %4354 = vmatprep.subr.mxu1 %v4532_v0 }
0x1be6   :  { %4355 = vmatpush3.msra.mxu1 %v3597_v43 }
0x1be7   :  { %4356 = vmatprep.subr.mxu1 %v4532_v0 }
0x1be8   :  { %4357 = vmatpush3.msra.mxu1 %v3596_v18 }
0x1c9d   :  { %v4339_v56 = vpop.f32.mrf.mxu1 }
0x1c9e   :  { %v4349_v3 = vpop.f32.mrf.mxu0 }
0x1c9f   :  { %v3340_v20 = vpop.f32.mrf.mxu1 }
0x1ca0   :  { %v3502_v34 = vpop.f32.mrf.mxu0 }
0x1ca1   :  { %v4344_v2 = vpop.f32.mrf.mxu1 }
0x1ca2   :  { %v3427_v21 = vadd.f32 %v4344_v2, %v4339_v56 }
0x1ca3   :  { %v3421_v7 = vpop.f32.mrf.mxu1 }
0x1ca4   :  { %v3512_v36 = vadd.f32 %v4349_v3, %v3427_v21  ;;  %v3422_v12 = vadd.f32 %v3421_v7, %v3340_v20  ;;  %v3681_v7 = vld [vmem:[#allocation12 + $0x108] sm:$0xf] }
0x1ca5   :  { %4362 = vmatpush3.msk.msra.mxu0 %vm719_vm5, %v3681_v7 }
0x1ca6   :  { %v3519_v4 = vadd.f32 %v3962_v14, %v3512_v36  ;;  %v3511_v59 = vadd.f32 %v3502_v34, %v3422_v12  ;;  %v3965_v36 = vld [vmem:[#allocation12 + $0x100] ss:$0 sm:$0xff] }
0x1ca8   :  { %v3518_v46 = vadd.f32 %v3962_v14, %v3511_v59  ;;  %v3521_v19 = vsel %vm3173_vm12, %v3519_v4, 0.0 }
0x1caa   :  { %v3520_v24 = vsel %vm3173_vm12, %v3518_v46, 0.0 }
0x1cab   :  { %v3522_v25 = vadd.f32 %v3521_v19, %v3520_v24  ;;  %v3967_v19 = vld [vmem:[#allocation12 + $0x110] ss:$0 sm:$0xff] }
0x1cad   :  { %v3523_v55 = vrot.slane %v3522_v25, 4 }
0x1caf   :  { %v3524_v26 = vadd.f32 %v3523_v55, %v3522_v25 }
0x1cb1   :  { %v3525_v23 = vrot.slane %v3524_v26, 2 }
0x1cb3   :  { %v3526_v44 = vadd.f32 %v3525_v23, %v3524_v26 }
0x1cb5   :  { %v3527_v61 = vrot.slane %v3526_v44, 1 }
0x1cb7   :  { %v3528_v29 = vadd.f32 %v3527_v61, %v3526_v44 }
0x1cb9   :  { %v3529_v13 = vmul.f32 0.0625, %v3528_v29 }
0x1cbb   :  { %v3530_v30 = vsub.f32 %v3518_v46, %v3529_v13  ;;  %v3531_v1 = vsub.f32 %v3519_v4, %v3529_v13 }
0x1cbd   :  { %v3532_v35 = vmul.f32 %v3530_v30, %v3530_v30  ;;  %v3533_v32 = vmul.f32 %v3531_v1, %v3531_v1 }
0x1cbf   :  { %v3534_v37 = vsel %vm3173_vm12, %v3532_v35, 0.0  ;;  %v3535_v38 = vsel %vm3173_vm12, %v3533_v32, 0.0 }
0x1cc0   :  { %v3536_v45 = vadd.f32 %v3535_v38, %v3534_v37 }
0x1cc2   :  { %v3537_v50 = vrot.slane %v3536_v45, 4 }
0x1cc4   :  { %v3538_v63 = vadd.f32 %v3537_v50, %v3536_v45 }
0x1cc6   :  { %v3539_v22 = vrot.slane %v3538_v63, 2 }
0x1cc8   :  { %v3540_v39 = vadd.f32 %v3539_v22, %v3538_v63 }
0x1cca   :  { %v3541_v31 = vrot.slane %v3540_v39, 1 }
0x1ccc   :  { %v3542_v62 = vadd.f32 %v3541_v31, %v3540_v39 }
0x1cce   :  { %v3543_v48 = vmul.f32 0.0625, %v3542_v62 }
0x1cd0   :  { %v3544_v51 = vadd.f32 1e-05, %v3543_v48 }
0x1cd2   :  { %4473 = vrsqrt.f32 %v3544_v51 }
0x1cdf   :  { %v4474_v15 = vpop.eup %4473 }
0x1ce0   :  { %v3546_v53 = vmul.f32 %v4474_v15, %v3530_v30  ;;  %v3547_v54 = vmul.f32 %v4474_v15, %v3531_v1 }
0x1ce2   :  { %v3553_v28 = vmul.f32 %v3963_v52, %v3546_v53  ;;  %v3554_v60 = vmul.f32 %v3963_v52, %v3547_v54 }
0x1ce4   :  { %v3560_v27 = vadd.f32 %v3964_v58, %v3553_v28  ;;  %v3561_v5 = vadd.f32 %v3964_v58, %v3554_v60 }
0x1ce6   :  { %v3562_v6 = vmul.f32 0.01, %v3560_v27  ;;  %v3563_v8 = vmul.f32 0.01, %v3561_v5 }
0x1ce8   :  { %v3564_v9 = vmax.f32 %v3560_v27, %v3562_v6  ;;  %v3565_v33 = vmax.f32 %v3561_v5, %v3563_v8 }
0x1cea   :  { %3566 = vst.msk [vmem:[#allocation9] sm:$0xff] %vm3173_vm12, %v3564_v9  ;;  %3567 = vst.msk [vmem:[#allocation9 + $0x8] sm:$0xff] %vm3173_vm12, %v3565_v33 }
0x1cf1   :  { %v3568_v10 = vld [vmem:[#allocation9] ss:$4 sm:$0xf]  ;;  %v3569_v40 = vld [vmem:[#allocation9 + $0x2] ss:$4 sm:$0xf] }
0x1cf2   :  { %v3570_v11 = vmax.f32 %v3568_v10, %v3569_v40  ;;  %v3572_v42 = vld [vmem:[#allocation9 + $0x1] ss:$4 sm:$0xf]  ;;  %v3573_v16 = vld [vmem:[#allocation9 + $0x3] ss:$4 sm:$0xf] }
0x1cf3   :  { %v3574_v41 = vmax.f32 %v3572_v42, %v3573_v16 }
0x1cf4   :  { %3571 = vst [vmem:[#allocation11] ss:$2 sm:$0xf] %v3570_v11 }
0x1cf5   :  { %3576 = vst [vmem:[#allocation11 + $0x1] ss:$2 sm:$0xf] %v3574_v41 }
0x1cfc   :  { %v3577_v47 = vld [vmem:[#allocation11] sm:$0xff] }
0x1cfd   :  { %v3587_v57 = vrot.slane %v3577_v47, 6  ;;  %v3579_v49 = vrot.slane %v3577_v47, 2  ;;  %v3583_v56 = vrot.slane %v3577_v47, 4 }
0x1cff   :  { %3588 = vrot.lane.b32.xlu1 %v3587_v57, %s4544_s4  ;;  %3580 = vrot.lane.b32.xlu0 %v3579_v49, %s4531_s13 }
0x1d03   :  { %3584 = vrot.lane.b32.xlu0 %v3583_v56, %s4545_s5 }
0x1d71   :  { %v3581_v20 = vpop.permute.xlu0 %3580  ;;  %v3589_v21 = vpop.permute.xlu1 %3588 }
0x1d72   :  { %v3591_v3 = vsel %vm3173_vm12, %v3577_v47, %v3581_v20 }
0x1d75   :  { %v3585_v2 = vpop.permute.xlu0 %3584 }
0x1d76   :  { %v3593_v14 = vsel %vm3592_vm14, %v3591_v3, %v3585_v2 }
0x1d77   :  { %v3595_v0 = vsel %vm3594_vm15, %v3593_v14, %v3589_v21 }
0x1d78   :  { %4359 = vmatmul.mubr.msk.f32.vlgmr.msra.gmra.mxu1 %vm3605_vm0, %v3595_v0 }
0x1e38   :  { %v3675_v12 = vpop.f32.mrf.mxu1 }
0x1e39   :  { %v3676_v34 = vadd.f32 %v3965_v36, %v3675_v12 }
0x1e3a   :  { %v4360_v4 = vpop.f32.mrf.mxu1 }
0x1e3b   :  { %v3679_v59 = vmul.f32 0.01, %v3676_v34 }
0x1e3d   :  { %v3680_v46 = vmax.f32 %v3676_v34, %v3679_v59 }
0x1e3f   :  { %4364 = vmatmul.mubr.msk.f32.vlgmr.msra.gmra.mxu0 %vm1407_vm7, %v3680_v46 }
0x1eff   :  { %v3759_v24 = vpop.f32.mrf.mxu0 }
0x1f00   :  { %v3760_v25 = vadd.f32 %v3967_v19, %v3759_v24 }
0x1f01   :  { %v4365_v55 = vpop.f32.mrf.mxu0 }
0x1f02   :  { %v3763_v26 = vmul.f32 0.01, %v3760_v25 }
0x1f04   :  { %v3764_v23 = vmax.f32 %v3760_v25, %v3763_v26 }
0x1f06   :  { %3766 = vst.msk [vmem:[%s5188_s2] sm:$0x3] %vm3765_vm1, %v3764_v23 }
0x1f07   :  { %3771 = vsyncpa [#allocation13], 1 }

</bundles_post_ra>
